<compile_context>
chip_gen: v7x
topology: tpu7x:2x2x1
jax: 0.10.0
libtpu: 0.0.40
codegen_flags: <defaults>
</compile_context>

<pallas_src>
import functools

import jax
import jax.numpy as jnp
from jax import lax
from jax.experimental import pallas as pl
from jax.experimental.pallas import tpu as pltpu

BN_EPS = 1e-5
LN_EPS = 1e-5
LANE = 128


# ----------------------------- small helpers --------------------------------

def _round_up(x, m):
    return ((x + m - 1) // m) * m


def _resident(shape):
    """BlockSpec for an array that stays fully resident across the 1-D grid."""
    nd = len(shape)
    return pl.BlockSpec(shape, lambda i, _nd=nd: (0,) * _nd)


def _choose_groups_per_tile(num_groups, group_size, max_tokens=512):
    """Pick groups-per-tile so the token tile is lane/sublane friendly.

    Prefers the largest tile whose token count is a multiple of 128 (fills the
    MXU M dim and amortizes per-grid-step overhead), then multiples of 8, then
    a single full-array tile (always a legal block).
    Note: on v7x a grid with >=2 balanced 'parallel' steps lets both
    TensorCores work; at these tiny demo shapes we keep one maximal tile.
    """
    divisors = [g for g in range(1, num_groups + 1) if num_groups % g == 0]
    cands = [g for g in divisors
             if g * group_size <= max_tokens and (g * group_size) % 8 == 0]
    if not cands:
        return num_groups
    lane_aligned = [g for g in cands if (g * group_size) % LANE == 0]
    return max(lane_aligned) if lane_aligned else max(cands)


# --------------------------------- kernel -----------------------------------

def fused_forward_kernel(num_layers, nhead, attn_seq, d_real, hd_real,
                         scale_ref, shift_ref, x_ref,
                         wqkv_ref, bqkv_ref, wo_ref, bo_ref,
                         ln1g_ref, ln1b_ref, w1_ref, b1_ref,
                         w2_ref, b2_ref, ln2g_ref, ln2b_ref,
                         fw_ref, fb_ref, o_ref):
    """BN-apply + `num_layers` post-norm encoder layers + final linear for one
    tile of attention groups (tokens are group-major; group size = attn_seq).

    Feature layout: the residual stream uses lanes [0, d_real) of d_pad;
    Q/K/V and the attention context use a per-head 128-padded layout so every
    head slice is a 128-aligned lane slice.  Padded lanes stay exactly zero.
    """
    tt, d_pad = x_ref.shape
    groups = tt // attn_seq
    hdp = wo_ref.shape[1] // nhead           # per-head padded dim (mult of 128)
    inv_d = 1.0 / float(d_real)
    att_scale = 1.0 / float(hd_real) ** 0.5

    lane_id = lax.broadcasted_iota(jnp.int32, (1, d_pad), 1)
    ln_mask = lane_id < d_real

    def layer_norm(y, gamma, beta):
        # Real-feature LayerNorm on a padded slab: padded lanes of y are 0 so
        # the mean is exact; variance masks them; gamma/beta pads are 0 so the
        # padded lanes stay 0 on output.
        mu = jnp.sum(y, axis=-1, keepdims=True) * inv_d
        yc = jnp.where(ln_mask, y - mu, 0.0)
        var = jnp.sum(yc * yc, axis=-1, keepdims=True) * inv_d
        return yc * lax.rsqrt(var + LN_EPS) * gamma + beta

    # Fused BatchNorm (batch stats folded into scale/shift in the wrapper).
    y = x_ref[...] * scale_ref[...] + shift_ref[...]          # (tt, d_pad) f32

    def encoder_layer(li, y):
        yb = y.astype(jnp.bfloat16)
        # ---- self-attention: one fused QKV matmul (K=d_pad, N=3*nhead*hdp).
        qkv = jnp.dot(yb, wqkv_ref[li],
                      preferred_element_type=jnp.float32) + bqkv_ref[li]

        ctx_parts = []
        for h in range(nhead):                                # static unroll
            # 128-aligned lane slices -> (groups, attn_seq, hdp) views.
            q = qkv[:, h * hdp:(h + 1) * hdp]
            k = qkv[:, (nhead + h) * hdp:(nhead + h + 1) * hdp]
            v = qkv[:, (2 * nhead + h) * hdp:(2 * nhead + h + 1) * hdp]
            q = q.reshape(groups, attn_seq, hdp).astype(jnp.bfloat16)
            k = k.reshape(groups, attn_seq, hdp).astype(jnp.bfloat16)
            v = v.reshape(groups, attn_seq, hdp).astype(jnp.bfloat16)
            # Block-diagonal attention: attn_seq x attn_seq scores per group,
            # batched over the tile's groups (no mask, no N x N buffers).
            s = jnp.einsum('gqc,gkc->gqk', q, k,
                           preferred_element_type=jnp.float32) * att_scale
            s = s - jnp.max(s, axis=-1, keepdims=True)
            p = jnp.exp(s)
            p = p / jnp.sum(p, axis=-1, keepdims=True)        # exact softmax
            ctx = jnp.einsum('gqk,gkc->gqc', p.astype(jnp.bfloat16), v,
                             preferred_element_type=jnp.float32)
            ctx_parts.append(ctx.reshape(tt, hdp).astype(jnp.bfloat16))

        # ONE fused output projection: (tt, nhead*hdp) @ (nhead*hdp, d_pad).
        ctx_all = jnp.concatenate(ctx_parts, axis=-1)
        attn = jnp.dot(ctx_all, wo_ref[li],
                       preferred_element_type=jnp.float32) + bo_ref[li]
        y = layer_norm(y + attn, ln1g_ref[li], ln1b_ref[li])

        # ---- feed-forward (ReLU); dropout = identity.
        h1 = jnp.maximum(
            jnp.dot(y.astype(jnp.bfloat16), w1_ref[li],
                    preferred_element_type=jnp.float32) + b1_ref[li], 0.0)
        h2 = jnp.dot(h1.astype(jnp.bfloat16), w2_ref[li],
                     preferred_element_type=jnp.float32) + b2_ref[li]
        y = layer_norm(y + h2, ln2g_ref[li], ln2b_ref[li])
        return y

    y = lax.fori_loop(0, num_layers, encoder_layer, y)

    # ---- final Linear(input_size, hidden_size) -----------------------------
    o_ref[...] = (jnp.dot(y.astype(jnp.bfloat16), fw_ref[...],
                          preferred_element_type=jnp.float32) + fb_ref[...])


# ----------------------------- params + padding -----------------------------

def init_params(key, input_size, hidden_size, num_layers):
    d, h, L = input_size, hidden_size, num_layers

    def dense(k, fan_in, shape):
        return (jax.random.normal(k, shape, jnp.float32)
                / jnp.sqrt(jnp.float32(fan_in)))

    keys = jax.random.split(key, L + 1)
    per_layer = []
    for li in range(L):
        ks = jax.random.split(keys[li], 6)
        per_layer.append(dict(
            wq=dense(ks[0], d, (d, d)), wk=dense(ks[1], d, (d, d)),
            wv=dense(ks[2], d, (d, d)), wo=dense(ks[3], d, (d, d)),
            w1=dense(ks[4], d, (d, h)), w2=dense(ks[5], h, (h, d))))
    stack = lambda name: jnp.stack([lyr[name] for lyr in per_layer])
    zeros = lambda shape: jnp.zeros(shape, jnp.float32)
    ones = lambda shape: jnp.ones(shape, jnp.float32)
    return dict(
        bn_g=ones((d,)), bn_b=zeros((d,)),
        wq=stack("wq"), wk=stack("wk"), wv=stack("wv"),
        bq=zeros((L, d)), bk=zeros((L, d)), bv=zeros((L, d)),
        wo=stack("wo"), bo=zeros((L, d)),
        ln1_g=ones((L, d)), ln1_b=zeros((L, d)),
        w1=stack("w1"), b1=zeros((L, h)),
        w2=stack("w2"), b2=zeros((L, d)),
        ln2_g=ones((L, d)), ln2_b=zeros((L, d)),
        ffc_w=dense(keys[-1], d, (d, h)), ffc_b=zeros((h,)),
    )


def _pad_params(params, *, nhead, d_pad, h_pad, hdp):
    """Zero-pad / permute real weights into the lane-dense kernel layout.

    Q/K/V columns and output-projection rows for head h land at offset h*hdp
    (hdp a multiple of 128) so all in-kernel head slices are 128-aligned.
    Matmul weights are cast to bf16; biases / LN params stay f32.
    """
    L, d, _ = params["wq"].shape
    h = params["w1"].shape[-1]
    hd = d // nhead

    def pad_mat(w, rows, cols):            # (L, a, b) -> (L, rows, cols)
        return jnp.pad(w, ((0, 0), (0, rows - w.shape[1]),
                           (0, cols - w.shape[2])))

    def pad_vec(b, cols):                  # (L, a) -> (L, 1, cols)
        return jnp.pad(b, ((0, 0), (0, cols - b.shape[1])))[:, None, :]

    def head_cols(w, b):                   # per-head padded output columns
        w = w.reshape(L, d, nhead, hd)
        w = jnp.pad(w, ((0, 0), (0, d_pad - d), (0, 0), (0, hdp - hd)))
        w = w.reshape(L, d_pad, nhead * hdp)
        b = b.reshape(L, nhead, hd)
        b = jnp.pad(b, ((0, 0), (0, 0), (0, hdp - hd)))
        return w, b.reshape(L, 1, nhead * hdp)

    wq, bq = head_cols(params["wq"], params["bq"])
    wk, bk = head_cols(params["wk"], params["bk"])
    wv, bv = head_cols(params["wv"], params["bv"])
    wqkv = jnp.concatenate([wq, wk, wv], axis=-1).astype(jnp.bfloat16)
    bqkv = jnp.concatenate([bq, bk, bv], axis=-1)

    wo = params["wo"].reshape(L, nhead, hd, d)
    wo = jnp.pad(wo, ((0, 0), (0, 0), (0, hdp - hd), (0, d_pad - d)))
    wo = wo.reshape(L, nhead * hdp, d_pad).astype(jnp.bfloat16)

    return dict(
        wqkv=wqkv, bqkv=bqkv, wo=wo, bo=pad_vec(params["bo"], d_pad),
        ln1_g=pad_vec(params["ln1_g"], d_pad),
        ln1_b=pad_vec(params["ln1_b"], d_pad),
        w1=pad_mat(params["w1"], d_pad, h_pad).astype(jnp.bfloat16),
        b1=pad_vec(params["b1"], h_pad),
        w2=pad_mat(params["w2"], h_pad, d_pad).astype(jnp.bfloat16),
        b2=pad_vec(params["b2"], d_pad),
        ln2_g=pad_vec(params["ln2_g"], d_pad),
        ln2_b=pad_vec(params["ln2_b"], d_pad),
        ffc_w=jnp.pad(params["ffc_w"],
                      ((0, d_pad - d), (0, h_pad - h))).astype(jnp.bfloat16),
        ffc_b=jnp.pad(params["ffc_b"], (0, h_pad - h))[None, :],
    )


WEIGHT_ORDER = ("wqkv", "bqkv", "wo", "bo", "ln1_g", "ln1_b",
                "w1", "b1", "w2", "b2", "ln2_g", "ln2_b", "ffc_w", "ffc_b")


# --------------------------------- wrapper ----------------------------------

def transformer_forward(x, params, *, nhead):
    """x: (bsz, seq_len, input_size) f32 -> (bsz, seq_len, hidden_size) f32."""
    bsz, seq_len, d = x.shape
    n = bsz * seq_len
    hidden = params["ffc_w"].shape[-1]
    num_layers = params["wq"].shape[0]
    hd = d // nhead
    assert hd * nhead == d, "nhead must divide input_size"

    d_pad = _round_up(d, LANE)
    h_pad = _round_up(hidden, LANE)
    hdp = _round_up(hd, LANE)

    # Group-major token slab: group = seq position, attention sequence = bsz.
    xt = jnp.transpose(x, (1, 0, 2)).reshape(n, d).astype(jnp.float32)

    # BatchNorm1d batch statistics in the wrapper (two-pass, biased variance),
    # folded into a per-feature (scale, shift) affine for the kernel.
    mean = jnp.mean(xt, axis=0)
    var = jnp.mean(jnp.square(xt - mean), axis=0)
    scale = params["bn_g"] * lax.rsqrt(var + BN_EPS)
    shift = params["bn_b"] - mean * scale
    bn_scale = jnp.pad(scale, (0, d_pad - d))[None, :]        # (1, d_pad)
    bn_shift = jnp.pad(shift, (0, d_pad - d))[None, :]

    xt_p = jnp.pad(xt, ((0, 0), (0, d_pad - d)))              # (n, d_pad)

    padded = _pad_params(params, nhead=nhead, d_pad=d_pad, h_pad=h_pad, hdp=hdp)
    weights = [padded[name] for name in WEIGHT_ORDER]

    gt = _choose_groups_per_tile(seq_len, bsz)
    tt = gt * bsz
    n_tiles = seq_len // gt

    out = pl.pallas_call(
        functools.partial(fused_forward_kernel, num_layers, nhead, bsz, d, hd),
        grid=(n_tiles,),
        in_specs=([_resident((1, d_pad)), _resident((1, d_pad)),
                   pl.BlockSpec((tt, d_pad), lambda i: (i, 0))]
                  + [_resident(w.shape) for w in weights]),
        out_specs=pl.BlockSpec((tt, h_pad), lambda i: (i, 0)),
        out_shape=jax.ShapeDtypeStruct((n, h_pad), jnp.float32),
        compiler_params=pltpu.CompilerParams(
            dimension_semantics=("parallel",),
            vmem_limit_bytes=48 * 1024 * 1024),
    )(bn_scale, bn_shift, xt_p, *weights)

    out = out[:, :hidden]                                     # drop lane pad
    return jnp.transpose(out.reshape(seq_len, bsz, hidden), (1, 0, 2))


# ----------------------------------- main ------------------------------------

if __name__ == "__main__":
    BSZ, SEQ, D_MODEL, HIDDEN, NHEAD, NLAYERS = 2, 8, 32, 64, 4, 2

    key = jax.random.PRNGKey(0)
    kx, kp = jax.random.split(key)
    x = jax.random.normal(kx, (BSZ, SEQ, D_MODEL), jnp.float32)
    params = init_params(kp, D_MODEL, HIDDEN, NLAYERS)

    out = transformer_forward(x, params, nhead=NHEAD)
    out = jax.block_until_ready(out)

    assert out.shape == (BSZ, SEQ, HIDDEN), out.shape
    assert out.dtype == jnp.float32
    assert bool(jnp.all(jnp.isfinite(out)))
    print("KERNEL_OK")
</pallas_src>

<mosaic_0001>
module attributes {stable_mosaic.version = 11 : i64} {
  func.func @fused_forward_kernel(%arg0: i32, %arg1: memref<1x128xf32, #tpu.memory_space<vmem>>, %arg2: memref<1x128xf32, #tpu.memory_space<vmem>>, %arg3: memref<16x128xf32, #tpu.memory_space<vmem>>, %arg4: memref<2x128x1536xbf16, #tpu.memory_space<vmem>>, %arg5: memref<2x1x1536xf32, #tpu.memory_space<vmem>>, %arg6: memref<2x512x128xbf16, #tpu.memory_space<vmem>>, %arg7: memref<2x1x128xf32, #tpu.memory_space<vmem>>, %arg8: memref<2x1x128xf32, #tpu.memory_space<vmem>>, %arg9: memref<2x1x128xf32, #tpu.memory_space<vmem>>, %arg10: memref<2x128x128xbf16, #tpu.memory_space<vmem>>, %arg11: memref<2x1x128xf32, #tpu.memory_space<vmem>>, %arg12: memref<2x128x128xbf16, #tpu.memory_space<vmem>>, %arg13: memref<2x1x128xf32, #tpu.memory_space<vmem>>, %arg14: memref<2x1x128xf32, #tpu.memory_space<vmem>>, %arg15: memref<2x1x128xf32, #tpu.memory_space<vmem>>, %arg16: memref<128x128xbf16, #tpu.memory_space<vmem>>, %arg17: memref<1x128xf32, #tpu.memory_space<vmem>>, %arg18: memref<16x128xf32, #tpu.memory_space<vmem>>) attributes {dimension_semantics = [#tpu.dimension_semantics<parallel>], iteration_bounds = array<i64: 1>, scalar_prefetch = 0 : i64, scratch_operands = 0 : i64, tpu.core_type = #tpu.core_type<tc>, window_params = [{pipeline_mode = #tpu.pipeline_mode<synchronous>, transform_indices = @transform_0, window_bounds = array<i64: 1, 128>}, {pipeline_mode = #tpu.pipeline_mode<synchronous>, transform_indices = @transform_1, window_bounds = array<i64: 1, 128>}, {transform_indices = @transform_2, window_bounds = array<i64: 16, 128>}, {pipeline_mode = #tpu.pipeline_mode<synchronous>, transform_indices = @transform_3, window_bounds = array<i64: 2, 128, 1536>}, {pipeline_mode = #tpu.pipeline_mode<synchronous>, transform_indices = @transform_4, window_bounds = array<i64: 2, 1, 1536>}, {pipeline_mode = #tpu.pipeline_mode<synchronous>, transform_indices = @transform_5, window_bounds = array<i64: 2, 512, 128>}, {pipeline_mode = #tpu.pipeline_mode<synchronous>, transform_indices = @transform_6, window_bounds = array<i64: 2, 1, 128>}, {pipeline_mode = #tpu.pipeline_mode<synchronous>, transform_indices = @transform_7, window_bounds = array<i64: 2, 1, 128>}, {pipeline_mode = #tpu.pipeline_mode<synchronous>, transform_indices = @transform_8, window_bounds = array<i64: 2, 1, 128>}, {pipeline_mode = #tpu.pipeline_mode<synchronous>, transform_indices = @transform_9, window_bounds = array<i64: 2, 128, 128>}, {pipeline_mode = #tpu.pipeline_mode<synchronous>, transform_indices = @transform_10, window_bounds = array<i64: 2, 1, 128>}, {pipeline_mode = #tpu.pipeline_mode<synchronous>, transform_indices = @transform_11, window_bounds = array<i64: 2, 128, 128>}, {pipeline_mode = #tpu.pipeline_mode<synchronous>, transform_indices = @transform_12, window_bounds = array<i64: 2, 1, 128>}, {pipeline_mode = #tpu.pipeline_mode<synchronous>, transform_indices = @transform_13, window_bounds = array<i64: 2, 1, 128>}, {pipeline_mode = #tpu.pipeline_mode<synchronous>, transform_indices = @transform_14, window_bounds = array<i64: 2, 1, 128>}, {pipeline_mode = #tpu.pipeline_mode<synchronous>, transform_indices = @transform_15, window_bounds = array<i64: 128, 128>}, {pipeline_mode = #tpu.pipeline_mode<synchronous>, transform_indices = @transform_16, window_bounds = array<i64: 1, 128>}, {transform_indices = @transform_17, window_bounds = array<i64: 16, 128>}]} {
    %0 = tpu.iota {dimensions = array<i32: 1>} : vector<1x128xi32>
    %c32_i32 = arith.constant 32 : i32
    %1 = vector.broadcast %c32_i32 : i32 to vector<1x128xi32>
    %2 = arith.cmpi slt, %0, %1 : vector<1x128xi32>
    %c0 = arith.constant 0 : index
    %c0_0 = arith.constant 0 : index
    %3 = vector.load %arg3[%c0, %c0_0] : memref<16x128xf32, #tpu.memory_space<vmem>>, vector<16x128xf32>
    %c0_1 = arith.constant 0 : index
    %c0_2 = arith.constant 0 : index
    %4 = vector.load %arg1[%c0_1, %c0_2] : memref<1x128xf32, #tpu.memory_space<vmem>>, vector<1x128xf32>
    %5 = vector.broadcast %4 : vector<1x128xf32> to vector<16x128xf32>
    %6 = arith.mulf %3, %5 : vector<16x128xf32>
    %c0_3 = arith.constant 0 : index
    %c0_4 = arith.constant 0 : index
    %7 = vector.load %arg2[%c0_3, %c0_4] : memref<1x128xf32, #tpu.memory_space<vmem>>, vector<1x128xf32>
    %8 = vector.broadcast %7 : vector<1x128xf32> to vector<16x128xf32>
    %9 = arith.addf %6, %8 : vector<16x128xf32>
    %c0_i32 = arith.constant 0 : i32
    %c2_i32 = arith.constant 2 : i32
    %10 = arith.addi %c0_i32, %c2_i32 : i32
    %c1_i32 = arith.constant 1 : i32
    %11 = scf.for %arg19 = %c0_i32 to %10 step %c1_i32 iter_args(%arg20 = %9) -> (vector<16x128xf32>)  : i32 {
      %19 = arith.truncf %arg20 : vector<16x128xf32> to vector<16x128xbf16>
      %20 = arith.index_cast %arg19 : i32 to index
      %c0_12 = arith.constant 0 : index
      %c0_13 = arith.constant 0 : index
      %21 = vector.load %arg4[%20, %c0_12, %c0_13] : memref<2x128x1536xbf16, #tpu.memory_space<vmem>>, vector<1x128x1536xbf16>
      %22 = vector.shape_cast %21 : vector<1x128x1536xbf16> to vector<128x1536xbf16>
      %cst_14 = arith.constant dense<0.000000e+00> : vector<16x1536xf32>
      %23 = tpu.matmul %19, %22, %cst_14 {dimension_numbers = #tpu.dot_dimension_numbers<[1], [0], [0], [1], [0, 0, 1, 1], [], []>} : vector<16x128xbf16>, vector<128x1536xbf16>, vector<16x1536xf32> -> vector<16x1536xf32>
      %24 = arith.index_cast %arg19 : i32 to index
      %c0_15 = arith.constant 0 : index
      %c0_16 = arith.constant 0 : index
      %25 = vector.load %arg5[%24, %c0_15, %c0_16] : memref<2x1x1536xf32, #tpu.memory_space<vmem>>, vector<1x1x1536xf32>
      %26 = vector.shape_cast %25 : vector<1x1x1536xf32> to vector<1x1536xf32>
      %27 = vector.broadcast %26 : vector<1x1536xf32> to vector<16x1536xf32>
      %28 = arith.addf %23, %27 : vector<16x1536xf32>
      %29 = vector.extract_strided_slice %28 {offsets = [0, 0], sizes = [16, 128], strides = [1, 1]} : vector<16x1536xf32> to vector<16x128xf32>
      %30 = vector.extract_strided_slice %28 {offsets = [0, 512], sizes = [16, 128], strides = [1, 1]} : vector<16x1536xf32> to vector<16x128xf32>
      %31 = vector.extract_strided_slice %28 {offsets = [0, 1024], sizes = [16, 128], strides = [1, 1]} : vector<16x1536xf32> to vector<16x128xf32>
      %32 = vector.shape_cast %29 : vector<16x128xf32> to vector<8x2x128xf32>
      %33 = arith.truncf %32 : vector<8x2x128xf32> to vector<8x2x128xbf16>
      %34 = vector.shape_cast %30 : vector<16x128xf32> to vector<8x2x128xf32>
      %35 = arith.truncf %34 : vector<8x2x128xf32> to vector<8x2x128xbf16>
      %36 = vector.shape_cast %31 : vector<16x128xf32> to vector<8x2x128xf32>
      %37 = arith.truncf %36 : vector<8x2x128xf32> to vector<8x2x128xbf16>
      "tpu.trace_start"() <{level = 10 : i32, message = "gqc,gkc->gqk"}> : () -> ()
      %cst_17 = arith.constant dense<0.000000e+00> : vector<8x2x2xf32>
      %38 = tpu.matmul %33, %35, %cst_17 {dimension_numbers = #tpu.dot_dimension_numbers<[2], [2], [1], [1], [0, 0, 0, 1, 1, 1], [0], [0]>} : vector<8x2x128xbf16>, vector<8x2x128xbf16>, vector<8x2x2xf32> -> vector<8x2x2xf32>
      "tpu.trace_stop"() : () -> ()
      %cst_18 = arith.constant 0.353553385 : f32
      %39 = vector.broadcast %cst_18 : f32 to vector<8x2x2xf32>
      %40 = arith.mulf %38, %39 : vector<8x2x2xf32>
      %cst_19 = arith.constant dense<0xFF800000> : vector<8x2xf32>
      %41 = vector.multi_reduction <maximumf>, %40, %cst_19 [2] : vector<8x2x2xf32> to vector<8x2xf32>
      %42 = vector.shape_cast %41 : vector<8x2xf32> to vector<8x2x1xf32>
      %43 = vector.broadcast %42 : vector<8x2x1xf32> to vector<8x2x2xf32>
      %44 = arith.subf %40, %43 : vector<8x2x2xf32>
      %45 = math.exp %44 : vector<8x2x2xf32>
      %cst_20 = arith.constant dense<0.000000e+00> : vector<8x2xf32>
      %46 = vector.multi_reduction <add>, %45, %cst_20 [2] : vector<8x2x2xf32> to vector<8x2xf32>
      %47 = vector.shape_cast %46 : vector<8x2xf32> to vector<8x2x1xf32>
      %48 = vector.broadcast %47 : vector<8x2x1xf32> to vector<8x2x2xf32>
      %49 = arith.divf %45, %48 : vector<8x2x2xf32>
      %50 = arith.truncf %49 : vector<8x2x2xf32> to vector<8x2x2xbf16>
      "tpu.trace_start"() <{level = 10 : i32, message = "gqk,gkc->gqc"}> : () -> ()
      %cst_21 = arith.constant dense<0.000000e+00> : vector<8x2x128xf32>
      %51 = tpu.matmul %50, %37, %cst_21 {dimension_numbers = #tpu.dot_dimension_numbers<[2], [1], [1], [2], [0, 0, 0, 1, 1, 2], [0], [0]>} : vector<8x2x2xbf16>, vector<8x2x128xbf16>, vector<8x2x128xf32> -> vector<8x2x128xf32>
      "tpu.trace_stop"() : () -> ()
      %52 = vector.shape_cast %51 : vector<8x2x128xf32> to vector<16x128xf32>
      %53 = arith.truncf %52 : vector<16x128xf32> to vector<16x128xbf16>
      %54 = vector.extract_strided_slice %28 {offsets = [0, 128], sizes = [16, 128], strides = [1, 1]} : vector<16x1536xf32> to vector<16x128xf32>
      %55 = vector.extract_strided_slice %28 {offsets = [0, 640], sizes = [16, 128], strides = [1, 1]} : vector<16x1536xf32> to vector<16x128xf32>
      %56 = vector.extract_strided_slice %28 {offsets = [0, 1152], sizes = [16, 128], strides = [1, 1]} : vector<16x1536xf32> to vector<16x128xf32>
      %57 = vector.shape_cast %54 : vector<16x128xf32> to vector<8x2x128xf32>
      %58 = arith.truncf %57 : vector<8x2x128xf32> to vector<8x2x128xbf16>
      %59 = vector.shape_cast %55 : vector<16x128xf32> to vector<8x2x128xf32>
      %60 = arith.truncf %59 : vector<8x2x128xf32> to vector<8x2x128xbf16>
      %61 = vector.shape_cast %56 : vector<16x128xf32> to vector<8x2x128xf32>
      %62 = arith.truncf %61 : vector<8x2x128xf32> to vector<8x2x128xbf16>
      "tpu.trace_start"() <{level = 10 : i32, message = "gqc,gkc->gqk"}> : () -> ()
      %cst_22 = arith.constant dense<0.000000e+00> : vector<8x2x2xf32>
      %63 = tpu.matmul %58, %60, %cst_22 {dimension_numbers = #tpu.dot_dimension_numbers<[2], [2], [1], [1], [0, 0, 0, 1, 1, 1], [0], [0]>} : vector<8x2x128xbf16>, vector<8x2x128xbf16>, vector<8x2x2xf32> -> vector<8x2x2xf32>
      "tpu.trace_stop"() : () -> ()
      %cst_23 = arith.constant 0.353553385 : f32
      %64 = vector.broadcast %cst_23 : f32 to vector<8x2x2xf32>
      %65 = arith.mulf %63, %64 : vector<8x2x2xf32>
      %cst_24 = arith.constant dense<0xFF800000> : vector<8x2xf32>
      %66 = vector.multi_reduction <maximumf>, %65, %cst_24 [2] : vector<8x2x2xf32> to vector<8x2xf32>
      %67 = vector.shape_cast %66 : vector<8x2xf32> to vector<8x2x1xf32>
      %68 = vector.broadcast %67 : vector<8x2x1xf32> to vector<8x2x2xf32>
      %69 = arith.subf %65, %68 : vector<8x2x2xf32>
      %70 = math.exp %69 : vector<8x2x2xf32>
      %cst_25 = arith.constant dense<0.000000e+00> : vector<8x2xf32>
      %71 = vector.multi_reduction <add>, %70, %cst_25 [2] : vector<8x2x2xf32> to vector<8x2xf32>
      %72 = vector.shape_cast %71 : vector<8x2xf32> to vector<8x2x1xf32>
      %73 = vector.broadcast %72 : vector<8x2x1xf32> to vector<8x2x2xf32>
      %74 = arith.divf %70, %73 : vector<8x2x2xf32>
      %75 = arith.truncf %74 : vector<8x2x2xf32> to vector<8x2x2xbf16>
      "tpu.trace_start"() <{level = 10 : i32, message = "gqk,gkc->gqc"}> : () -> ()
      %cst_26 = arith.constant dense<0.000000e+00> : vector<8x2x128xf32>
      %76 = tpu.matmul %75, %62, %cst_26 {dimension_numbers = #tpu.dot_dimension_numbers<[2], [1], [1], [2], [0, 0, 0, 1, 1, 2], [0], [0]>} : vector<8x2x2xbf16>, vector<8x2x128xbf16>, vector<8x2x128xf32> -> vector<8x2x128xf32>
      "tpu.trace_stop"() : () -> ()
      %77 = vector.shape_cast %76 : vector<8x2x128xf32> to vector<16x128xf32>
      %78 = arith.truncf %77 : vector<16x128xf32> to vector<16x128xbf16>
      %79 = vector.extract_strided_slice %28 {offsets = [0, 256], sizes = [16, 128], strides = [1, 1]} : vector<16x1536xf32> to vector<16x128xf32>
      %80 = vector.extract_strided_slice %28 {offsets = [0, 768], sizes = [16, 128], strides = [1, 1]} : vector<16x1536xf32> to vector<16x128xf32>
      %81 = vector.extract_strided_slice %28 {offsets = [0, 1280], sizes = [16, 128], strides = [1, 1]} : vector<16x1536xf32> to vector<16x128xf32>
      %82 = vector.shape_cast %79 : vector<16x128xf32> to vector<8x2x128xf32>
      %83 = arith.truncf %82 : vector<8x2x128xf32> to vector<8x2x128xbf16>
      %84 = vector.shape_cast %80 : vector<16x128xf32> to vector<8x2x128xf32>
      %85 = arith.truncf %84 : vector<8x2x128xf32> to vector<8x2x128xbf16>
      %86 = vector.shape_cast %81 : vector<16x128xf32> to vector<8x2x128xf32>
      %87 = arith.truncf %86 : vector<8x2x128xf32> to vector<8x2x128xbf16>
      "tpu.trace_start"() <{level = 10 : i32, message = "gqc,gkc->gqk"}> : () -> ()
      %cst_27 = arith.constant dense<0.000000e+00> : vector<8x2x2xf32>
      %88 = tpu.matmul %83, %85, %cst_27 {dimension_numbers = #tpu.dot_dimension_numbers<[2], [2], [1], [1], [0, 0, 0, 1, 1, 1], [0], [0]>} : vector<8x2x128xbf16>, vector<8x2x128xbf16>, vector<8x2x2xf32> -> vector<8x2x2xf32>
      "tpu.trace_stop"() : () -> ()
      %cst_28 = arith.constant 0.353553385 : f32
      %89 = vector.broadcast %cst_28 : f32 to vector<8x2x2xf32>
      %90 = arith.mulf %88, %89 : vector<8x2x2xf32>
      %cst_29 = arith.constant dense<0xFF800000> : vector<8x2xf32>
      %91 = vector.multi_reduction <maximumf>, %90, %cst_29 [2] : vector<8x2x2xf32> to vector<8x2xf32>
      %92 = vector.shape_cast %91 : vector<8x2xf32> to vector<8x2x1xf32>
      %93 = vector.broadcast %92 : vector<8x2x1xf32> to vector<8x2x2xf32>
      %94 = arith.subf %90, %93 : vector<8x2x2xf32>
      %95 = math.exp %94 : vector<8x2x2xf32>
      %cst_30 = arith.constant dense<0.000000e+00> : vector<8x2xf32>
      %96 = vector.multi_reduction <add>, %95, %cst_30 [2] : vector<8x2x2xf32> to vector<8x2xf32>
      %97 = vector.shape_cast %96 : vector<8x2xf32> to vector<8x2x1xf32>
      %98 = vector.broadcast %97 : vector<8x2x1xf32> to vector<8x2x2xf32>
      %99 = arith.divf %95, %98 : vector<8x2x2xf32>
      %100 = arith.truncf %99 : vector<8x2x2xf32> to vector<8x2x2xbf16>
      "tpu.trace_start"() <{level = 10 : i32, message = "gqk,gkc->gqc"}> : () -> ()
      %cst_31 = arith.constant dense<0.000000e+00> : vector<8x2x128xf32>
      %101 = tpu.matmul %100, %87, %cst_31 {dimension_numbers = #tpu.dot_dimension_numbers<[2], [1], [1], [2], [0, 0, 0, 1, 1, 2], [0], [0]>} : vector<8x2x2xbf16>, vector<8x2x128xbf16>, vector<8x2x128xf32> -> vector<8x2x128xf32>
      "tpu.trace_stop"() : () -> ()
      %102 = vector.shape_cast %101 : vector<8x2x128xf32> to vector<16x128xf32>
      %103 = arith.truncf %102 : vector<16x128xf32> to vector<16x128xbf16>
      %104 = vector.extract_strided_slice %28 {offsets = [0, 384], sizes = [16, 128], strides = [1, 1]} : vector<16x1536xf32> to vector<16x128xf32>
      %105 = vector.extract_strided_slice %28 {offsets = [0, 896], sizes = [16, 128], strides = [1, 1]} : vector<16x1536xf32> to vector<16x128xf32>
      %106 = vector.extract_strided_slice %28 {offsets = [0, 1408], sizes = [16, 128], strides = [1, 1]} : vector<16x1536xf32> to vector<16x128xf32>
      %107 = vector.shape_cast %104 : vector<16x128xf32> to vector<8x2x128xf32>
      %108 = arith.truncf %107 : vector<8x2x128xf32> to vector<8x2x128xbf16>
      %109 = vector.shape_cast %105 : vector<16x128xf32> to vector<8x2x128xf32>
      %110 = arith.truncf %109 : vector<8x2x128xf32> to vector<8x2x128xbf16>
      %111 = vector.shape_cast %106 : vector<16x128xf32> to vector<8x2x128xf32>
      %112 = arith.truncf %111 : vector<8x2x128xf32> to vector<8x2x128xbf16>
      "tpu.trace_start"() <{level = 10 : i32, message = "gqc,gkc->gqk"}> : () -> ()
      %cst_32 = arith.constant dense<0.000000e+00> : vector<8x2x2xf32>
      %113 = tpu.matmul %108, %110, %cst_32 {dimension_numbers = #tpu.dot_dimension_numbers<[2], [2], [1], [1], [0, 0, 0, 1, 1, 1], [0], [0]>} : vector<8x2x128xbf16>, vector<8x2x128xbf16>, vector<8x2x2xf32> -> vector<8x2x2xf32>
      "tpu.trace_stop"() : () -> ()
      %cst_33 = arith.constant 0.353553385 : f32
      %114 = vector.broadcast %cst_33 : f32 to vector<8x2x2xf32>
      %115 = arith.mulf %113, %114 : vector<8x2x2xf32>
      %cst_34 = arith.constant dense<0xFF800000> : vector<8x2xf32>
      %116 = vector.multi_reduction <maximumf>, %115, %cst_34 [2] : vector<8x2x2xf32> to vector<8x2xf32>
      %117 = vector.shape_cast %116 : vector<8x2xf32> to vector<8x2x1xf32>
      %118 = vector.broadcast %117 : vector<8x2x1xf32> to vector<8x2x2xf32>
      %119 = arith.subf %115, %118 : vector<8x2x2xf32>
      %120 = math.exp %119 : vector<8x2x2xf32>
      %cst_35 = arith.constant dense<0.000000e+00> : vector<8x2xf32>
      %121 = vector.multi_reduction <add>, %120, %cst_35 [2] : vector<8x2x2xf32> to vector<8x2xf32>
      %122 = vector.shape_cast %121 : vector<8x2xf32> to vector<8x2x1xf32>
      %123 = vector.broadcast %122 : vector<8x2x1xf32> to vector<8x2x2xf32>
      %124 = arith.divf %120, %123 : vector<8x2x2xf32>
      %125 = arith.truncf %124 : vector<8x2x2xf32> to vector<8x2x2xbf16>
      "tpu.trace_start"() <{level = 10 : i32, message = "gqk,gkc->gqc"}> : () -> ()
      %cst_36 = arith.constant dense<0.000000e+00> : vector<8x2x128xf32>
      %126 = tpu.matmul %125, %112, %cst_36 {dimension_numbers = #tpu.dot_dimension_numbers<[2], [1], [1], [2], [0, 0, 0, 1, 1, 2], [0], [0]>} : vector<8x2x2xbf16>, vector<8x2x128xbf16>, vector<8x2x128xf32> -> vector<8x2x128xf32>
      "tpu.trace_stop"() : () -> ()
      %127 = vector.shape_cast %126 : vector<8x2x128xf32> to vector<16x128xf32>
      %128 = arith.truncf %127 : vector<16x128xf32> to vector<16x128xbf16>
      %129 = tpu.concatenate %53, %78, %103, %128 in 1 : vector<16x128xbf16>, vector<16x128xbf16>, vector<16x128xbf16>, vector<16x128xbf16> -> vector<16x512xbf16>
      %130 = arith.index_cast %arg19 : i32 to index
      %c0_37 = arith.constant 0 : index
      %c0_38 = arith.constant 0 : index
      %131 = vector.load %arg6[%130, %c0_37, %c0_38] : memref<2x512x128xbf16, #tpu.memory_space<vmem>>, vector<1x512x128xbf16>
      %132 = vector.shape_cast %131 : vector<1x512x128xbf16> to vector<512x128xbf16>
      %cst_39 = arith.constant dense<0.000000e+00> : vector<16x128xf32>
      %133 = tpu.matmul %129, %132, %cst_39 {dimension_numbers = #tpu.dot_dimension_numbers<[1], [0], [0], [1], [0, 0, 1, 1], [], []>} : vector<16x512xbf16>, vector<512x128xbf16>, vector<16x128xf32> -> vector<16x128xf32>
      %134 = arith.index_cast %arg19 : i32 to index
      %c0_40 = arith.constant 0 : index
      %c0_41 = arith.constant 0 : index
      %135 = vector.load %arg7[%134, %c0_40, %c0_41] : memref<2x1x128xf32, #tpu.memory_space<vmem>>, vector<1x1x128xf32>
      %136 = vector.shape_cast %135 : vector<1x1x128xf32> to vector<1x128xf32>
      %137 = vector.broadcast %136 : vector<1x128xf32> to vector<16x128xf32>
      %138 = arith.addf %133, %137 : vector<16x128xf32>
      %139 = arith.addf %arg20, %138 : vector<16x128xf32>
      %140 = arith.index_cast %arg19 : i32 to index
      %c0_42 = arith.constant 0 : index
      %c0_43 = arith.constant 0 : index
      %141 = vector.load %arg8[%140, %c0_42, %c0_43] : memref<2x1x128xf32, #tpu.memory_space<vmem>>, vector<1x1x128xf32>
      %142 = vector.shape_cast %141 : vector<1x1x128xf32> to vector<1x128xf32>
      %143 = arith.index_cast %arg19 : i32 to index
      %c0_44 = arith.constant 0 : index
      %c0_45 = arith.constant 0 : index
      %144 = vector.load %arg9[%143, %c0_44, %c0_45] : memref<2x1x128xf32, #tpu.memory_space<vmem>>, vector<1x1x128xf32>
      %145 = vector.shape_cast %144 : vector<1x1x128xf32> to vector<1x128xf32>
      %cst_46 = arith.constant dense<0.000000e+00> : vector<16xf32>
      %146 = vector.multi_reduction <add>, %139, %cst_46 [1] : vector<16x128xf32> to vector<16xf32>
      %147 = vector.shape_cast %146 : vector<16xf32> to vector<16x1xf32>
      %cst_47 = arith.constant 3.125000e-02 : f32
      %148 = vector.broadcast %cst_47 : f32 to vector<16x1xf32>
      %149 = arith.mulf %147, %148 : vector<16x1xf32>
      %150 = vector.broadcast %149 : vector<16x1xf32> to vector<16x128xf32>
      %151 = arith.subf %139, %150 : vector<16x128xf32>
      %cst_48 = arith.constant 0.000000e+00 : f32
      %152 = vector.shape_cast %2 : vector<1x128xi1> to vector<1x128xi1>
      %153 = vector.broadcast %152 : vector<1x128xi1> to vector<16x128xi1>
      %154 = vector.broadcast %cst_48 : f32 to vector<16x128xf32>
      %155 = arith.select %153, %151, %154 : vector<16x128xi1>, vector<16x128xf32>
      %156 = arith.mulf %155, %155 : vector<16x128xf32>
      %cst_49 = arith.constant dense<0.000000e+00> : vector<16xf32>
      %157 = vector.multi_reduction <add>, %156, %cst_49 [1] : vector<16x128xf32> to vector<16xf32>
      %158 = vector.shape_cast %157 : vector<16xf32> to vector<16x1xf32>
      %cst_50 = arith.constant 3.125000e-02 : f32
      %159 = vector.broadcast %cst_50 : f32 to vector<16x1xf32>
      %160 = arith.mulf %158, %159 : vector<16x1xf32>
      %cst_51 = arith.constant 9.99999974E-6 : f32
      %161 = vector.broadcast %cst_51 : f32 to vector<16x1xf32>
      %162 = arith.addf %160, %161 : vector<16x1xf32>
      %163 = math.rsqrt %162 : vector<16x1xf32>
      %164 = vector.broadcast %163 : vector<16x1xf32> to vector<16x128xf32>
      %165 = arith.mulf %155, %164 : vector<16x128xf32>
      %166 = vector.broadcast %142 : vector<1x128xf32> to vector<16x128xf32>
      %167 = arith.mulf %165, %166 : vector<16x128xf32>
      %168 = vector.broadcast %145 : vector<1x128xf32> to vector<16x128xf32>
      %169 = arith.addf %167, %168 : vector<16x128xf32>
      %170 = arith.truncf %169 : vector<16x128xf32> to vector<16x128xbf16>
      %171 = arith.index_cast %arg19 : i32 to index
      %c0_52 = arith.constant 0 : index
      %c0_53 = arith.constant 0 : index
      %172 = vector.load %arg10[%171, %c0_52, %c0_53] : memref<2x128x128xbf16, #tpu.memory_space<vmem>>, vector<1x128x128xbf16>
      %173 = vector.shape_cast %172 : vector<1x128x128xbf16> to vector<128x128xbf16>
      %cst_54 = arith.constant dense<0.000000e+00> : vector<16x128xf32>
      %174 = tpu.matmul %170, %173, %cst_54 {dimension_numbers = #tpu.dot_dimension_numbers<[1], [0], [0], [1], [0, 0, 1, 1], [], []>} : vector<16x128xbf16>, vector<128x128xbf16>, vector<16x128xf32> -> vector<16x128xf32>
      %175 = arith.index_cast %arg19 : i32 to index
      %c0_55 = arith.constant 0 : index
      %c0_56 = arith.constant 0 : index
      %176 = vector.load %arg11[%175, %c0_55, %c0_56] : memref<2x1x128xf32, #tpu.memory_space<vmem>>, vector<1x1x128xf32>
      %177 = vector.shape_cast %176 : vector<1x1x128xf32> to vector<1x128xf32>
      %178 = vector.broadcast %177 : vector<1x128xf32> to vector<16x128xf32>
      %179 = arith.addf %174, %178 : vector<16x128xf32>
      %cst_57 = arith.constant 0.000000e+00 : f32
      %180 = vector.broadcast %cst_57 : f32 to vector<16x128xf32>
      %181 = arith.maximumf %179, %180 : vector<16x128xf32>
      %182 = arith.truncf %181 : vector<16x128xf32> to vector<16x128xbf16>
      %183 = arith.index_cast %arg19 : i32 to index
      %c0_58 = arith.constant 0 : index
      %c0_59 = arith.constant 0 : index
      %184 = vector.load %arg12[%183, %c0_58, %c0_59] : memref<2x128x128xbf16, #tpu.memory_space<vmem>>, vector<1x128x128xbf16>
      %185 = vector.shape_cast %184 : vector<1x128x128xbf16> to vector<128x128xbf16>
      %cst_60 = arith.constant dense<0.000000e+00> : vector<16x128xf32>
      %186 = tpu.matmul %182, %185, %cst_60 {dimension_numbers = #tpu.dot_dimension_numbers<[1], [0], [0], [1], [0, 0, 1, 1], [], []>} : vector<16x128xbf16>, vector<128x128xbf16>, vector<16x128xf32> -> vector<16x128xf32>
      %187 = arith.index_cast %arg19 : i32 to index
      %c0_61 = arith.constant 0 : index
      %c0_62 = arith.constant 0 : index
      %188 = vector.load %arg13[%187, %c0_61, %c0_62] : memref<2x1x128xf32, #tpu.memory_space<vmem>>, vector<1x1x128xf32>
      %189 = vector.shape_cast %188 : vector<1x1x128xf32> to vector<1x128xf32>
      %190 = vector.broadcast %189 : vector<1x128xf32> to vector<16x128xf32>
      %191 = arith.addf %186, %190 : vector<16x128xf32>
      %192 = arith.addf %169, %191 : vector<16x128xf32>
      %193 = arith.index_cast %arg19 : i32 to index
      %c0_63 = arith.constant 0 : index
      %c0_64 = arith.constant 0 : index
      %194 = vector.load %arg14[%193, %c0_63, %c0_64] : memref<2x1x128xf32, #tpu.memory_space<vmem>>, vector<1x1x128xf32>
      %195 = vector.shape_cast %194 : vector<1x1x128xf32> to vector<1x128xf32>
      %196 = arith.index_cast %arg19 : i32 to index
      %c0_65 = arith.constant 0 : index
      %c0_66 = arith.constant 0 : index
      %197 = vector.load %arg15[%196, %c0_65, %c0_66] : memref<2x1x128xf32, #tpu.memory_space<vmem>>, vector<1x1x128xf32>
      %198 = vector.shape_cast %197 : vector<1x1x128xf32> to vector<1x128xf32>
      %cst_67 = arith.constant dense<0.000000e+00> : vector<16xf32>
      %199 = vector.multi_reduction <add>, %192, %cst_67 [1] : vector<16x128xf32> to vector<16xf32>
      %200 = vector.shape_cast %199 : vector<16xf32> to vector<16x1xf32>
      %cst_68 = arith.constant 3.125000e-02 : f32
      %201 = vector.broadcast %cst_68 : f32 to vector<16x1xf32>
      %202 = arith.mulf %200, %201 : vector<16x1xf32>
      %203 = vector.broadcast %202 : vector<16x1xf32> to vector<16x128xf32>
      %204 = arith.subf %192, %203 : vector<16x128xf32>
      %cst_69 = arith.constant 0.000000e+00 : f32
      %205 = vector.shape_cast %2 : vector<1x128xi1> to vector<1x128xi1>
      %206 = vector.broadcast %205 : vector<1x128xi1> to vector<16x128xi1>
      %207 = vector.broadcast %cst_69 : f32 to vector<16x128xf32>
      %208 = arith.select %206, %204, %207 : vector<16x128xi1>, vector<16x128xf32>
      %209 = arith.mulf %208, %208 : vector<16x128xf32>
      %cst_70 = arith.constant dense<0.000000e+00> : vector<16xf32>
      %210 = vector.multi_reduction <add>, %209, %cst_70 [1] : vector<16x128xf32> to vector<16xf32>
      %211 = vector.shape_cast %210 : vector<16xf32> to vector<16x1xf32>
      %cst_71 = arith.constant 3.125000e-02 : f32
      %212 = vector.broadcast %cst_71 : f32 to vector<16x1xf32>
      %213 = arith.mulf %211, %212 : vector<16x1xf32>
      %cst_72 = arith.constant 9.99999974E-6 : f32
      %214 = vector.broadcast %cst_72 : f32 to vector<16x1xf32>
      %215 = arith.addf %213, %214 : vector<16x1xf32>
      %216 = math.rsqrt %215 : vector<16x1xf32>
      %217 = vector.broadcast %216 : vector<16x1xf32> to vector<16x128xf32>
      %218 = arith.mulf %208, %217 : vector<16x128xf32>
      %219 = vector.broadcast %195 : vector<1x128xf32> to vector<16x128xf32>
      %220 = arith.mulf %218, %219 : vector<16x128xf32>
      %221 = vector.broadcast %198 : vector<1x128xf32> to vector<16x128xf32>
      %222 = arith.addf %220, %221 : vector<16x128xf32>
      scf.yield %222 : vector<16x128xf32>
    }
    %c2_i32_5 = arith.constant 2 : i32
    %12 = arith.truncf %11 : vector<16x128xf32> to vector<16x128xbf16>
    %c0_6 = arith.constant 0 : index
    %c0_7 = arith.constant 0 : index
    %13 = vector.load %arg16[%c0_6, %c0_7] : memref<128x128xbf16, #tpu.memory_space<vmem>>, vector<128x128xbf16>
    %cst = arith.constant dense<0.000000e+00> : vector<16x128xf32>
    %14 = tpu.matmul %12, %13, %cst {dimension_numbers = #tpu.dot_dimension_numbers<[1], [0], [0], [1], [0, 0, 1, 1], [], []>} : vector<16x128xbf16>, vector<128x128xbf16>, vector<16x128xf32> -> vector<16x128xf32>
    %c0_8 = arith.constant 0 : index
    %c0_9 = arith.constant 0 : index
    %15 = vector.load %arg17[%c0_8, %c0_9] : memref<1x128xf32, #tpu.memory_space<vmem>>, vector<1x128xf32>
    %16 = vector.broadcast %15 : vector<1x128xf32> to vector<16x128xf32>
    %17 = arith.addf %14, %16 : vector<16x128xf32>
    %c0_10 = arith.constant 0 : index
    %c0_11 = arith.constant 0 : index
    %18 = vector.load %arg18[%c0_10, %c0_11] : memref<16x128xf32, #tpu.memory_space<vmem>>, vector<16x128xf32>
    tpu.vector_store %arg18[%c0_10, %c0_11], %17 {strides = array<i32>} : memref<16x128xf32, #tpu.memory_space<vmem>>, vector<16x128xf32>,
    return
  }
  func.func @transform_0(%arg0: i32) -> (i32, i32) {
    %c0_i32 = arith.constant 0 : i32
    %c0_i32_0 = arith.constant 0 : i32
    %c0_i32_1 = arith.constant 0 : i32
    return %c0_i32, %c0_i32_0 : i32, i32
  }
  func.func @transform_1(%arg0: i32) -> (i32, i32) {
    %c0_i32 = arith.constant 0 : i32
    %c0_i32_0 = arith.constant 0 : i32
    %c0_i32_1 = arith.constant 0 : i32
    return %c0_i32, %c0_i32_0 : i32, i32
  }
  func.func @transform_2(%arg0: i32) -> (i32, i32) {
    %c0_i32 = arith.constant 0 : i32
    %c0_i32_0 = arith.constant 0 : i32
    return %arg0, %c0_i32 : i32, i32
  }
  func.func @transform_3(%arg0: i32) -> (i32, i32, i32) {
    %c0_i32 = arith.constant 0 : i32
    %c0_i32_0 = arith.constant 0 : i32
    %c0_i32_1 = arith.constant 0 : i32
    %c0_i32_2 = arith.constant 0 : i32
    return %c0_i32, %c0_i32_0, %c0_i32_1 : i32, i32, i32
  }
  func.func @transform_4(%arg0: i32) -> (i32, i32, i32) {
    %c0_i32 = arith.constant 0 : i32
    %c0_i32_0 = arith.constant 0 : i32
    %c0_i32_1 = arith.constant 0 : i32
    %c0_i32_2 = arith.constant 0 : i32
    return %c0_i32, %c0_i32_0, %c0_i32_1 : i32, i32, i32
  }
  func.func @transform_5(%arg0: i32) -> (i32, i32, i32) {
    %c0_i32 = arith.constant 0 : i32
    %c0_i32_0 = arith.constant 0 : i32
    %c0_i32_1 = arith.constant 0 : i32
    %c0_i32_2 = arith.constant 0 : i32
    return %c0_i32, %c0_i32_0, %c0_i32_1 : i32, i32, i32
  }
  func.func @transform_6(%arg0: i32) -> (i32, i32, i32) {
    %c0_i32 = arith.constant 0 : i32
    %c0_i32_0 = arith.constant 0 : i32
    %c0_i32_1 = arith.constant 0 : i32
    %c0_i32_2 = arith.constant 0 : i32
    return %c0_i32, %c0_i32_0, %c0_i32_1 : i32, i32, i32
  }
  func.func @transform_7(%arg0: i32) -> (i32, i32, i32) {
    %c0_i32 = arith.constant 0 : i32
    %c0_i32_0 = arith.constant 0 : i32
    %c0_i32_1 = arith.constant 0 : i32
    %c0_i32_2 = arith.constant 0 : i32
    return %c0_i32, %c0_i32_0, %c0_i32_1 : i32, i32, i32
  }
  func.func @transform_8(%arg0: i32) -> (i32, i32, i32) {
    %c0_i32 = arith.constant 0 : i32
    %c0_i32_0 = arith.constant 0 : i32
    %c0_i32_1 = arith.constant 0 : i32
    %c0_i32_2 = arith.constant 0 : i32
    return %c0_i32, %c0_i32_0, %c0_i32_1 : i32, i32, i32
  }
  func.func @transform_9(%arg0: i32) -> (i32, i32, i32) {
    %c0_i32 = arith.constant 0 : i32
    %c0_i32_0 = arith.constant 0 : i32
    %c0_i32_1 = arith.constant 0 : i32
    %c0_i32_2 = arith.constant 0 : i32
    return %c0_i32, %c0_i32_0, %c0_i32_1 : i32, i32, i32
  }
  func.func @transform_10(%arg0: i32) -> (i32, i32, i32) {
    %c0_i32 = arith.constant 0 : i32
    %c0_i32_0 = arith.constant 0 : i32
    %c0_i32_1 = arith.constant 0 : i32
    %c0_i32_2 = arith.constant 0 : i32
    return %c0_i32, %c0_i32_0, %c0_i32_1 : i32, i32, i32
  }
  func.func @transform_11(%arg0: i32) -> (i32, i32, i32) {
    %c0_i32 = arith.constant 0 : i32
    %c0_i32_0 = arith.constant 0 : i32
    %c0_i32_1 = arith.constant 0 : i32
    %c0_i32_2 = arith.constant 0 : i32
    return %c0_i32, %c0_i32_0, %c0_i32_1 : i32, i32, i32
  }
  func.func @transform_12(%arg0: i32) -> (i32, i32, i32) {
    %c0_i32 = arith.constant 0 : i32
    %c0_i32_0 = arith.constant 0 : i32
    %c0_i32_1 = arith.constant 0 : i32
    %c0_i32_2 = arith.constant 0 : i32
    return %c0_i32, %c0_i32_0, %c0_i32_1 : i32, i32, i32
  }
  func.func @transform_13(%arg0: i32) -> (i32, i32, i32) {
    %c0_i32 = arith.constant 0 : i32
    %c0_i32_0 = arith.constant 0 : i32
    %c0_i32_1 = arith.constant 0 : i32
    %c0_i32_2 = arith.constant 0 : i32
    return %c0_i32, %c0_i32_0, %c0_i32_1 : i32, i32, i32
  }
  func.func @transform_14(%arg0: i32) -> (i32, i32, i32) {
    %c0_i32 = arith.constant 0 : i32
    %c0_i32_0 = arith.constant 0 : i32
    %c0_i32_1 = arith.constant 0 : i32
    %c0_i32_2 = arith.constant 0 : i32
    return %c0_i32, %c0_i32_0, %c0_i32_1 : i32, i32, i32
  }
  func.func @transform_15(%arg0: i32) -> (i32, i32) {
    %c0_i32 = arith.constant 0 : i32
    %c0_i32_0 = arith.constant 0 : i32
    %c0_i32_1 = arith.constant 0 : i32
    return %c0_i32, %c0_i32_0 : i32, i32
  }
  func.func @transform_16(%arg0: i32) -> (i32, i32) {
    %c0_i32 = arith.constant 0 : i32
    %c0_i32_0 = arith.constant 0 : i32
    %c0_i32_1 = arith.constant 0 : i32
    return %c0_i32, %c0_i32_0 : i32, i32
  }
  func.func @transform_17(%arg0: i32) -> (i32, i32) {
    %c0_i32 = arith.constant 0 : i32
    %c0_i32_0 = arith.constant 0 : i32
    return %arg0, %c0_i32 : i32, i32
  }
}

</mosaic_0001>

<bundles_post_ra>
// kernel: tpu_custom_call.1
= control target key start
LH: loop header
LB: loop body
LE: loop exit
PB: predicated region body
PF: predicated region fallthrough
CT: control target
= control target key end

     0   :  { %s8523_s0 = inlined_call_operand.hbm [shape: f32[1,128], index: 0, kind: input, shape index: {}]   ;;  %s8524_s1 = inlined_call_operand.vmem [shape: f32[1,128], index: 1, kind: input, shape index: {}]   ;;  %s8525_s2 = inlined_call_operand.hbm [shape: f32[16,128], index: 2, kind: input, shape index: {}]   ;;  %s8526_s3 = inlined_call_operand.hbm [shape: bf16[2,128,1536], index: 3, kind: input, shape index: {}]   ;;  %s8527_s4 = inlined_call_operand.hbm [shape: f32[2,1,1536], index: 4, kind: input, shape index: {}]   ;;  %s8528_s5 = inlined_call_operand.hbm [shape: bf16[2,512,128], index: 5, kind: input, shape index: {}]   ;;  %s8529_s6 = inlined_call_operand.vmem [shape: f32[2,1,128], index: 6, kind: input, shape index: {}]   ;;  %s8530_s7 = inlined_call_operand.vmem [shape: f32[2,1,128], index: 7, kind: input, shape index: {}]   ;;  %s8531_s8 = inlined_call_operand.vmem [shape: f32[2,1,128], index: 8, kind: input, shape index: {}]   ;;  %s8532_s9 = inlined_call_operand.hbm [shape: bf16[2,128,128], index: 9, kind: input, shape index: {}]   ;;  %s8533_s10 = inlined_call_operand.vmem [shape: f32[2,1,128], index: 10, kind: input, shape index: {}]   ;;  %s8534_s11 = inlined_call_operand.hbm [shape: bf16[2,128,128], index: 11, kind: input, shape index: {}]   ;;  %s8535_s12 = inlined_call_operand.vmem [shape: f32[2,1,128], index: 12, kind: input, shape index: {}]   ;;  %s8536_s13 = inlined_call_operand.vmem [shape: f32[2,1,128], index: 13, kind: input, shape index: {}]   ;;  %s8537_s14 = inlined_call_operand.vmem [shape: f32[2,1,128], index: 14, kind: input, shape index: {}]   ;;  %s8538_s15 = inlined_call_operand.hbm [shape: bf16[128,128], index: 15, kind: input, shape index: {}]   ;;  %s8539_s16 = inlined_call_operand.vmem [shape: f32[1,128], index: 16, kind: input, shape index: {}]   ;;  %s8540_s17 = inlined_call_operand.hbm [shape: f32[16,128], index: 17, kind: output, shape index: {}]  }
   0x1   :  { %8554 = sst [smem:[#allocation31_spill]] %s8523_s0 }
   0x2   :  { %8555 = sst [smem:[#allocation32_spill]] %s8524_s1 }
   0x3   :  { %22 = vsyncpa [#allocation3], 0 }
   0x4   :  { %23 = vsyncpa [#allocation6], 0 }
   0x5   :  { %24 = vsyncpa [#allocation9], 0 }
   0x6   :  { %25 = vsyncpa [#allocation12], 0 }
   0x7   :  { %26 = vsyncpa [#allocation15], 0 }
   0x8   :  { %27 = vsyncpa [#allocation4], 0  ;;  %s7382_s24 = smov [#allocation5]   ;;  %s7148_s28 = scalar_lea.hbm %s8525_s2, 256 }
   0x9   :  { %s45_s25 = sshll.u32 %s7382_s24, 4  ;;  %p7149_p0 = scmp.ne.s32.totalorder %s8525_s2, %s7148_s28  ;;  %s46_s25 = int_to_ptr.vmem [resolvable:$true] %s45_s25 }
   0xa   :  { %p7152_p1 = scmp.lt.u32.totalorder %s7148_s28, %s8525_s2 }
   0xc   :  { %p7154_p2 = pnand %p7152_p1, %p7149_p0 }
   0xe   :  { %7157 = shalt.err (!%p7154_p2)
}
   0xf   :  { %s7158_s19 = scalar_lea.vmem %s46_s25, 256  ;;  %p7163_p4 = scmp.lt.s32.totalorder %s46_s25, %s46_s25 }
  0x10   :  { %p7159_p3 = scmp.ne.s32.totalorder %s46_s25, %s7158_s19  ;;  %p7164_p5 = scmp.lt.s32.totalorder %s7158_s19, %s7158_s19 }
  0x12   :  { %p7165_p6 = por %p7164_p5, %p7163_p4 }
  0x14   :  { %p7166_p7 = pnand %p7165_p6, %p7159_p3 }
  0x16   :  { %7169 = shalt.err (!%p7166_p7)
}
  0x17   :  { %s8542_s1 = smov 128   ;;  %s8543_s20 = smov 8  }
  0x18   :  { %51 = dma.hbm_to_vmem [thread:$0]  %s8525_s2, 256, %s46_s25, [#allocation6], %s8542_s1, %s8542_s1, %s8543_s20  }
  0x19   :  { %s7385_s23 = smov [#allocation8]   ;;  %s7170_s28 = scalar_lea.hbm %s8527_s4, 384 }
  0x1a   :  { %s69_s24 = sshll.u32 %s7385_s23, 4  ;;  %p7171_p8 = scmp.ne.s32.totalorder %s8527_s4, %s7170_s28  ;;  %s70_s24 = int_to_ptr.vmem [resolvable:$true] %s69_s24 }
  0x1b   :  { %p7174_p9 = scmp.lt.u32.totalorder %s7170_s28, %s8527_s4 }
  0x1d   :  { %p7176_p10 = pnand %p7174_p9, %p7171_p8 }
  0x1f   :  { %7179 = shalt.err (!%p7176_p10)
}
  0x20   :  { %s7180_s19 = scalar_lea.vmem %s70_s24, 384  ;;  %p7185_p12 = scmp.lt.s32.totalorder %s70_s24, %s70_s24 }
  0x21   :  { %p7181_p11 = scmp.ne.s32.totalorder %s70_s24, %s7180_s19  ;;  %p7186_p13 = scmp.lt.s32.totalorder %s7180_s19, %s7180_s19 }
  0x23   :  { %p7187_p0 = por %p7186_p13, %p7185_p12 }
  0x25   :  { %p7188_p1 = pnand %p7187_p0, %p7181_p11 }
  0x27   :  { %7191 = shalt.err (!%p7188_p1)
}
  0x28   :  { %s7386_s2 = smov 192   ;;  %s7387_s25 = smov 12  }
  0x29   :  { %75 = dma.hbm_to_vmem [thread:$0]  %s8527_s4, 384, %s70_s24, [#allocation9], %s7386_s2, %s7386_s2, %s7387_s25  }
  0x2a   :  { %s7388_s23 = smov [#allocation11]   ;;  %s7389_s27 = smov [#allocation2]  }
  0x2b   :  { %s99_s26 = sshll.u32 %s7388_s23, 4  ;;  %s34_s29 = sshll.u32 %s7389_s27, 4  ;;  %s100_s26 = int_to_ptr.vmem [resolvable:$true] %s99_s26  ;;  %s7522_s29 = int_to_ptr.vmem [resolvable:$true] %s34_s29 }
  0x2c   :  { %s7192_s30 = scalar_lea.hbm %s8532_s9, 2048 }
  0x2d   :  { %p7193_p2 = scmp.ne.s32.totalorder %s8532_s9, %s7192_s30  ;;  %p7196_p3 = scmp.lt.u32.totalorder %s7192_s30, %s8532_s9 }
  0x2f   :  { %p7198_p4 = pnand %p7196_p3, %p7193_p2 }
  0x31   :  { %7201 = shalt.err (!%p7198_p4)
}
  0x32   :  { %s7202_s4 = scalar_lea.vmem %s100_s26, 2048  ;;  %p7207_p6 = scmp.lt.s32.totalorder %s100_s26, %s100_s26 }
  0x33   :  { %p7203_p5 = scmp.ne.s32.totalorder %s100_s26, %s7202_s4  ;;  %p7208_p7 = scmp.lt.s32.totalorder %s7202_s4, %s7202_s4 }
  0x35   :  { %p7209_p8 = por %p7208_p7, %p7207_p6 }
  0x37   :  { %p7210_p9 = pnand %p7209_p8, %p7203_p5 }
  0x39   :  { %7213 = shalt.err (!%p7210_p9)
}
  0x3a   :  { %s7390_s24 = smov 64   ;;  %s7391_s2 = smov 4  }
  0x3b   :  { %105 = dma.hbm_to_vmem [thread:$0]  %s8532_s9, 2048, %s100_s26, [#allocation12], %s7390_s24, %s7390_s24, %s7391_s2  }
  0x3c   :  { %s8556_s22 = sld [smem:[#allocation31_spill]] }
  0x42   :  { %s7214_s23 = scalar_lea.hbm %s8556_s22, 16 }
  0x43   :  { %p7215_p10 = scmp.ne.s32.totalorder %s8556_s22, %s7214_s23  ;;  %p7218_p11 = scmp.lt.u32.totalorder %s7214_s23, %s8556_s22 }
  0x45   :  { %p7220_p12 = pnand %p7218_p11, %p7215_p10 }
  0x47   :  { %7223 = shalt.err (!%p7220_p12)
}
  0x48   :  { %s7224_s18 = scalar_lea.vmem %s7522_s29, 16  ;;  %s7228_s9 = scalar_lea.vmem %s7522_s29, 32 }
  0x49   :  { %p7225_p13 = scmp.ne.s32.totalorder %s7522_s29, %s7224_s18  ;;  %p7229_p0 = scmp.lt.s32.totalorder %s7522_s29, %s7522_s29 }
  0x4a   :  { %p7230_p1 = scmp.lt.s32.totalorder %s7228_s9, %s7224_s18 }
  0x4c   :  { %p7231_p2 = por %p7230_p1, %p7229_p0 }
  0x4e   :  { %p7232_p3 = pnand %p7231_p2, %p7225_p13 }
  0x50   :  { %7235 = shalt.err (!%p7232_p3)
}
  0x51   :  { %37 = dma.hbm_to_vmem [thread:$0]  %s8556_s22, 16, %s7522_s29, [#allocation3]  }
  0x52   :  { %s7392_s4 = smov [#allocation7]   ;;  %s7236_s20 = scalar_lea.hbm %s8526_s3, 24576 }
  0x53   :  { %s57_s25 = sshll.u32 %s7392_s4, 4  ;;  %p7237_p4 = scmp.ne.s32.totalorder %s8526_s3, %s7236_s20  ;;  %s58_s25 = int_to_ptr.vmem [resolvable:$true] %s57_s25 }
  0x54   :  { %p7240_p5 = scmp.lt.u32.totalorder %s7236_s20, %s8526_s3 }
  0x56   :  { %p7242_p6 = pnand %p7240_p5, %p7237_p4 }
  0x58   :  { %7245 = shalt.err (!%p7242_p6)
}
  0x59   :  { %s7246_s30 = scalar_lea.vmem %s58_s25, 24576  ;;  %p7251_p8 = scmp.lt.s32.totalorder %s58_s25, %s58_s25 }
  0x5a   :  { %p7247_p7 = scmp.ne.s32.totalorder %s58_s25, %s7246_s30  ;;  %p7252_p9 = scmp.lt.s32.totalorder %s7246_s30, %s7246_s30 }
  0x5c   :  { %p7253_p10 = por %p7252_p9, %p7251_p8 }
  0x5e   :  { %p7254_p11 = pnand %p7253_p10, %p7247_p7 }
  0x60   :  { %7257 = shalt.err (!%p7254_p11)
}
  0x61   :  { %s7393_s29 = smov 768   ;;  %s7394_s22 = smov 48  }
  0x62   :  { %63 = dma.hbm_to_vmem [thread:$0]  %s8526_s3, 24576, %s58_s25, [#allocation6], %s7393_s29, %s7393_s29, %s7394_s22  }
  0x63   :  { %s7395_s26 = smov [#allocation10]   ;;  %s7396_s4 = smov [#allocation13]  }
  0x64   :  { %s81_s19 = sshll.u32 %s7395_s26, 4  ;;  %s113_s21 = sshll.u32 %s7396_s4, 4  ;;  %s82_s19 = int_to_ptr.vmem [resolvable:$true] %s81_s19  ;;  %s114_s21 = int_to_ptr.vmem [resolvable:$true] %s113_s21 }
  0x65   :  { %s7258_s23 = scalar_lea.hbm %s8528_s5, 8192 }
  0x66   :  { %p7259_p12 = scmp.ne.s32.totalorder %s8528_s5, %s7258_s23  ;;  %p7262_p13 = scmp.lt.u32.totalorder %s7258_s23, %s8528_s5 }
  0x68   :  { %p7264_p0 = pnand %p7262_p13, %p7259_p12 }
  0x6a   :  { %7267 = shalt.err (!%p7264_p0)
}
  0x6b   :  { %s7268_s3 = scalar_lea.vmem %s82_s19, 8192  ;;  %p7273_p2 = scmp.lt.s32.totalorder %s82_s19, %s82_s19 }
  0x6c   :  { %p7269_p1 = scmp.ne.s32.totalorder %s82_s19, %s7268_s3  ;;  %p7274_p3 = scmp.lt.s32.totalorder %s7268_s3, %s7268_s3 }
  0x6e   :  { %p7275_p4 = por %p7274_p3, %p7273_p2 }
  0x70   :  { %p7276_p5 = pnand %p7275_p4, %p7269_p1 }
  0x72   :  { %7279 = shalt.err (!%p7276_p5)
}
  0x73   :  { %87 = dma.hbm_to_vmem [thread:$0]  %s8528_s5, 8192, %s82_s19, [#allocation9], %s7390_s24, %s7390_s24, %s7391_s2  }
  0x74   :  { %s7280_s9 = scalar_lea.hbm %s8534_s11, 2048 }
  0x75   :  { %p7281_p6 = scmp.ne.s32.totalorder %s8534_s11, %s7280_s9  ;;  %p7284_p7 = scmp.lt.u32.totalorder %s7280_s9, %s8534_s11 }
  0x77   :  { %p7286_p8 = pnand %p7284_p7, %p7281_p6 }
  0x79   :  { %7289 = shalt.err (!%p7286_p8)
}
  0x7a   :  { %s7290_s23 = scalar_lea.vmem %s114_s21, 2048  ;;  %p7295_p10 = scmp.lt.s32.totalorder %s114_s21, %s114_s21 }
  0x7b   :  { %p7291_p9 = scmp.ne.s32.totalorder %s114_s21, %s7290_s23  ;;  %p7296_p11 = scmp.lt.s32.totalorder %s7290_s23, %s7290_s23 }
  0x7d   :  { %p7297_p12 = por %p7296_p11, %p7295_p10 }
  0x7f   :  { %p7298_p13 = pnand %p7297_p12, %p7291_p9 }
  0x81   :  { %7301 = shalt.err (!%p7298_p13)
}
  0x82   :  { %119 = dma.hbm_to_vmem [thread:$0]  %s8534_s11, 2048, %s114_s21, [#allocation12], %s7390_s24, %s7390_s24, %s7391_s2  }
  0x83   :  { %s7397_s27 = smov [#allocation14]   ;;  %s7302_s3 = scalar_lea.hbm %s8538_s15, 1024 }
  0x84   :  { %s131_s28 = sshll.u32 %s7397_s27, 4  ;;  %p7303_p0 = scmp.ne.s32.totalorder %s8538_s15, %s7302_s3  ;;  %s132_s28 = int_to_ptr.vmem [resolvable:$true] %s131_s28 }
  0x85   :  { %p7306_p1 = scmp.lt.u32.totalorder %s7302_s3, %s8538_s15 }
  0x87   :  { %p7308_p2 = pnand %p7306_p1, %p7303_p0 }
  0x89   :  { %7311 = shalt.err (!%p7308_p2)
}
  0x8a   :  { %s7312_s9 = scalar_lea.vmem %s132_s28, 1024  ;;  %p7317_p4 = scmp.lt.s32.totalorder %s132_s28, %s132_s28 }
  0x8b   :  { %p7313_p3 = scmp.ne.s32.totalorder %s132_s28, %s7312_s9  ;;  %p7318_p5 = scmp.lt.s32.totalorder %s7312_s9, %s7312_s9 }
  0x8d   :  { %p7319_p6 = por %p7318_p5, %p7317_p4 }
  0x8f   :  { %p7320_p7 = pnand %p7319_p6, %p7313_p3 }
  0x91   :  { %7323 = shalt.err (!%p7320_p7)
}
  0x92   :  { %137 = dma.hbm_to_vmem [thread:$0]  %s8538_s15, 1024, %s132_s28, [#allocation15], %s7390_s24, %s7390_s24, %s7391_s2  }
  0x93   :  { %7358 = dma.done.wait [#allocation3], 16  }
  0x94   :  { %7359 = vsyncadd [#allocation3], 4294967280 }
  0x95   :  { %7360 = dma.done.wait [#allocation6], 24832  }
  0x96   :  { %7361 = vsyncadd [#allocation6], 4294942464 }
  0x97   :  { %7362 = dma.done.wait [#allocation9], 8576  }
  0x98   :  { %7363 = vsyncadd [#allocation9], 4294958720 }
  0x99   :  { %7364 = dma.done.wait [#allocation12], 4096  }
  0x9a   :  { %7365 = vsyncadd [#allocation12], 4294963200 }
  0x9b   :  { %7366 = dma.done.wait [#allocation15], 1024  }
  0x9c   :  { %7367 = vsyncadd [#allocation15], 4294966272  ;;  %v8544_v0 = vlaneseq  ;;  %v168_v2 = vld [vmem:[#allocation5] sm:$0xff]  ;;  %v169_v3 = vld [vmem:[#allocation5 + $0x8] sm:$0xff]  ;;  %s8558_s2 = sld [smem:[#allocation32_spill]]  ;;  %s7625_s26 = smov 0  }
  0x9d   :  { %v5917_v4 = vld [vmem:[#allocation2] ss:$0 sm:$0xff] }
  0x9e   :  { %v7615_v1 = vand.u32 127, %v8544_v0  ;;  %v177_v5 = vmul.f32 %v5917_v4, %v168_v2  ;;  %v178_v6 = vmul.f32 %v5917_v4, %v169_v3 }
  0xa0   :  { %8557 = vst [vmem:[#allocation23_spill] sm:$0xff] %v7615_v1  ;;  %vm167_vm0 = vcmp.lt.s32.totalorder %v7615_v1, 32 }
  0xa2   :  { %v5918_v7 = vld [vmem:[%s8558_s2] ss:$0 sm:$0xff] }
  0xa3   :  { %v186_v8 = vadd.f32 %v5918_v7, %v177_v5   ;;  %v187_v9 = vadd.f32 %v5918_v7, %v178_v6  }
  0xa4 LB: > { %8559 = vst [vmem:[#allocation24_spill] sm:$0xff] %v7372_v9  ;;  %8560 = vst [vmem:[#allocation25_spill] sm:$0xff] %v7376_v8  ;;  %v7398_v10 = vmov 0   ;;  %s6117_s4 = smul.u32 768, %s7380_s26  ;;  %v7666_v34 = vpack.c.bf16 %v7372_v9, %v7376_v8  ;;  %vm7400_vm1 = vmmov 0   ;;  %v8561_v0 = vlaneseq  ;;  %s6118_s5 = sshll.u32 %s7380_s26, 8  ;;  %s7380_s26 = sphi %s7625_s26, %s193_s26   ;;  %v7376_v8 = vphi %v186_v8, %v8580_v8   ;;  %v7372_v9 = vphi %v187_v9, %v8579_v9  }
  0xa5   : > { %874 = vmatprep.mubr.bf16.mxu0 %v7398_v10  ;;  %917 = vmatprep.mubr.bf16.mxu1 %v7398_v10  ;;  %s296_s20 = smul.u32 12, %s7380_s26  ;;  %vm1685_vm2 = vcmask 1040384   ;;  %vm1584_vm3 = vcmask 9216   ;;  %vm1681_vm4 = vcmask 15360   ;;  %s8342_s19 = scalar_lea.vmem [#allocation10], %s6118_s5 }
  0xa6   : > { %s7639_s1 = scalar_lea.vmem [#allocation7], %s6117_s4  ;;  %s5142_s0 = scalar_lea.vmem %s8529_s6, %s7380_s26 }
  0xa7   : > { %v6811_v11 = vld [vmem:[%s7639_s1 + $0x4] ss:$48 sps:$4 sm:$0xff]   ;;  %v6813_v12 = vld [vmem:[%s7639_s1] ss:$48 sps:$4 sm:$0xff]   ;;  %v6859_v24 = vld [vmem:[%s7639_s1 + $0xc] ss:$48 sps:$4 sm:$0xff]   ;;  %s5426_s18 = scalar_lea.vmem %s8530_s7, %s7380_s26  ;;  %s5428_s21 = scalar_lea.vmem %s8531_s8, %s7380_s26 }
  0xa8   : > { %842 = vmatprep.subr.bf16.mxu0 %v6811_v11  ;;  %v6814_v13 = vld [vmem:[%s7639_s1 + $0x64] ss:$48 sps:$4 sm:$0xff]   ;;  %v6816_v14 = vld [vmem:[%s7639_s1 + $0x60] ss:$48 sps:$4 sm:$0xff]   ;;  %v6861_v25 = vld [vmem:[%s7639_s1 + $0x8] ss:$48 sps:$4 sm:$0xff]   ;;  %885 = vmatprep.subr.bf16.mxu1 %v6859_v24  ;;  %s5492_s2 = scalar_lea.vmem %s8533_s10, %s7380_s26 }
  0xa9   : > { %843 = vmatpush1.bf16.msra.mxu0 %v6813_v12  ;;  %v6817_v15 = vld [vmem:[%s7639_s1 + $0xc4] ss:$48 sps:$4 sm:$0xff]   ;;  %v6819_v16 = vld [vmem:[%s7639_s1 + $0xc0] ss:$48 sps:$4 sm:$0xff]   ;;  %v6862_v27 = vld [vmem:[%s7639_s1 + $0x6c] ss:$48 sps:$4 sm:$0xff]   ;;  %886 = vmatpush1.bf16.msra.mxu1 %v6861_v25 }
  0xaa   : > { %844 = vmatprep.subr.bf16.mxu0 %v6814_v13  ;;  %v6820_v17 = vld [vmem:[%s7639_s1 + $0x124] ss:$48 sps:$4 sm:$0xff]   ;;  %v6822_v18 = vld [vmem:[%s7639_s1 + $0x120] ss:$48 sps:$4 sm:$0xff]   ;;  %v6864_v29 = vld [vmem:[%s7639_s1 + $0x68] ss:$48 sps:$4 sm:$0xff]   ;;  %887 = vmatprep.subr.bf16.mxu1 %v6862_v27 }
  0xab   : > { %v6823_v19 = vld [vmem:[%s7639_s1 + $0x184] ss:$48 sps:$4 sm:$0xff]   ;;  %v6825_v20 = vld [vmem:[%s7639_s1 + $0x180] ss:$48 sps:$4 sm:$0xff]   ;;  %v6865_v30 = vld [vmem:[%s7639_s1 + $0xcc] ss:$48 sps:$4 sm:$0xff]  }
  0xac   : > { %v6826_v21 = vld [vmem:[%s7639_s1 + $0x1e4] ss:$48 sps:$4 sm:$0xff]   ;;  %v6828_v22 = vld [vmem:[%s7639_s1 + $0x1e0] ss:$48 sps:$4 sm:$0xff]   ;;  %v6867_v33 = vld [vmem:[%s7639_s1 + $0xc8] ss:$48 sps:$4 sm:$0xff]  }
  0xad   : > { %845 = vmatpush1.bf16.msra.mxu0 %v6816_v14  ;;  %v6829_v23 = vld [vmem:[%s7639_s1 + $0x244] ss:$48 sps:$4 sm:$0xff]   ;;  %v6831_v26 = vld [vmem:[%s7639_s1 + $0x240] ss:$48 sps:$4 sm:$0xff]   ;;  %888 = vmatpush1.bf16.msra.mxu1 %v6864_v29  ;;  %v6868_v35 = vld [vmem:[%s7639_s1 + $0x12c] ss:$48 sps:$4 sm:$0xff]  }
  0xae   : > { %846 = vmatprep.subr.bf16.mxu0 %v6817_v15  ;;  %v6832_v28 = vld [vmem:[%s7639_s1 + $0x2a4] ss:$48 sps:$4 sm:$0xff]   ;;  %v6834_v31 = vld [vmem:[%s7639_s1 + $0x2a0] ss:$48 sps:$4 sm:$0xff]   ;;  %889 = vmatprep.subr.bf16.mxu1 %v6865_v30  ;;  %v6870_v38 = vld [vmem:[%s7639_s1 + $0x128] ss:$48 sps:$4 sm:$0xff]  }
  0xaf   : > { %v6837_v32 = vld [vmem:[%s7639_s1 + $0x14] ss:$48 sps:$4 sm:$0xff]   ;;  %v6835_v36 = vld [vmem:[%s7639_s1 + $0x10] ss:$48 sps:$4 sm:$0xff]   ;;  %v6871_v39 = vld [vmem:[%s7639_s1 + $0x18c] ss:$48 sps:$4 sm:$0xff]  }
  0xb0   : > { %v6840_v37 = vld [vmem:[%s7639_s1 + $0x74] ss:$48 sps:$4 sm:$0xff]   ;;  %v6838_v40 = vld [vmem:[%s7639_s1 + $0x70] ss:$48 sps:$4 sm:$0xff]   ;;  %v6873_v42 = vld [vmem:[%s7639_s1 + $0x188] ss:$48 sps:$4 sm:$0xff]  }
  0xb1   : > { %847 = vmatpush1.bf16.msra.mxu0 %v6819_v16  ;;  %890 = vmatpush1.bf16.msra.mxu1 %v6867_v33  ;;  %v6843_v41 = vld [vmem:[%s7639_s1 + $0xd4] ss:$48 sps:$4 sm:$0xff]   ;;  %v6874_v43 = vld [vmem:[%s7639_s1 + $0x1ec] ss:$48 sps:$4 sm:$0xff]   ;;  %v6841_v44 = vld [vmem:[%s7639_s1 + $0xd0] ss:$48 sps:$4 sm:$0xff]  }
  0xb2   : > { %848 = vmatprep.subr.bf16.mxu0 %v6820_v17  ;;  %891 = vmatprep.subr.bf16.mxu1 %v6868_v35  ;;  %v6846_v45 = vld [vmem:[%s7639_s1 + $0x134] ss:$48 sps:$4 sm:$0xff]   ;;  %v6876_v46 = vld [vmem:[%s7639_s1 + $0x1e8] ss:$48 sps:$4 sm:$0xff]   ;;  %v6844_v47 = vld [vmem:[%s7639_s1 + $0x130] ss:$48 sps:$4 sm:$0xff]  }
  0xb3   : > { %v6849_v48 = vld [vmem:[%s7639_s1 + $0x194] ss:$48 sps:$4 sm:$0xff]   ;;  %v6877_v49 = vld [vmem:[%s7639_s1 + $0x24c] ss:$48 sps:$4 sm:$0xff]   ;;  %v6879_v50 = vld [vmem:[%s7639_s1 + $0x248] ss:$48 sps:$4 sm:$0xff]  }
  0xb4   : > { %v6880_v51 = vld [vmem:[%s7639_s1 + $0x2ac] ss:$48 sps:$4 sm:$0xff]   ;;  %v6847_v52 = vld [vmem:[%s7639_s1 + $0x190] ss:$48 sps:$4 sm:$0xff]   ;;  %v6852_v53 = vld [vmem:[%s7639_s1 + $0x1f4] ss:$48 sps:$4 sm:$0xff]  }
  0xb5   : > { %849 = vmatpush1.bf16.msra.mxu0 %v6822_v18  ;;  %892 = vmatpush1.bf16.msra.mxu1 %v6870_v38  ;;  %v6882_v54 = vld [vmem:[%s7639_s1 + $0x2a8] ss:$48 sps:$4 sm:$0xff]   ;;  %v6885_v55 = vld [vmem:[%s7639_s1 + $0x1c] ss:$48 sps:$4 sm:$0xff]   ;;  %v6850_v56 = vld [vmem:[%s7639_s1 + $0x1f0] ss:$48 sps:$4 sm:$0xff]  }
  0xb6   : > { %850 = vmatprep.subr.bf16.mxu0 %v6823_v19  ;;  %893 = vmatprep.subr.bf16.mxu1 %v6871_v39  ;;  %v6855_v57 = vld [vmem:[%s7639_s1 + $0x254] ss:$48 sps:$4 sm:$0xff]   ;;  %v6883_v58 = vld [vmem:[%s7639_s1 + $0x18] ss:$48 sps:$4 sm:$0xff]   ;;  %v6888_v59 = vld [vmem:[%s7639_s1 + $0x7c] ss:$48 sps:$4 sm:$0xff]  }
  0xb7   : > { %v6853_v60 = vld [vmem:[%s7639_s1 + $0x250] ss:$48 sps:$4 sm:$0xff]   ;;  %v6858_v61 = vld [vmem:[%s7639_s1 + $0x2b4] ss:$48 sps:$4 sm:$0xff]   ;;  %v6886_v62 = vld [vmem:[%s7639_s1 + $0x78] ss:$48 sps:$4 sm:$0xff]  }
  0xb8   : > { %v6891_v63 = vld [vmem:[%s7639_s1 + $0xdc] ss:$48 sps:$4 sm:$0xff]   ;;  %v6856_v2 = vld [vmem:[%s7639_s1 + $0x2b0] ss:$48 sps:$4 sm:$0xff]   ;;  %v6889_v3 = vld [vmem:[%s7639_s1 + $0xd8] ss:$48 sps:$4 sm:$0xff]  }
  0xb9   : > { %851 = vmatpush1.bf16.msra.mxu0 %v6825_v20  ;;  %894 = vmatpush1.bf16.msra.mxu1 %v6873_v42  ;;  %v6894_v4 = vld [vmem:[%s7639_s1 + $0x13c] ss:$48 sps:$4 sm:$0xff]   ;;  %v6892_v5 = vld [vmem:[%s7639_s1 + $0x138] ss:$48 sps:$4 sm:$0xff]   ;;  %v6909_v17 = vld [vmem:[%s7639_s1 + $0x24] ss:$48 sps:$4 sm:$0xff]  }
  0xba   : > { %852 = vmatprep.subr.bf16.mxu0 %v6826_v21  ;;  %895 = vmatprep.subr.bf16.mxu1 %v6874_v43  ;;  %v6897_v6 = vld [vmem:[%s7639_s1 + $0x19c] ss:$48 sps:$4 sm:$0xff]   ;;  %v6895_v7 = vld [vmem:[%s7639_s1 + $0x198] ss:$48 sps:$4 sm:$0xff]   ;;  %v6907_v18 = vld [vmem:[%s7639_s1 + $0x20] ss:$48 sps:$4 sm:$0xff]  }
  0xbb   : > { %v6900_v11 = vld [vmem:[%s7639_s1 + $0x1fc] ss:$48 sps:$4 sm:$0xff]   ;;  %v6898_v12 = vld [vmem:[%s7639_s1 + $0x1f8] ss:$48 sps:$4 sm:$0xff]   ;;  %v6915_v21 = vld [vmem:[%s7639_s1 + $0x84] ss:$48 sps:$4 sm:$0xff]  }
  0xbc   : > { %v6903_v13 = vld [vmem:[%s7639_s1 + $0x25c] ss:$48 sps:$4 sm:$0xff]   ;;  %v6901_v14 = vld [vmem:[%s7639_s1 + $0x258] ss:$48 sps:$4 sm:$0xff]   ;;  %v6921_v24 = vld [vmem:[%s7639_s1 + $0xe4] ss:$48 sps:$4 sm:$0xff]  }
  0xbd   : > { %853 = vmatpush1.bf16.msra.mxu0 %v6828_v22  ;;  %896 = vmatpush1.bf16.msra.mxu1 %v6876_v46  ;;  %v6906_v15 = vld [vmem:[%s7639_s1 + $0x2bc] ss:$48 sps:$4 sm:$0xff]   ;;  %v6904_v16 = vld [vmem:[%s7639_s1 + $0x2b8] ss:$48 sps:$4 sm:$0xff]   ;;  %v6913_v22 = vld [vmem:[%s7639_s1 + $0x80] ss:$48 sps:$4 sm:$0xff]  }
  0xbe   : > { %854 = vmatprep.subr.bf16.mxu0 %v6829_v23  ;;  %897 = vmatprep.subr.bf16.mxu1 %v6877_v49  ;;  %v6912_v19 = vld [vmem:[%s7639_s1 + $0x2c] ss:$48 sps:$4 sm:$0xff]   ;;  %v6910_v20 = vld [vmem:[%s7639_s1 + $0x28] ss:$48 sps:$4 sm:$0xff]   ;;  %v6919_v25 = vld [vmem:[%s7639_s1 + $0xe0] ss:$48 sps:$4 sm:$0xff]  }
  0xbf   : > { %v6918_v23 = vld [vmem:[%s7639_s1 + $0x8c] ss:$48 sps:$4 sm:$0xff]   ;;  %v6922_v27 = vld [vmem:[%s7639_s1 + $0xe8] ss:$48 sps:$4 sm:$0xff]   ;;  %v6925_v29 = vld [vmem:[%s7639_s1 + $0x140] ss:$48 sps:$4 sm:$0xff]  }
  0xc0   : > { %v6928_v30 = vld [vmem:[%s7639_s1 + $0x148] ss:$48 sps:$4 sm:$0xff]   ;;  %v6931_v33 = vld [vmem:[%s7639_s1 + $0x1a0] ss:$48 sps:$4 sm:$0xff]   ;;  %v6936_v35 = vld [vmem:[%s7639_s1 + $0x1ac] ss:$48 sps:$4 sm:$0xff]  }
  0xc1   : > { %855 = vmatpush1.bf16.msra.mxu0 %v6831_v26  ;;  %898 = vmatpush1.bf16.msra.mxu1 %v6879_v50  ;;  %v6924_v26 = vld [vmem:[%s7639_s1 + $0xec] ss:$48 sps:$4 sm:$0xff]   ;;  %v6937_v39 = vld [vmem:[%s7639_s1 + $0x200] ss:$48 sps:$4 sm:$0xff]   ;;  %v8548_v49 = vmov 0.0   ;;  %s7775_s23 = scalar_lea.vmem [#allocation8], %s296_s20  ;;  %s5610_s20 = scalar_lea.vmem %s8535_s12, %s7380_s26 }
  0xc2   : > { %856 = vmatprep.subr.bf16.mxu0 %v6832_v28  ;;  %899 = vmatprep.subr.bf16.mxu1 %v6880_v51  ;;  %v6927_v28 = vld [vmem:[%s7639_s1 + $0x144] ss:$48 sps:$4 sm:$0xff]   ;;  %v6942_v38 = vld [vmem:[%s7639_s1 + $0x20c] ss:$48 sps:$4 sm:$0xff]   ;;  %v6943_v43 = vld [vmem:[%s7639_s1 + $0x260] ss:$48 sps:$4 sm:$0xff]  }
  0xc3   : > { %v6948_v42 = vld [vmem:[%s7639_s1 + $0x26c] ss:$48 sps:$4 sm:$0xff]   ;;  %s6119_s30 = sshll.u32 %s7380_s26, 6 }
  0xc4   : > { %v6954_v46 = vld [vmem:[%s7639_s1 + $0x2cc] ss:$48 sps:$4 sm:$0xff]   ;;  %s8430_s3 = scalar_lea.vmem [#allocation11], %s6119_s30  ;;  %s8453_s25 = scalar_lea.vmem [#allocation13], %s6119_s30 }
  0xc5   : > { %857 = vmatpush1.bf16.msra.mxu0 %v6834_v31  ;;  %900 = vmatpush1.bf16.msra.mxu1 %v6882_v54  ;;  %v6930_v31 = vld [vmem:[%s7639_s1 + $0x14c] ss:$48 sps:$4 sm:$0xff]  }
  0xc6   : > { %928 = vmatprep.subr.bf16.mxu0 %v6837_v32  ;;  %971 = vmatprep.subr.bf16.mxu1 %v6885_v55  ;;  %v6933_v32 = vld [vmem:[%s7639_s1 + $0x1a4] ss:$48 sps:$4 sm:$0xff]  }
  0xc8   : > { %875 = vmatmul.mubr.bf16.vlgmr.msra.gmra.mrb[0].mxu0 %v7666_v34  ;;  %918 = vmatmul.mubr.bf16.vlgmr.msra.gmra.mrb[0].mxu1 %v7666_v34 }
  0xc9   : > { %929 = vmatpush1.bf16.msra.mxu0 %v6835_v36  ;;  %960 = vmatprep.mubr.bf16.mxu0 %v7398_v10  ;;  %v6939_v36 = vld [vmem:[%s7639_s1 + $0x204] ss:$48 sps:$4 sm:$0xff]  }
  0xca   : > { %930 = vmatprep.subr.bf16.mxu0 %v6840_v37  ;;  %972 = vmatpush1.bf16.msra.mxu1 %v6883_v58  ;;  %v6934_v37 = vld [vmem:[%s7639_s1 + $0x1a8] ss:$48 sps:$4 sm:$0xff]  }
  0xcb   : > { %1003 = vmatprep.mubr.bf16.mxu1 %v7398_v10  ;;  %973 = vmatprep.subr.bf16.mxu1 %v6888_v59 }
  0xcd   : > { %931 = vmatpush1.bf16.msra.mxu0 %v6838_v40  ;;  %v6945_v40 = vld [vmem:[%s7639_s1 + $0x264] ss:$48 sps:$4 sm:$0xff]  }
  0xce   : > { %932 = vmatprep.subr.bf16.mxu0 %v6843_v41  ;;  %974 = vmatpush1.bf16.msra.mxu1 %v6886_v62  ;;  %v6940_v41 = vld [vmem:[%s7639_s1 + $0x208] ss:$48 sps:$4 sm:$0xff]   ;;  %v7778_v62 = vld [vmem:[%s7775_s23] sm:$0xff] }
  0xcf   : > { %975 = vmatprep.subr.bf16.mxu1 %v6891_v63 }
  0xd1   : > { %933 = vmatpush1.bf16.msra.mxu0 %v6841_v44  ;;  %v6951_v44 = vld [vmem:[%s7639_s1 + $0x2c4] ss:$48 sps:$4 sm:$0xff]  }
  0xd2   : > { %934 = vmatprep.subr.bf16.mxu0 %v6846_v45  ;;  %976 = vmatpush1.bf16.msra.mxu1 %v6889_v3  ;;  %v6946_v45 = vld [vmem:[%s7639_s1 + $0x268] ss:$48 sps:$4 sm:$0xff]  }
  0xd3   : > { %977 = vmatprep.subr.bf16.mxu1 %v6894_v4 }
  0xd5   : > { %935 = vmatpush1.bf16.msra.mxu0 %v6844_v47  ;;  %v6949_v47 = vld [vmem:[%s7639_s1 + $0x2c0] ss:$48 sps:$4 sm:$0xff]  }
  0xd6   : > { %936 = vmatprep.subr.bf16.mxu0 %v6849_v48  ;;  %978 = vmatpush1.bf16.msra.mxu1 %v6892_v5  ;;  %v6952_v48 = vld [vmem:[%s7639_s1 + $0x2c8] ss:$48 sps:$4 sm:$0xff]  }
  0xd7   : > { %979 = vmatprep.subr.bf16.mxu1 %v6897_v6 }
  0xd9   : > { %937 = vmatpush1.bf16.msra.mxu0 %v6847_v52 }
  0xda   : > { %938 = vmatprep.subr.bf16.mxu0 %v6852_v53  ;;  %980 = vmatpush1.bf16.msra.mxu1 %v6895_v7 }
  0xdb   : > { %981 = vmatprep.subr.bf16.mxu1 %v6900_v11 }
  0xdd   : > { %939 = vmatpush1.bf16.msra.mxu0 %v6850_v56 }
  0xde   : > { %940 = vmatprep.subr.bf16.mxu0 %v6855_v57  ;;  %982 = vmatpush1.bf16.msra.mxu1 %v6898_v12  ;;  %v7401_v57 = vmov 1983009808  }
  0xdf   : > { %983 = vmatprep.subr.bf16.mxu1 %v6903_v13  ;;  %v1104_v58 = vunpack.c.l.s4 %v7401_v57 }
  0xe1   : > { %941 = vmatpush1.bf16.msra.mxu0 %v6853_v60  ;;  %v1105_v63 = vunpack.c.0.s8 %v1104_v58 }
  0xe2   : > { %942 = vmatprep.subr.bf16.mxu0 %v6858_v61  ;;  %984 = vmatpush1.bf16.msra.mxu1 %v6901_v14 }
  0xe3   : > { %985 = vmatprep.subr.bf16.mxu1 %v6906_v15 }
  0xe5   : > { %943 = vmatpush1.bf16.msra.mxu0 %v6856_v2 }
  0xe6   : > { %986 = vmatpush1.bf16.msra.mxu1 %v6904_v16  ;;  %1014 = vmatprep.subr.bf16.mxu0 %v6909_v17 }
  0xe7   : > { %1057 = vmatprep.subr.bf16.mxu1 %v6912_v19 }
  0xe8   : > { %961 = vmatmul.mubr.bf16.vlgmr.msra.gmra.mrb[4].mxu0 %v7666_v34 }
  0xe9   : > { %1046 = vmatprep.mubr.bf16.mxu0 %v7398_v10  ;;  %1004 = vmatmul.mubr.bf16.vlgmr.msra.gmra.mrb[4].mxu1 %v7666_v34 }
  0xea   : > { %1089 = vmatprep.mubr.bf16.mxu1 %v7398_v10  ;;  %1015 = vmatpush1.bf16.msra.mxu0 %v6907_v18  ;;  %v6916_v10 = vld [vmem:[%s7639_s1 + $0x88] ss:$48 sps:$4 sm:$0xff]  }
  0xeb   : > { %1058 = vmatpush1.bf16.msra.mxu1 %v6910_v20  ;;  %1016 = vmatprep.subr.bf16.mxu0 %v6915_v21 }
  0xec   : > { %1059 = vmatprep.subr.bf16.mxu1 %v6918_v23 }
  0xee   : > { %1017 = vmatpush1.bf16.msra.mxu0 %v6913_v22 }
  0xef   : > { %1060 = vmatpush1.bf16.msra.mxu1 %v6916_v10  ;;  %1018 = vmatprep.subr.bf16.mxu0 %v6921_v24 }
  0xf0   : > { %1061 = vmatprep.subr.bf16.mxu1 %v6924_v26 }
  0xf2   : > { %1019 = vmatpush1.bf16.msra.mxu0 %v6919_v25 }
  0xf3   : > { %1062 = vmatpush1.bf16.msra.mxu1 %v6922_v27  ;;  %1020 = vmatprep.subr.bf16.mxu0 %v6927_v28 }
  0xf4   : > { %1063 = vmatprep.subr.bf16.mxu1 %v6930_v31 }
  0xf6   : > { %1021 = vmatpush1.bf16.msra.mxu0 %v6925_v29 }
  0xf7   : > { %1022 = vmatprep.subr.bf16.mxu0 %v6933_v32  ;;  %1064 = vmatpush1.bf16.msra.mxu1 %v6928_v30 }
  0xf8   : > { %1065 = vmatprep.subr.bf16.mxu1 %v6936_v35 }
  0xfa   : > { %1023 = vmatpush1.bf16.msra.mxu0 %v6931_v33 }
  0xfb   : > { %1024 = vmatprep.subr.bf16.mxu0 %v6939_v36  ;;  %1066 = vmatpush1.bf16.msra.mxu1 %v6934_v37 }
  0xfc   : > { %1067 = vmatprep.subr.bf16.mxu1 %v6942_v38 }
  0xfe   : > { %1025 = vmatpush1.bf16.msra.mxu0 %v6937_v39 }
  0xff   : > { %1026 = vmatprep.subr.bf16.mxu0 %v6945_v40  ;;  %1068 = vmatpush1.bf16.msra.mxu1 %v6940_v41 }
 0x100   : > { %1069 = vmatprep.subr.bf16.mxu1 %v6948_v42 }
 0x102   : > { %1027 = vmatpush1.bf16.msra.mxu0 %v6943_v43 }
 0x103   : > { %1028 = vmatprep.subr.bf16.mxu0 %v6951_v44  ;;  %1070 = vmatpush1.bf16.msra.mxu1 %v6946_v45 }
 0x104   : > { %1071 = vmatprep.subr.bf16.mxu1 %v6954_v46 }
 0x106   : > { %1029 = vmatpush1.bf16.msra.mxu0 %v6949_v47 }
 0x107   : > { %1072 = vmatpush1.bf16.msra.mxu1 %v6952_v48  ;;  %6320 = vmatprep.subr.bf16.mxu0 %v8548_v49 }
 0x108   : > { %6326 = vmatprep.subr.bf16.mxu1 %v8548_v49 }
 0x109   : > { %1047 = vmatmul.mubr.bf16.vlgmr.msra.gmra.mrb[8].mxu0 %v7666_v34 }
 0x10a   : > { %1090 = vmatmul.mubr.bf16.vlgmr.msra.gmra.mrb[8].mxu1 %v7666_v34  ;;  %6322 = vmatprep.mubr.msk.bf16.mxu0 %vm7400_vm1, %v8548_v49  ;;  %v7763_v34 = vshrl.u32 %v8561_v0, 7 }
 0x10b   : > { %6328 = vmatprep.mubr.msk.bf16.mxu1 %vm7400_vm1, %v8548_v49 }
 0x10c   : > { %v320_v59 = vsub.s32 4, %v7763_v34  ;;  %v304_v61 = vsub.s32 0, %v7763_v34  ;;  %v7785_v5 = vsub.s32 %v1105_v63, %v7763_v34 }
 0x10e   : > { %v321_v2 = vrot.slane %v7778_v62, %v320_v59  ;;  %v305_v3 = vrot.slane %v7778_v62, %v304_v61 }
 0x19b   : > { %v876_v50 = vpop.f32.mrb[0].mxu0  ;;  %v7765_v54 = vpop.f32.mrb[0].mxu1 }
 0x19c   : > { %v7757_v51 = vpop.f32.mrb[1].mxu0  ;;  %v7767_v55 = vpop.f32.mrb[1].mxu1  ;;  %v877_v11 = vadd.f32 %v876_v50, %v305_v3 }
 0x19d   : > { %v880_v52 = vpop.f32.mrb[2].mxu0  ;;  %v7769_v56 = vpop.f32.mrb[2].mxu1 }
 0x19e   : > { %v7759_v53 = vpop.f32.mrb[3].mxu0  ;;  %v7772_v60 = vpop.f32.mrb[3].mxu1  ;;  %v1109_v18 = vrot.slane %v877_v11, %v7785_v5  ;;  %v1102_v21 = vcombine.high %v877_v11, %v877_v11  ;;  %v881_v31 = vadd.f32 %v880_v52, %v305_v3  ;;  %v299_v3 = vld [vmem:[%s7775_s23 + $0x8] sm:$0xf] }
 0x19f   : > { %v337_v11 = vrot.slane %v299_v3, %v304_v61 }
 0x1a0   : > { %v1117_v22 = vcombine.high %v1109_v18, %v1109_v18  ;;  %v1144_v24 = vpack.c.bf16 %v1109_v18, %v1109_v18  ;;  %v1116_v26 = vrot.slane %v1102_v21, %v7785_v5  ;;  %v1126_v38 = vrot.slane %v881_v31, %v7785_v5 }
 0x1a1   : > { %v1119_v45 = vcombine.high %v881_v31, %v881_v31 }
 0x1a2   : > { %v1145_v27 = vpack.c.bf16 %v1117_v22, %v1117_v22  ;;  %v1118_v30 = vcombine.high %v1116_v26, %v1116_v26  ;;  %v1146_v35 = vpack.c.bf16 %v1116_v26, %v1116_v26  ;;  %v1134_v46 = vcombine.high %v1126_v38, %v1126_v38 }
 0x1a3   : > { %v1148_v48 = vpack.c.bf16 %v1126_v38, %v1126_v38  ;;  %v1133_v52 = vrot.slane %v1119_v45, %v7785_v5 }
 0x1a4   : > { %v1147_v37 = vpack.c.bf16 %v1118_v30, %v1118_v30  ;;  %v1149_v57 = vpack.c.bf16 %v1134_v46, %v1134_v46 }
 0x1a5   : > { %v1135_v59 = vcombine.high %v1133_v52, %v1133_v52  ;;  %v1150_v63 = vpack.c.bf16 %v1133_v52, %v1133_v52 }
 0x1bb   : > { %v962_v4 = vpop.f32.mrb[4].mxu0 }
 0x1bc   : > { %v963_v6 = vadd.f32 %v962_v4, %v321_v2  ;;  %v7787_v7 = vpop.f32.mrb[5].mxu0  ;;  %v7805_v39 = vpop.f32.mrb[4].mxu1  ;;  %v8547_v4 = vsub.s32 1, %v7763_v34 }
 0x1bd   : > { %v966_v12 = vpop.f32.mrb[6].mxu0  ;;  %v7810_v42 = vpop.f32.mrb[5].mxu1 }
 0x1be   : > { %v1154_v13 = vcombine.high %v963_v6, %v963_v6  ;;  %v1161_v14 = vrot.slane %v963_v6, %v7785_v5  ;;  %v7790_v15 = vpop.f32.mrb[7].mxu0  ;;  %v967_v10 = vadd.f32 %v966_v12, %v321_v2  ;;  %v7813_v43 = vpop.f32.mrb[6].mxu1  ;;  %v1151_v2 = vpack.c.bf16 %v1135_v59, %v1135_v59 }
 0x1bf   : > { %v7817_v44 = vpop.f32.mrb[7].mxu1  ;;  %v8546_v6 = vsub.s32 2, %v7763_v34  ;;  %v8545_v12 = vsub.s32 3, %v7763_v34 }
 0x1c0   : > { %v1169_v16 = vcombine.high %v1161_v14, %v1161_v14  ;;  %v1196_v17 = vpack.c.bf16 %v1161_v14, %v1161_v14  ;;  %v1168_v19 = vrot.slane %v1154_v13, %v7785_v5  ;;  %v1178_v29 = vrot.slane %v967_v10, %v7785_v5 }
 0x1c1   : > { %v1171_v32 = vcombine.high %v967_v10, %v967_v10  ;;  %v341_v13 = vrot.slane %v299_v3, %v8547_v4  ;;  %v345_v14 = vrot.slane %v299_v3, %v8546_v6 }
 0x1c2   : > { %v1197_v20 = vpack.c.bf16 %v1169_v16, %v1169_v16  ;;  %6321 = vmatpush3.bf16.xpose.msra.mxu0 %v1196_v17  ;;  %v1170_v23 = vcombine.high %v1168_v19, %v1168_v19  ;;  %v1198_v25 = vpack.c.bf16 %v1168_v19, %v1168_v19  ;;  %v1186_v33 = vcombine.high %v1178_v29, %v1178_v29 }
 0x1c3   : > { %6332 = vmatprep.subr.bf16.mxu0 %v8548_v49  ;;  %v1200_v36 = vpack.c.bf16 %v1178_v29, %v1178_v29  ;;  %v1185_v40 = vrot.slane %v1171_v32, %v7785_v5  ;;  %v349_v17 = vrot.slane %v299_v3, %v8545_v12 }
 0x1c4   : > { %6327 = vmatpush3.bf16.xpose.msra.mxu1 %v1197_v20  ;;  %v1199_v28 = vpack.c.bf16 %v1170_v23, %v1170_v23  ;;  %v1201_v41 = vpack.c.bf16 %v1186_v33, %v1186_v33 }
 0x1c5   : > { %6338 = vmatprep.subr.bf16.mxu1 %v8548_v49  ;;  %v1187_v47 = vcombine.high %v1185_v40, %v1185_v40  ;;  %v1202_v50 = vpack.c.bf16 %v1185_v40, %v1185_v40 }
 0x1c7   : > { %v1203_v58 = vpack.c.bf16 %v1187_v47, %v1187_v47 }
 0x1c9   : > { %6323 = vmatmul.mubr.bf16.vlgmr.msra.gmra.mrb[12].mxu0 %v1144_v24 }
 0x1ca   : > { %6333 = vmatpush3.bf16.xpose.msra.mxu0 %v1198_v25  ;;  %6334 = vmatprep.mubr.msk.bf16.mxu0 %vm7400_vm1, %v8548_v49 }
 0x1cb   : > { %6329 = vmatmul.mubr.bf16.vlgmr.msra.gmra.mrb[12].mxu1 %v1145_v27  ;;  %6344 = vmatprep.subr.bf16.mxu0 %v8548_v49 }
 0x1cc   : > { %6339 = vmatpush3.bf16.xpose.msra.mxu1 %v1199_v28  ;;  %6340 = vmatprep.mubr.msk.bf16.mxu1 %vm7400_vm1, %v8548_v49 }
 0x1cd   : > { %6350 = vmatprep.subr.bf16.mxu1 %v8548_v49 }
 0x1d1   : > { %6335 = vmatmul.mubr.bf16.vlgmr.msra.gmra.mrb[16].mxu0 %v1146_v35 }
 0x1d2   : > { %6345 = vmatpush3.bf16.xpose.msra.mxu0 %v1200_v36  ;;  %6346 = vmatprep.mubr.msk.bf16.mxu0 %vm7400_vm1, %v8548_v49 }
 0x1d3   : > { %6341 = vmatmul.mubr.bf16.vlgmr.msra.gmra.mrb[16].mxu1 %v1147_v37  ;;  %6356 = vmatprep.subr.bf16.mxu0 %v8548_v49 }
 0x1d4   : > { %6351 = vmatpush3.bf16.xpose.msra.mxu1 %v1201_v41  ;;  %6352 = vmatprep.mubr.msk.bf16.mxu1 %vm7400_vm1, %v8548_v49 }
 0x1d5   : > { %6362 = vmatprep.subr.bf16.mxu1 %v8548_v49 }
 0x1d9   : > { %6347 = vmatmul.mubr.bf16.vlgmr.msra.gmra.mrb[20].mxu0 %v1148_v48 }
 0x1da   : > { %6357 = vmatpush3.bf16.xpose.msra.mxu0 %v1202_v50  ;;  %6358 = vmatprep.mubr.msk.bf16.mxu0 %vm7400_vm1, %v8548_v49 }
 0x1db   : > { %6353 = vmatmul.mubr.bf16.vlgmr.msra.gmra.mrb[20].mxu1 %v1149_v57  ;;  %6368 = vmatprep.subr.bf16.mxu0 %v8548_v49 }
 0x1dc   : > { %6363 = vmatpush3.bf16.xpose.msra.mxu1 %v1203_v58  ;;  %6364 = vmatprep.mubr.msk.bf16.mxu1 %vm7400_vm1, %v8548_v49  ;;  %v1048_v16 = vpop.f32.mrb[8].mxu0 }
 0x1dd   : > { %6374 = vmatprep.subr.bf16.mxu1 %v8548_v49  ;;  %v1049_v18 = vadd.f32 %v1048_v16, %v337_v11  ;;  %v1050_v19 = vpop.f32.mrb[9].mxu0  ;;  %v1091_v22 = vpop.f32.mrb[8].mxu1 }
 0x1de   : > { %v1051_v20 = vadd.f32 %v1050_v19, %v341_v13  ;;  %v1052_v21 = vpop.f32.mrb[10].mxu0  ;;  %v1092_v25 = vadd.f32 %v1091_v22, %v345_v14  ;;  %v1093_v26 = vpop.f32.mrb[9].mxu1 }
 0x1df   : > { %v1206_v23 = vcombine.high %v1049_v18, %v1049_v18  ;;  %v1213_v61 = vrot.slane %v1049_v18, %v7785_v5  ;;  %v1053_v10 = vadd.f32 %v1052_v21, %v337_v11  ;;  %v1054_v24 = vpop.f32.mrb[11].mxu0  ;;  %v1094_v30 = vadd.f32 %v1093_v26, %v349_v17  ;;  %v1095_v31 = vpop.f32.mrb[10].mxu1 }
 0x1e0   : > { %v2202_v27 = vcombine.high %v1051_v20, %v1051_v20  ;;  %v7845_v28 = vrot.slane %v1051_v20, %v7785_v5  ;;  %v1055_v29 = vadd.f32 %v1054_v24, %v341_v13  ;;  %v1097_v37 = vpop.f32.mrb[11].mxu1  ;;  %v3195_v59 = vcombine.high %v1092_v25, %v1092_v25 }
 0x1e1   : > { %6359 = vmatmul.mubr.bf16.vlgmr.msra.gmra.mrb[24].mxu0 %v1150_v63  ;;  %v1220_v32 = vrot.slane %v1206_v23, %v7785_v5  ;;  %v1221_v33 = vcombine.high %v1213_v61, %v1213_v61  ;;  %v1248_v35 = vpack.c.bf16 %v1213_v61, %v1213_v61  ;;  %v1223_v36 = vcombine.high %v1053_v10, %v1053_v10 }
 0x1e2   : > { %6370 = vmatprep.mubr.msk.bf16.mxu0 %vm7400_vm1, %v8548_v49  ;;  %v7849_v38 = vrot.slane %v2202_v27, %v7785_v5  ;;  %v2217_v40 = vcombine.high %v7845_v28, %v7845_v28  ;;  %v2244_v41 = vpack.c.bf16 %v7845_v28, %v7845_v28  ;;  %v1230_v45 = vrot.slane %v1053_v10, %v7785_v5 }
 0x1e3   : > { %6365 = vmatmul.mubr.bf16.vlgmr.msra.gmra.mrb[24].mxu1 %v1151_v2  ;;  %v1249_v46 = vpack.c.bf16 %v1221_v33, %v1221_v33  ;;  %v1237_v47 = vrot.slane %v1223_v36, %v7785_v5  ;;  %v2219_v48 = vcombine.high %v1055_v29, %v1055_v29  ;;  %v2226_v50 = vrot.slane %v1055_v29, %v7785_v5 }
 0x1e4   : > { %6376 = vmatprep.mubr.msk.bf16.mxu1 %vm7400_vm1, %v8548_v49  ;;  %v2245_v52 = vpack.c.bf16 %v2217_v40, %v2217_v40  ;;  %v1238_v57 = vcombine.high %v1230_v45, %v1230_v45  ;;  %v1252_v58 = vpack.c.bf16 %v1230_v45, %v1230_v45  ;;  %v3202_v11 = vrot.slane %v1092_v25, %v7785_v5 }
 0x1e5   : > { %v2233_v63 = vrot.slane %v2219_v48, %v7785_v5  ;;  %v2234_v2 = vcombine.high %v2226_v50, %v2226_v50  ;;  %v2248_v3 = vpack.c.bf16 %v2226_v50, %v2226_v50  ;;  %v7861_v16 = vrot.slane %v3195_v59, %v7785_v5 }
 0x1e6   : > { %v1253_v13 = vpack.c.bf16 %v1238_v57, %v1238_v57  ;;  %v4188_v18 = vcombine.high %v1094_v30, %v1094_v30  ;;  %v7864_v19 = vrot.slane %v1094_v30, %v7785_v5  ;;  %v3210_v21 = vcombine.high %v3202_v11, %v3202_v11 }
 0x1e7   : > { %v2249_v20 = vpack.c.bf16 %v2234_v2, %v2234_v2  ;;  %v3237_v22 = vpack.c.bf16 %v3202_v11, %v3202_v11  ;;  %v1096_v23 = vadd.f32 %v1095_v31, %v345_v14  ;;  %v1098_v25 = vadd.f32 %v1097_v37, %v349_v17 }
 0x1e8   : > { %v7867_v61 = vrot.slane %v4188_v18, %v7785_v5  ;;  %v4203_v10 = vcombine.high %v7864_v19, %v7864_v19  ;;  %v4230_v24 = vpack.c.bf16 %v7864_v19, %v7864_v19  ;;  %v3238_v26 = vpack.c.bf16 %v3210_v21, %v3210_v21 }
 0x1e9   : > { %v3212_v27 = vcombine.high %v1096_v23, %v1096_v23  ;;  %v3219_v28 = vrot.slane %v1096_v23, %v7785_v5  ;;  %v4205_v30 = vcombine.high %v1098_v25, %v1098_v25  ;;  %v4212_v33 = vrot.slane %v1098_v25, %v7785_v5 }
 0x1ea   : > { %v4231_v29 = vpack.c.bf16 %v4203_v10, %v4203_v10  ;;  %v1687_v14 = vsel %vm1685_vm2, %v1248_v35, 0  ;;  %v1733_v45 = vsel %vm1685_vm2, %v1249_v46, 0  ;;  %v1250_v57 = vpack.c.bf16 %v1220_v32, %v1220_v32 }
 0x1eb   : > { %v3226_v31 = vrot.slane %v3212_v27, %v7785_v5  ;;  %v3227_v36 = vcombine.high %v3219_v28, %v3219_v28  ;;  %v3241_v40 = vpack.c.bf16 %v3219_v28, %v3219_v28  ;;  %6369 = vmatpush3.bf16.msra.mxu0 %v1687_v14  ;;  %v4219_v17 = vrot.slane %v4205_v30, %v7785_v5 }
 0x1ec   : > { %v4220_v37 = vcombine.high %v4212_v33, %v4212_v33  ;;  %v4234_v48 = vpack.c.bf16 %v4212_v33, %v4212_v33  ;;  %6375 = vmatpush3.bf16.msra.mxu1 %v1733_v45  ;;  %6380 = vmatprep.subr.bf16.mxu0 %v8548_v49  ;;  %v1222_v59 = vcombine.high %v1220_v32, %v1220_v32  ;;  %v7882_v35 = vsel %vm1685_vm2, %v1252_v58, 0 }
 0x1ed   : > { %v3242_v50 = vpack.c.bf16 %v3227_v36, %v3227_v36  ;;  %6386 = vmatprep.subr.bf16.mxu1 %v8548_v49  ;;  %v7885_v11 = vsel %vm1685_vm2, %v1253_v13, 0  ;;  %v1254_v46 = vpack.c.bf16 %v1237_v47, %v1237_v47  ;;  %v1239_v18 = vcombine.high %v1237_v47, %v1237_v47 }
 0x1ee   : > { %v4235_v2 = vpack.c.bf16 %v4220_v37, %v4220_v37  ;;  %v7888_v19 = vsel %vm1685_vm2, %v1250_v57, 0  ;;  %v1251_v21 = vpack.c.bf16 %v1222_v59, %v1222_v59  ;;  %v7891_v23 = vsel %vm1685_vm2, %v2244_v41, 0 }
 0x1ef   : > { %v7894_v10 = vsel %vm1685_vm2, %v2245_v52, 0  ;;  %v7897_v32 = vsel %vm1685_vm2, %v1254_v46, 0  ;;  %v1255_v58 = vpack.c.bf16 %v1239_v18, %v1239_v18  ;;  %v2246_v13 = vpack.c.bf16 %v7849_v38, %v7849_v38 }
 0x1f0   : > { %v2218_v47 = vcombine.high %v7849_v38, %v7849_v38  ;;  %v7904_v25 = vsel %vm1685_vm2, %v1251_v21, 0  ;;  %v7907_v27 = vsel %vm1685_vm2, %v2248_v3, 0  ;;  %v7910_v41 = vsel %vm1685_vm2, %v2249_v20, 0 }
 0x1f1   : > { %v2250_v52 = vpack.c.bf16 %v2233_v63, %v2233_v63  ;;  %v7913_v28 = vsel %vm1685_vm2, %v1255_v58, 0  ;;  %v7916_v30 = vsel %vm1685_vm2, %v2246_v13, 0  ;;  %v2235_v14 = vcombine.high %v2233_v63, %v2233_v63 }
 0x1f2   : > { %v2247_v33 = vpack.c.bf16 %v2218_v47, %v2218_v47  ;;  %v7922_v36 = vsel %vm1685_vm2, %v3237_v22, 0  ;;  %v7925_v3 = vsel %vm1685_vm2, %v3238_v26, 0  ;;  %v3239_v20 = vpack.c.bf16 %v7861_v16, %v7861_v16 }
 0x1f3   : > { %v7919_v38 = vsel %vm1685_vm2, %v2250_v52, 0  ;;  %v2251_v37 = vpack.c.bf16 %v2235_v14, %v2235_v14  ;;  %v3211_v57 = vcombine.high %v7861_v16, %v7861_v16  ;;  %v7935_v63 = vsel %vm1685_vm2, %v3241_v40, 0 }
 0x1f4   : > { %v7930_v45 = vsel %vm1685_vm2, %v2247_v33, 0  ;;  %v7938_v59 = vsel %vm1685_vm2, %v3239_v20, 0  ;;  %v7941_v22 = vsel %vm1685_vm2, %v3242_v50, 0  ;;  %v3243_v26 = vpack.c.bf16 %v3226_v31, %v3226_v31 }
 0x1f5   : > { %v3228_v46 = vcombine.high %v3226_v31, %v3226_v31  ;;  %v7944_v18 = vsel %vm1685_vm2, %v2251_v37, 0  ;;  %v3240_v21 = vpack.c.bf16 %v3211_v57, %v3211_v57  ;;  %v7947_v58 = vsel %vm1685_vm2, %v4230_v24, 0 }
 0x1f6   : > { %v7950_v16 = vsel %vm1685_vm2, %v4231_v29, 0  ;;  %v7953_v40 = vsel %vm1685_vm2, %v3243_v26, 0  ;;  %v4232_v50 = vpack.c.bf16 %v7867_v61, %v7867_v61  ;;  %v4204_v31 = vcombine.high %v7867_v61, %v7867_v61 }
 0x1f7   : > { %v3244_v13 = vpack.c.bf16 %v3228_v46, %v3228_v46  ;;  %v7960_v47 = vsel %vm1685_vm2, %v3240_v21, 0  ;;  %v7963_v52 = vsel %vm1685_vm2, %v4234_v48, 0  ;;  %v7966_v24 = vsel %vm1685_vm2, %v4235_v2, 0 }
 0x1f8   : > { %8562 = vst [vmem:[#allocation26_spill] sm:$0xff] %v7963_v52  ;;  %8563 = vst [vmem:[#allocation27_spill] sm:$0xff] %v7966_v24  ;;  %v4236_v29 = vpack.c.bf16 %v4219_v17, %v4219_v17  ;;  %v7972_v14 = vsel %vm1685_vm2, %v4232_v50, 0  ;;  %v4233_v20 = vpack.c.bf16 %v4204_v31, %v4204_v31  ;;  %v4221_v37 = vcombine.high %v4219_v17, %v4219_v17 }
 0x1f9   : > { %v7969_v33 = vsel %vm1685_vm2, %v3244_v13, 0 }
 0x1fa   : > { %v7975_v61 = vsel %vm1685_vm2, %v4236_v29, 0  ;;  %v7978_v57 = vsel %vm1685_vm2, %v4233_v20, 0  ;;  %v4237_v48 = vpack.c.bf16 %v4221_v37, %v4221_v37 }
 0x1fb   : > { %8564 = vst [vmem:[#allocation28_spill] sm:$0xff] %v7975_v61  ;;  %8565 = vst [vmem:[#allocation29_spill] sm:$0xff] %v7978_v57 }
 0x1fc   : > { %v7981_v26 = vsel %vm1685_vm2, %v4237_v48, 0 }
 0x1fd   : > { %8566 = vst [vmem:[#allocation30_spill] sm:$0xff] %v7981_v26 }
 0x29c   : > { %v1290_v2 = vpop.f32.mrb[12].mxu0 }
 0x29d   : > { %v1576_v46 = vmul.f32 0.35355338, %v1290_v2  ;;  %v6324_v21 = vpop.f32.mrb[13].mxu0 }
 0x29e   : > { %v1293_v13 = vpop.f32.mrb[14].mxu0  ;;  %v1330_v0 = vpop.f32.mrb[12].mxu1 }
 0x29f   : > { %v1577_v50 = vmul.f32 0.35355338, %v1330_v0  ;;  %v6325_v12 = vpop.f32.mrb[15].mxu0  ;;  %v6330_v31 = vpop.f32.mrb[13].mxu1  ;;  %v1585_v17 = vsel %vm1584_vm3, %v1576_v46, -inf }
 0x2a0   : > { %1586 = vmax.xlane.f32.xlu0 %v1585_v17  ;;  %v1333_v29 = vpop.f32.mrb[14].mxu1 }
 0x2a1   : > { %v6331_v6 = vpop.f32.mrb[15].mxu1  ;;  %v1588_v20 = vsel %vm1584_vm3, %v1577_v50, -inf }
 0x2a4   : > { %1589 = vmax.xlane.f32.xlu0 %v1588_v20  ;;  %v1370_v37 = vpop.f32.mrb[16].mxu0 }
 0x2a5   : > { %v1578_v48 = vmul.f32 0.35355338, %v1370_v37  ;;  %v6336_v4 = vpop.f32.mrb[17].mxu0 }
 0x2a6   : > { %v1373_v49 = vpop.f32.mrb[18].mxu0  ;;  %v1410_v1 = vpop.f32.mrb[16].mxu1 }
 0x2a7   : > { %v1579_v2 = vmul.f32 0.35355338, %v1410_v1  ;;  %v6337_v21 = vpop.f32.mrb[19].mxu0  ;;  %v6342_v13 = vpop.f32.mrb[17].mxu1  ;;  %v1591_v0 = vsel %vm1584_vm3, %v1578_v48, -inf }
 0x2a8   : > { %1592 = vmax.xlane.f32.xlu1 %v1591_v0  ;;  %v1413_v12 = vpop.f32.mrb[18].mxu1 }
 0x2a9   : > { %v6343_v31 = vpop.f32.mrb[19].mxu1  ;;  %v1594_v17 = vsel %vm1584_vm3, %v1579_v2, -inf }
 0x2ac   : > { %v1450_v29 = vpop.f32.mrb[20].mxu0  ;;  %1595 = vmax.xlane.f32.xlu1 %v1594_v17 }
 0x2ad   : > { %v1580_v6 = vmul.f32 0.35355338, %v1450_v29  ;;  %v6348_v9 = vpop.f32.mrb[21].mxu0 }
 0x2ae   : > { %v1453_v20 = vpop.f32.mrb[22].mxu0  ;;  %v1490_v8 = vpop.f32.mrb[20].mxu1 }
 0x2af   : > { %v1581_v37 = vmul.f32 0.35355338, %v1490_v8  ;;  %v6349_v4 = vpop.f32.mrb[23].mxu0  ;;  %v6354_v49 = vpop.f32.mrb[21].mxu1  ;;  %v1597_v1 = vsel %vm1584_vm3, %v1580_v6, -inf }
 0x2b0   : > { %1598 = vmax.xlane.f32.xlu0 %v1597_v1  ;;  %v1493_v21 = vpop.f32.mrb[22].mxu1 }
 0x2b1   : > { %v6355_v13 = vpop.f32.mrb[23].mxu1  ;;  %v1600_v0 = vsel %vm1584_vm3, %v1581_v37, -inf }
 0x2b2   : > { %1601 = vmax.xlane.f32.xlu1 %v1600_v0 }
 0x2b4   : > { %v1530_v12 = vpop.f32.mrb[24].mxu0 }
 0x2b5   : > { %v1582_v31 = vmul.f32 0.35355338, %v1530_v12  ;;  %v6360_v26 = vpop.f32.mrb[25].mxu0 }
 0x2b6   : > { %v1533_v61 = vpop.f32.mrb[26].mxu0  ;;  %v1570_v17 = vpop.f32.mrb[24].mxu1 }
 0x2b7   : > { %v1583_v29 = vmul.f32 0.35355338, %v1570_v17  ;;  %v6361_v9 = vpop.f32.mrb[27].mxu0  ;;  %v6366_v20 = vpop.f32.mrb[25].mxu1  ;;  %v1603_v8 = vsel %vm1584_vm3, %v1582_v31, -inf }
 0x2b8   : > { %1604 = vmax.xlane.f32.xlu0 %v1603_v8  ;;  %v1573_v4 = vpop.f32.mrb[26].mxu1 }
 0x2b9   : > { %v6367_v49 = vpop.f32.mrb[27].mxu1  ;;  %v1606_v1 = vsel %vm1584_vm3, %v1583_v29, -inf }
 0x2ba   : > { %1607 = vmax.xlane.f32.xlu1 %v1606_v1 }
 0x32d   : > { %v1587_v21 = vpop.xlane.xlu0 %1586 }
 0x32e   : > { %v1609_v13 = vsub.f32 %v1576_v46, %v1587_v21 }
 0x330   : > { %v1617_v24 = vmul.f32 1.442695, %v1609_v13 }
 0x331   : > { %v1590_v0 = vpop.xlane.xlu0 %1589 }
 0x332   : > { %7003 = vpow2.f32 %v1617_v24  ;;  %v1610_v12 = vsub.f32 %v1577_v50, %v1590_v0 }
 0x334   : > { %v1619_v26 = vmul.f32 1.442695, %v1610_v12 }
 0x335   : > { %v1593_v61 = vpop.xlane.xlu1 %1592 }
 0x336   : > { %7005 = vpow2.f32 %v1619_v26  ;;  %v1611_v17 = vsub.f32 %v1578_v48, %v1593_v61 }
 0x338   : > { %v1621_v9 = vmul.f32 1.442695, %v1611_v17 }
 0x339   : > { %v1596_v20 = vpop.xlane.xlu1 %1595 }
 0x33a   : > { %7007 = vpow2.f32 %v1621_v9  ;;  %v1612_v52 = vsub.f32 %v1579_v2, %v1596_v20 }
 0x33c   : > { %v7004_v8 = vpop.eup %7003  ;;  %v1623_v4 = vmul.f32 1.442695, %v1612_v52 }
 0x33d   : > { %v1599_v49 = vpop.xlane.xlu0 %1598  ;;  %v1633_v57 = vsel %vm1584_vm3, %v7004_v8, 0.0 }
 0x33e   : > { %7009 = vpow2.f32 %v1623_v4  ;;  %v1613_v1 = vsub.f32 %v1580_v6, %v1599_v49  ;;  %1634 = vadd.xlane.f32.xlu0 %v1633_v57 }
 0x33f   : > { %v1602_v46 = vpop.xlane.xlu1 %1601 }
 0x340   : > { %v7006_v21 = vpop.eup %7005  ;;  %v1625_v24 = vmul.f32 1.442695, %v1613_v1  ;;  %v1614_v50 = vsub.f32 %v1581_v37, %v1602_v46 }
 0x341   : > { %v1636_v13 = vsel %vm1584_vm3, %v7006_v21, 0.0 }
 0x342   : > { %7011 = vpow2.f32 %v1625_v24  ;;  %v1627_v48 = vmul.f32 1.442695, %v1614_v50  ;;  %1637 = vadd.xlane.f32.xlu1 %v1636_v13 }
 0x344   : > { %v7008_v0 = vpop.eup %7007  ;;  %7013 = vpow2.f32 %v1627_v48 }
 0x345   : > { %v1605_v2 = vpop.xlane.xlu0 %1604  ;;  %v1639_v52 = vsel %vm1584_vm3, %v7008_v0, 0.0 }
 0x346   : > { %v1615_v12 = vsub.f32 %v1582_v31, %v1605_v2  ;;  %1640 = vadd.xlane.f32.xlu0 %v1639_v52 }
 0x347   : > { %v1608_v26 = vpop.xlane.xlu1 %1607 }
 0x348   : > { %v7010_v61 = vpop.eup %7009  ;;  %v1629_v6 = vmul.f32 1.442695, %v1615_v12  ;;  %v1616_v57 = vsub.f32 %v1583_v29, %v1608_v26 }
 0x349   : > { %v1642_v17 = vsel %vm1584_vm3, %v7010_v61, 0.0 }
 0x34a   : > { %7015 = vpow2.f32 %v1629_v6  ;;  %v1631_v37 = vmul.f32 1.442695, %v1616_v57  ;;  %1643 = vadd.xlane.f32.xlu1 %v1642_v17  ;;  %v8567_v17 = vmov 0.0  }
 0x34c   : > { %v7012_v9 = vpop.eup %7011  ;;  %7017 = vpow2.f32 %v1631_v37 }
 0x34d   : > { %v1645_v20 = vsel %vm1584_vm3, %v7012_v9, 0.0 }
 0x34e   : > { %v7014_v4 = vpop.eup %7013  ;;  %1646 = vadd.xlane.f32.xlu0 %v1645_v20 }
 0x34f   : > { %v1648_v49 = vsel %vm1584_vm3, %v7014_v4, 0.0 }
 0x350   : > { %1649 = vadd.xlane.f32.xlu1 %v1648_v49 }
 0x354   : > { %v7997_v31 = vpop.eup %7015 }
 0x355   : > { %v1651_v1 = vsel %vm1584_vm3, %v7997_v31, 0.0 }
 0x356   : > { %v8001_v29 = vpop.eup %7017  ;;  %1652 = vadd.xlane.f32.xlu0 %v1651_v1  ;;  %v324_v1 = vsub.s32 5, %v7763_v34 }
 0x357   : > { %v1654_v46 = vsel %vm1584_vm3, %v8001_v29, 0.0 }
 0x358   : > { %1655 = vadd.xlane.f32.xlu1 %v1654_v46 }
 0x3cb   : > { %v1635_v24 = vpop.xlane.xlu0 %1634 }
 0x3cc   : > { %7019 = vrcp.f32 %v1635_v24 }
 0x3cf   : > { %v1638_v50 = vpop.xlane.xlu1 %1637 }
 0x3d0   : > { %7021 = vrcp.f32 %v1638_v50 }
 0x3d3   : > { %v1641_v13 = vpop.xlane.xlu0 %1640 }
 0x3d4   : > { %7023 = vrcp.f32 %v1641_v13  ;;  %v325_v13 = vrot.slane %v7778_v62, %v324_v1 }
 0x3d6   : > { %v7020_v48 = vpop.eup %7019 }
 0x3d7   : > { %v1658_v2 = vmul.f32 %v7020_v48, %v7004_v8  ;;  %v1644_v52 = vpop.xlane.xlu1 %1643 }
 0x3d8   : > { %7025 = vrcp.f32 %v1644_v52  ;;  %v965_v52 = vadd.f32 %v7787_v7, %v325_v13 }
 0x3d9   : > { %v1673_v12 = vpack.c.bf16 %v1658_v2, %v1658_v2 }
 0x3da   : > { %v7022_v26 = vpop.eup %7021 }
 0x3db   : > { %v1660_v6 = vmul.f32 %v7022_v26, %v7006_v21  ;;  %6371 = vmatmul.mubr.msk.bf16.vlgmr.msra.gmra.mrb[28].mxu0 %vm1681_vm4, %v1673_v12  ;;  %v1647_v57 = vpop.xlane.xlu0 %1646  ;;  %v8568_v12 = vsub.s32 1, %v7763_v34  ;;  %v2157_v26 = vrot.slane %v965_v52, %v7785_v5 }
 0x3dc   : > { %6381 = vmatpush3.bf16.msra.mxu0 %v7888_v19  ;;  %7027 = vrcp.f32 %v1647_v57  ;;  %6382 = vmatprep.mubr.msk.bf16.mxu0 %vm7400_vm1, %v8567_v17 }
 0x3dd   : > { %v1650_v37 = vpop.xlane.xlu1 %1649  ;;  %v1674_v20 = vpack.c.bf16 %v1660_v6, %v1660_v6  ;;  %6392 = vmatprep.subr.bf16.mxu0 %v8567_v17 }
 0x3de   : > { %v7024_v8 = vpop.eup %7023  ;;  %7029 = vrcp.f32 %v1650_v37 }
 0x3df   : > { %v1662_v49 = vmul.f32 %v7024_v8, %v7008_v0  ;;  %6377 = vmatmul.mubr.msk.bf16.vlgmr.msra.gmra.mrb[28].mxu1 %vm1681_vm4, %v1674_v20  ;;  %v2165_v20 = vcombine.high %v2157_v26, %v2157_v26  ;;  %v2192_v8 = vpack.c.bf16 %v2157_v26, %v2157_v26 }
 0x3e0   : > { %6387 = vmatpush3.bf16.msra.mxu1 %v7904_v25  ;;  %6388 = vmatprep.mubr.msk.bf16.mxu1 %vm7400_vm1, %v8567_v17 }
 0x3e1   : > { %v1675_v21 = vpack.c.bf16 %v1662_v49, %v1662_v49  ;;  %6398 = vmatprep.subr.bf16.mxu1 %v8567_v17  ;;  %v2193_v49 = vpack.c.bf16 %v2165_v20, %v2165_v20 }
 0x3e2   : > { %v7026_v19 = vpop.eup %7025 }
 0x3e3   : > { %v1664_v46 = vmul.f32 %v7026_v19, %v7010_v61  ;;  %6383 = vmatmul.mubr.msk.bf16.vlgmr.msra.gmra.mrb[32].mxu0 %vm1681_vm4, %v1675_v21  ;;  %v1653_v24 = vpop.xlane.xlu0 %1652 }
 0x3e4   : > { %6393 = vmatpush3.bf16.msra.mxu0 %v7882_v35  ;;  %7031 = vrcp.f32 %v1653_v24  ;;  %6394 = vmatprep.mubr.msk.bf16.mxu0 %vm7400_vm1, %v8567_v17  ;;  %v969_v24 = vadd.f32 %v7790_v15, %v325_v13 }
 0x3e5   : > { %v1656_v25 = vpop.xlane.xlu1 %1655  ;;  %v1676_v0 = vpack.c.bf16 %v1664_v46, %v1664_v46  ;;  %6404 = vmatprep.subr.bf16.mxu0 %v8567_v17 }
 0x3e6   : > { %v7028_v50 = vpop.eup %7027  ;;  %7033 = vrcp.f32 %v1656_v25 }
 0x3e7   : > { %v1666_v48 = vmul.f32 %v7028_v50, %v7012_v9  ;;  %6389 = vmatmul.mubr.msk.bf16.vlgmr.msra.gmra.mrb[32].mxu1 %vm1681_vm4, %v1676_v0 }
 0x3e8   : > { %v7030_v61 = vpop.eup %7029  ;;  %6399 = vmatpush3.bf16.msra.mxu1 %v7885_v11  ;;  %6400 = vmatprep.mubr.msk.bf16.mxu1 %vm7400_vm1, %v8567_v17 }
 0x3e9   : > { %v1668_v35 = vmul.f32 %v7030_v61, %v7014_v4  ;;  %v1677_v2 = vpack.c.bf16 %v1666_v48, %v1666_v48  ;;  %6410 = vmatprep.subr.bf16.mxu1 %v8567_v17  ;;  %v309_v4 = vrot.slane %v7778_v62, %v8568_v12  ;;  %v2150_v62 = vcombine.high %v965_v52, %v965_v52 }
 0x3ea   : > { %v2174_v48 = vrot.slane %v969_v24, %v7785_v5 }
 0x3eb   : > { %6395 = vmatmul.mubr.msk.bf16.vlgmr.msra.gmra.mrb[36].mxu0 %vm1681_vm4, %v1677_v2  ;;  %v1678_v9 = vpack.c.bf16 %v1668_v35, %v1668_v35  ;;  %v879_v37 = vadd.f32 %v7757_v51, %v309_v4  ;;  %v883_v13 = vadd.f32 %v7759_v53, %v309_v4  ;;  %v2167_v35 = vcombine.high %v969_v24, %v969_v24 }
 0x3ec   : > { %6405 = vmatpush3.bf16.msra.mxu0 %v7897_v32  ;;  %6406 = vmatprep.mubr.msk.bf16.mxu0 %vm7400_vm1, %v8567_v17  ;;  %v2182_v2 = vcombine.high %v2174_v48, %v2174_v48  ;;  %v2196_v52 = vpack.c.bf16 %v2174_v48, %v2174_v48 }
 0x3ed   : > { %6416 = vmatprep.subr.bf16.mxu0 %v8567_v17  ;;  %v2098_v51 = vcombine.high %v879_v37, %v879_v37  ;;  %v2181_v12 = vrot.slane %v2167_v35, %v7785_v5  ;;  %v2115_v53 = vcombine.high %v883_v13, %v883_v13 }
 0x3ee   : > { %v7032_v11 = vpop.eup %7031  ;;  %v2197_v26 = vpack.c.bf16 %v2182_v2, %v2182_v2 }
 0x3ef   : > { %v1670_v6 = vmul.f32 %v7032_v11, %v7997_v31  ;;  %6401 = vmatmul.mubr.msk.bf16.vlgmr.msra.gmra.mrb[36].mxu1 %vm1681_vm4, %v1678_v9  ;;  %v2105_v31 = vrot.slane %v879_v37, %v7785_v5  ;;  %v2112_v25 = vrot.slane %v2098_v51, %v7785_v5  ;;  %v2122_v11 = vrot.slane %v883_v13, %v7785_v5 }
 0x3f0   : > { %v7034_v7 = vpop.eup %7033  ;;  %6411 = vmatpush3.bf16.msra.mxu1 %v7913_v28  ;;  %6412 = vmatprep.mubr.msk.bf16.mxu1 %vm7400_vm1, %v8567_v17 }
 0x3f1   : > { %v1672_v32 = vmul.f32 %v7034_v7, %v8001_v29  ;;  %v1679_v57 = vpack.c.bf16 %v1670_v6, %v1670_v6  ;;  %6422 = vmatprep.subr.bf16.mxu1 %v8567_v17  ;;  %v2164_v29 = vrot.slane %v2150_v62, %v7785_v5  ;;  %v2113_v21 = vcombine.high %v2105_v31, %v2105_v31 }
 0x3f2   : > { %v2140_v19 = vpack.c.bf16 %v2105_v31, %v2105_v31  ;;  %v2114_v61 = vcombine.high %v2112_v25, %v2112_v25  ;;  %v2142_v15 = vpack.c.bf16 %v2112_v25, %v2112_v25  ;;  %v2130_v4 = vcombine.high %v2122_v11, %v2122_v11 }
 0x3f3   : > { %6407 = vmatmul.mubr.msk.bf16.vlgmr.msra.gmra.mrb[40].mxu0 %vm1681_vm4, %v1679_v57  ;;  %v1680_v28 = vpack.c.bf16 %v1672_v32, %v1672_v32  ;;  %v2166_v1 = vcombine.high %v2164_v29, %v2164_v29  ;;  %v2194_v46 = vpack.c.bf16 %v2164_v29, %v2164_v29  ;;  %v2141_v0 = vpack.c.bf16 %v2113_v21, %v2113_v21 }
 0x3f4   : > { %6418 = vmatprep.mubr.msk.bf16.mxu0 %vm7400_vm1, %v8567_v17  ;;  %v2143_v9 = vpack.c.bf16 %v2114_v61, %v2114_v61  ;;  %v2144_v6 = vpack.c.bf16 %v2122_v11, %v2122_v11  ;;  %v2183_v7 = vcombine.high %v2181_v12, %v2181_v12  ;;  %v2198_v32 = vpack.c.bf16 %v2181_v12, %v2181_v12 }
 0x3f5   : > { %6417 = vmatpush3.bf16.xpose.msra.mxu0 %v2192_v8  ;;  %v2195_v50 = vpack.c.bf16 %v2166_v1, %v2166_v1  ;;  %v2129_v57 = vrot.slane %v2115_v53, %v7785_v5  ;;  %v2145_v37 = vpack.c.bf16 %v2130_v4, %v2130_v4 }
 0x3f6   : > { %6428 = vmatprep.subr.bf16.mxu0 %v8567_v17  ;;  %v2199_v62 = vpack.c.bf16 %v2183_v7, %v2183_v7 }
 0x3f7   : > { %6413 = vmatmul.mubr.msk.bf16.vlgmr.msra.gmra.mrb[40].mxu1 %vm1681_vm4, %v1680_v28  ;;  %v2131_v20 = vcombine.high %v2129_v57, %v2129_v57  ;;  %v2146_v8 = vpack.c.bf16 %v2129_v57, %v2129_v57 }
 0x3f8   : > { %6424 = vmatprep.mubr.msk.bf16.mxu1 %vm7400_vm1, %v8567_v17 }
 0x3f9   : > { %6423 = vmatpush3.bf16.xpose.msra.mxu1 %v2193_v49  ;;  %v2147_v28 = vpack.c.bf16 %v2131_v20, %v2131_v20 }
 0x3fa   : > { %6434 = vmatprep.subr.bf16.mxu1 %v8567_v17 }
 0x3fc   : > { %6419 = vmatmul.mubr.bf16.vlgmr.msra.gmra.mrb[44].mxu0 %v2140_v19 }
 0x3fd   : > { %6429 = vmatpush3.bf16.xpose.msra.mxu0 %v2194_v46  ;;  %6430 = vmatprep.mubr.msk.bf16.mxu0 %vm7400_vm1, %v8567_v17 }
 0x3fe   : > { %6440 = vmatprep.subr.bf16.mxu0 %v8567_v17 }
 0x400   : > { %6425 = vmatmul.mubr.bf16.vlgmr.msra.gmra.mrb[44].mxu1 %v2141_v0 }
 0x401   : > { %6435 = vmatpush3.bf16.xpose.msra.mxu1 %v2195_v50  ;;  %6436 = vmatprep.mubr.msk.bf16.mxu1 %vm7400_vm1, %v8567_v17 }
 0x402   : > { %6446 = vmatprep.subr.bf16.mxu1 %v8567_v17 }
 0x404   : > { %6431 = vmatmul.mubr.bf16.vlgmr.msra.gmra.mrb[48].mxu0 %v2142_v15 }
 0x405   : > { %6441 = vmatpush3.bf16.xpose.msra.mxu0 %v2196_v52  ;;  %6442 = vmatprep.mubr.msk.bf16.mxu0 %vm7400_vm1, %v8567_v17 }
 0x406   : > { %6452 = vmatprep.subr.bf16.mxu0 %v8567_v17 }
 0x408   : > { %6437 = vmatmul.mubr.bf16.vlgmr.msra.gmra.mrb[48].mxu1 %v2143_v9 }
 0x409   : > { %6447 = vmatpush3.bf16.xpose.msra.mxu1 %v2197_v26  ;;  %6448 = vmatprep.mubr.msk.bf16.mxu1 %vm7400_vm1, %v8567_v17 }
 0x40a   : > { %6458 = vmatprep.subr.bf16.mxu1 %v8567_v17 }
 0x40c   : > { %6443 = vmatmul.mubr.bf16.vlgmr.msra.gmra.mrb[52].mxu0 %v2144_v6 }
 0x40d   : > { %6453 = vmatpush3.bf16.xpose.msra.mxu0 %v2198_v32  ;;  %6454 = vmatprep.mubr.msk.bf16.mxu0 %vm7400_vm1, %v8567_v17 }
 0x40e   : > { %6464 = vmatprep.subr.bf16.mxu0 %v8567_v17 }
 0x410   : > { %6449 = vmatmul.mubr.bf16.vlgmr.msra.gmra.mrb[52].mxu1 %v2145_v37 }
 0x411   : > { %6459 = vmatpush3.bf16.xpose.msra.mxu1 %v2199_v62  ;;  %6460 = vmatprep.mubr.msk.bf16.mxu1 %vm7400_vm1, %v8567_v17 }
 0x412   : > { %6470 = vmatprep.subr.bf16.mxu1 %v8567_v17 }
 0x414   : > { %6455 = vmatmul.mubr.bf16.vlgmr.msra.gmra.mrb[56].mxu0 %v2146_v8 }
 0x415   : > { %6465 = vmatpush3.bf16.msra.mxu0 %v7891_v23  ;;  %6466 = vmatprep.mubr.msk.bf16.mxu0 %vm7400_vm1, %v8567_v17 }
 0x416   : > { %6476 = vmatprep.subr.bf16.mxu0 %v8567_v17 }
 0x418   : > { %6461 = vmatmul.mubr.bf16.vlgmr.msra.gmra.mrb[56].mxu1 %v2147_v28 }
 0x419   : > { %6471 = vmatpush3.bf16.msra.mxu1 %v7894_v10  ;;  %6472 = vmatprep.mubr.msk.bf16.mxu1 %vm7400_vm1, %v8567_v17 }
 0x41a   : > { %6482 = vmatprep.subr.bf16.mxu1 %v8567_v17 }
 0x4ae   : > { %v1723_v31 = vpop.f32.mrb[28].mxu0 }
 0x4af   : > { %v6372_v29 = vpop.f32.mrb[29].mxu0 }
 0x4b0   : > { %v1726_v49 = vpop.f32.mrb[30].mxu0 }
 0x4b1   : > { %v6373_v51 = vpop.f32.mrb[31].mxu0 }
 0x4b2   : > { %v1769_v21 = vpop.f32.mrb[28].mxu1 }
 0x4b3   : > { %v2059_v23 = vcombine.low %v1723_v31, %v1769_v21  ;;  %v6378_v19 = vpop.f32.mrb[29].mxu1 }
 0x4b4   : > { %v1772_v1 = vpop.f32.mrb[30].mxu1 }
 0x4b5   : > { %v6379_v46 = vpop.f32.mrb[31].mxu1  ;;  %v2067_v13 = vrot.slane %v2059_v23, %v7785_v5 }
 0x4b6   : > { %v1815_v24 = vpop.f32.mrb[32].mxu0 }
 0x4b7   : > { %v6384_v25 = vpop.f32.mrb[33].mxu0 }
 0x4b8   : > { %v1818_v0 = vpop.f32.mrb[34].mxu0 }
 0x4b9   : > { %v6385_v50 = vpop.f32.mrb[35].mxu0 }
 0x4ba   : > { %v1861_v48 = vpop.f32.mrb[32].mxu1 }
 0x4bb   : > { %v2060_v10 = vcombine.low %v1815_v24, %v1861_v48  ;;  %v6390_v61 = vpop.f32.mrb[33].mxu1 }
 0x4bc   : > { %v1864_v15 = vpop.f32.mrb[34].mxu1 }
 0x4bd   : > { %v2074_v35 = vrot.slane %v2060_v10, %v7785_v5  ;;  %v6391_v2 = vpop.f32.mrb[35].mxu1 }
 0x4be   : > { %v1907_v52 = vpop.f32.mrb[36].mxu0 }
 0x4bf   : > { %v2075_v9 = vcombine.low %v2067_v13, %v2074_v35  ;;  %v6396_v11 = vpop.f32.mrb[37].mxu0 }
 0x4c0   : > { %v1910_v12 = vpop.f32.mrb[38].mxu0 }
 0x4c1   : > { %v6397_v26 = vpop.f32.mrb[39].mxu0 }
 0x4c2   : > { %v1953_v53 = vpop.f32.mrb[36].mxu1 }
 0x4c3   : > { %v2076_v4 = vcombine.low %v1907_v52, %v1953_v53  ;;  %v6402_v6 = vpop.f32.mrb[37].mxu1 }
 0x4c4   : > { %v1956_v7 = vpop.f32.mrb[38].mxu1 }
 0x4c5   : > { %v6403_v32 = vpop.f32.mrb[39].mxu1  ;;  %v2084_v49 = vrot.slane %v2076_v4, %v7785_v5 }
 0x4c6   : > { %v1999_v57 = vpop.f32.mrb[40].mxu0 }
 0x4c7   : > { %v6408_v37 = vpop.f32.mrb[41].mxu0 }
 0x4c8   : > { %v2002_v62 = vpop.f32.mrb[42].mxu0 }
 0x4c9   : > { %v6409_v20 = vpop.f32.mrb[43].mxu0 }
 0x4ca   : > { %v2045_v8 = vpop.f32.mrb[40].mxu1 }
 0x4cb   : > { %v2077_v28 = vcombine.low %v1999_v57, %v2045_v8  ;;  %v6414_v31 = vpop.f32.mrb[41].mxu1 }
 0x4cc   : > { %v2048_v29 = vpop.f32.mrb[42].mxu1 }
 0x4cd   : > { %v2091_v51 = vrot.slane %v2077_v28, %v7785_v5  ;;  %v6415_v21 = vpop.f32.mrb[43].mxu1 }
 0x4cf   : > { %v2092_v23 = vcombine.low %v2084_v49, %v2091_v51  ;;  %v2286_v19 = vpop.f32.mrb[44].mxu0 }
 0x4d0   : > { %v2572_v1 = vmul.f32 0.35355338, %v2286_v19  ;;  %v6420_v46 = vpop.f32.mrb[45].mxu0 }
 0x4d1   : > { %v8092_v24 = vpack.c.bf16 %v2092_v23, %v2075_v9  ;;  %v2289_v25 = vpop.f32.mrb[46].mxu0 }
 0x4d2   : > { %v6421_v0 = vpop.f32.mrb[47].mxu0  ;;  %v2580_v50 = vsel %vm1584_vm3, %v2572_v1, -inf }
 0x4d3   : > { %2581 = vmax.xlane.f32.xlu0 %v2580_v50  ;;  %v2326_v48 = vpop.f32.mrb[44].mxu1 }
 0x4d4   : > { %v2573_v10 = vmul.f32 0.35355338, %v2326_v48  ;;  %v6426_v61 = vpop.f32.mrb[45].mxu1 }
 0x4d5   : > { %v2329_v15 = vpop.f32.mrb[46].mxu1 }
 0x4d6   : > { %v6427_v13 = vpop.f32.mrb[47].mxu1  ;;  %v2583_v35 = vsel %vm1584_vm3, %v2573_v10, -inf }
 0x4d7   : > { %v2366_v2 = vpop.f32.mrb[48].mxu0  ;;  %2584 = vmax.xlane.f32.xlu1 %v2583_v35 }
 0x4d8   : > { %v2574_v52 = vmul.f32 0.35355338, %v2366_v2  ;;  %v6432_v11 = vpop.f32.mrb[49].mxu0 }
 0x4d9   : > { %v2369_v12 = vpop.f32.mrb[50].mxu0 }
 0x4da   : > { %v6433_v26 = vpop.f32.mrb[51].mxu0  ;;  %v2586_v9 = vsel %vm1584_vm3, %v2574_v52, -inf }
 0x4db   : > { %2587 = vmax.xlane.f32.xlu0 %v2586_v9  ;;  %v2406_v53 = vpop.f32.mrb[48].mxu1 }
 0x4dc   : > { %v2575_v4 = vmul.f32 0.35355338, %v2406_v53  ;;  %v6438_v6 = vpop.f32.mrb[49].mxu1 }
 0x4dd   : > { %v2409_v7 = vpop.f32.mrb[50].mxu1 }
 0x4de   : > { %v6439_v32 = vpop.f32.mrb[51].mxu1  ;;  %v2589_v57 = vsel %vm1584_vm3, %v2575_v4, -inf }
 0x4df   : > { %v2446_v37 = vpop.f32.mrb[52].mxu0  ;;  %2590 = vmax.xlane.f32.xlu1 %v2589_v57 }
 0x4e0   : > { %v2576_v62 = vmul.f32 0.35355338, %v2446_v37  ;;  %v6444_v20 = vpop.f32.mrb[53].mxu0 }
 0x4e1   : > { %v2449_v8 = vpop.f32.mrb[54].mxu0 }
 0x4e2   : > { %v6445_v28 = vpop.f32.mrb[55].mxu0  ;;  %v2592_v31 = vsel %vm1584_vm3, %v2576_v62, -inf }
 0x4e3   : > { %2593 = vmax.xlane.f32.xlu0 %v2592_v31  ;;  %v2486_v29 = vpop.f32.mrb[52].mxu1 }
 0x4e4   : > { %v2577_v49 = vmul.f32 0.35355338, %v2486_v29  ;;  %v6450_v51 = vpop.f32.mrb[53].mxu1 }
 0x4e5   : > { %v2489_v21 = vpop.f32.mrb[54].mxu1 }
 0x4e6   : > { %v6451_v23 = vpop.f32.mrb[55].mxu1  ;;  %v2595_v19 = vsel %vm1584_vm3, %v2577_v49, -inf }
 0x4e7   : > { %v2526_v46 = vpop.f32.mrb[56].mxu0  ;;  %2596 = vmax.xlane.f32.xlu1 %v2595_v19 }
 0x4e8   : > { %v2578_v25 = vmul.f32 0.35355338, %v2526_v46  ;;  %v6456_v0 = vpop.f32.mrb[57].mxu0 }
 0x4e9   : > { %v2529_v50 = vpop.f32.mrb[58].mxu0 }
 0x4ea   : > { %v6457_v48 = vpop.f32.mrb[59].mxu0  ;;  %v2598_v61 = vsel %vm1584_vm3, %v2578_v25, -inf }
 0x4eb   : > { %2599 = vmax.xlane.f32.xlu0 %v2598_v61  ;;  %v2566_v15 = vpop.f32.mrb[56].mxu1 }
 0x4ec   : > { %v2579_v13 = vmul.f32 0.35355338, %v2566_v15  ;;  %v6462_v35 = vpop.f32.mrb[57].mxu1 }
 0x4ed   : > { %v2569_v2 = vpop.f32.mrb[58].mxu1 }
 0x4ee   : > { %v6463_v11 = vpop.f32.mrb[59].mxu1  ;;  %v2601_v12 = vsel %vm1584_vm3, %v2579_v13, -inf }
 0x4ef   : > { %2602 = vmax.xlane.f32.xlu1 %v2601_v12 }
 0x560   : > { %v2582_v26 = vpop.xlane.xlu0 %2581 }
 0x561   : > { %v2604_v9 = vsub.f32 %v2572_v1, %v2582_v26 }
 0x563   : > { %v2612_v53 = vmul.f32 1.442695, %v2604_v9 }
 0x564   : > { %v2585_v6 = vpop.xlane.xlu1 %2584 }
 0x565   : > { %7035 = vpow2.f32 %v2612_v53  ;;  %v2605_v7 = vsub.f32 %v2573_v10, %v2585_v6 }
 0x567   : > { %v2614_v32 = vmul.f32 1.442695, %v2605_v7 }
 0x568   : > { %v2588_v57 = vpop.xlane.xlu0 %2587 }
 0x569   : > { %7037 = vpow2.f32 %v2614_v32  ;;  %v2606_v37 = vsub.f32 %v2574_v52, %v2588_v57 }
 0x56b   : > { %v2616_v20 = vmul.f32 1.442695, %v2606_v37 }
 0x56c   : > { %v2591_v8 = vpop.xlane.xlu1 %2590 }
 0x56d   : > { %7039 = vpow2.f32 %v2616_v20  ;;  %v2607_v28 = vsub.f32 %v2575_v4, %v2591_v8 }
 0x56f   : > { %v7036_v31 = vpop.eup %7035  ;;  %v2618_v29 = vmul.f32 1.442695, %v2607_v28 }
 0x570   : > { %v2594_v51 = vpop.xlane.xlu0 %2593  ;;  %v2628_v21 = vsel %vm1584_vm3, %v7036_v31, 0.0 }
 0x571   : > { %7041 = vpow2.f32 %v2618_v29  ;;  %v2608_v23 = vsub.f32 %v2576_v62, %v2594_v51  ;;  %2629 = vadd.xlane.f32.xlu0 %v2628_v21 }
 0x573   : > { %v7038_v1 = vpop.eup %7037  ;;  %v2620_v19 = vmul.f32 1.442695, %v2608_v23 }
 0x574   : > { %v2597_v46 = vpop.xlane.xlu1 %2596  ;;  %v2631_v10 = vsel %vm1584_vm3, %v7038_v1, 0.0 }
 0x575   : > { %7043 = vpow2.f32 %v2620_v19  ;;  %v2609_v0 = vsub.f32 %v2577_v49, %v2597_v46  ;;  %2632 = vadd.xlane.f32.xlu1 %v2631_v10 }
 0x577   : > { %v7040_v52 = vpop.eup %7039  ;;  %v2622_v50 = vmul.f32 1.442695, %v2609_v0  ;;  %v328_v0 = vsub.s32 6, %v7763_v34 }
 0x578   : > { %v2600_v48 = vpop.xlane.xlu0 %2599  ;;  %v2634_v4 = vsel %vm1584_vm3, %v7040_v52, 0.0 }
 0x579   : > { %7045 = vpow2.f32 %v2622_v50  ;;  %v2610_v61 = vsub.f32 %v2578_v25, %v2600_v48  ;;  %2635 = vadd.xlane.f32.xlu0 %v2634_v4  ;;  %v8133_v4 = vld [vmem:[%s7775_s23] sm:$0xff] }
 0x57b   : > { %v7042_v15 = vpop.eup %7041  ;;  %v2624_v35 = vmul.f32 1.442695, %v2610_v61  ;;  %v329_v61 = vrot.slane %v8133_v4, %v328_v0 }
 0x57c   : > { %v2603_v62 = vpop.xlane.xlu1 %2602  ;;  %v2637_v2 = vsel %vm1584_vm3, %v7042_v15, 0.0 }
 0x57d   : > { %7047 = vpow2.f32 %v2624_v35  ;;  %v2611_v11 = vsub.f32 %v2579_v13, %v2603_v62  ;;  %2638 = vadd.xlane.f32.xlu1 %v2637_v2  ;;  %v1006_v2 = vadd.f32 %v7805_v39, %v329_v61 }
 0x57f   : > { %v7044_v12 = vpop.eup %7043  ;;  %v2626_v26 = vmul.f32 1.442695, %v2611_v11 }
 0x580   : > { %v2640_v49 = vsel %vm1584_vm3, %v7044_v12, 0.0 }
 0x581   : > { %7049 = vpow2.f32 %v2626_v26  ;;  %2641 = vadd.xlane.f32.xlu0 %v2640_v49  ;;  %v8569_v26 = vsub.s32 2, %v7763_v34 }
 0x583   : > { %v7046_v9 = vpop.eup %7045  ;;  %v313_v49 = vrot.slane %v8133_v4, %v8569_v26 }
 0x584   : > { %v2643_v53 = vsel %vm1584_vm3, %v7046_v9, 0.0 }
 0x585   : > { %2644 = vadd.xlane.f32.xlu1 %v2643_v53  ;;  %v3150_v53 = vrot.slane %v1006_v2, %v7785_v5 }
 0x587   : > { %v8108_v25 = vpop.eup %7047 }
 0x588   : > { %v2646_v6 = vsel %vm1584_vm3, %v8108_v25, 0.0 }
 0x589   : > { %2647 = vadd.xlane.f32.xlu0 %v2646_v6  ;;  %v920_v6 = vadd.f32 %v7765_v54, %v313_v49 }
 0x58b   : > { %v8112_v7 = vpop.eup %7049  ;;  %v3091_v54 = vcombine.high %v920_v6, %v920_v6 }
 0x58c   : > { %v2649_v13 = vsel %vm1584_vm3, %v8112_v7, 0.0 }
 0x58d   : > { %2650 = vadd.xlane.f32.xlu1 %v2649_v13  ;;  %v3143_v13 = vcombine.high %v1006_v2, %v1006_v2 }
 0x5fe   : > { %v2630_v32 = vpop.xlane.xlu0 %2629 }
 0x5ff   : > { %7051 = vrcp.f32 %v2630_v32  ;;  %v3158_v32 = vcombine.high %v3150_v53, %v3150_v53 }
 0x602   : > { %v2633_v57 = vpop.xlane.xlu1 %2632 }
 0x603   : > { %7053 = vrcp.f32 %v2633_v57  ;;  %v3185_v57 = vpack.c.bf16 %v3150_v53, %v3150_v53 }
 0x606   : > { %v2636_v37 = vpop.xlane.xlu0 %2635 }
 0x607   : > { %7055 = vrcp.f32 %v2636_v37 }
 0x609   : > { %v7052_v20 = vpop.eup %7051 }
 0x60a   : > { %v2653_v8 = vmul.f32 %v7052_v20, %v7036_v31  ;;  %v2639_v28 = vpop.xlane.xlu1 %2638  ;;  %v3157_v20 = vrot.slane %v3143_v13, %v7785_v5 }
 0x60b   : > { %7057 = vrcp.f32 %v2639_v28 }
 0x60c   : > { %v2668_v29 = vpack.c.bf16 %v2653_v8, %v2653_v8  ;;  %v3186_v8 = vpack.c.bf16 %v3158_v32, %v3158_v32 }
 0x60d   : > { %v7054_v51 = vpop.eup %7053 }
 0x60e   : > { %v2655_v21 = vmul.f32 %v7054_v51, %v7038_v1  ;;  %6467 = vmatmul.mubr.msk.bf16.vlgmr.msra.gmra.mrb[60].mxu0 %vm1681_vm4, %v2668_v29  ;;  %v2642_v23 = vpop.xlane.xlu0 %2641  ;;  %v3159_v29 = vcombine.high %v3157_v20, %v3157_v20  ;;  %v3187_v51 = vpack.c.bf16 %v3157_v20, %v3157_v20 }
 0x60f   : > { %6477 = vmatpush3.bf16.msra.mxu0 %v7916_v30  ;;  %7059 = vrcp.f32 %v2642_v23  ;;  %6478 = vmatprep.mubr.msk.bf16.mxu0 %vm7400_vm1, %v8567_v17  ;;  %v3105_v23 = vrot.slane %v3091_v54, %v7785_v5 }
 0x610   : > { %v2669_v19 = vpack.c.bf16 %v2655_v21, %v2655_v21  ;;  %6488 = vmatprep.subr.bf16.mxu0 %v8567_v17  ;;  %v1010_v21 = vadd.f32 %v7813_v43, %v329_v61 }
 0x611   : > { %v7056_v46 = vpop.eup %7055  ;;  %v3135_v43 = vpack.c.bf16 %v3105_v23, %v3105_v23 }
 0x612   : > { %v2657_v10 = vmul.f32 %v7056_v46, %v7040_v52  ;;  %6473 = vmatmul.mubr.msk.bf16.vlgmr.msra.gmra.mrb[60].mxu1 %vm1681_vm4, %v2669_v19  ;;  %v2645_v31 = vpop.xlane.xlu1 %2644  ;;  %v3188_v46 = vpack.c.bf16 %v3159_v29, %v3159_v29 }
 0x613   : > { %6483 = vmatpush3.bf16.msra.mxu1 %v7930_v45  ;;  %7061 = vrcp.f32 %v2645_v31  ;;  %6484 = vmatprep.mubr.msk.bf16.mxu1 %vm7400_vm1, %v8567_v17  ;;  %v3107_v31 = vcombine.high %v3105_v23, %v3105_v23 }
 0x614   : > { %v2670_v30 = vpack.c.bf16 %v2657_v10, %v2657_v10  ;;  %6494 = vmatprep.subr.bf16.mxu1 %v8567_v17  ;;  %v3167_v10 = vrot.slane %v1010_v21, %v7785_v5 }
 0x615   : > { %v7058_v1 = vpop.eup %7057 }
 0x616   : > { %v2659_v50 = vmul.f32 %v7058_v1, %v7042_v15  ;;  %6479 = vmatmul.mubr.msk.bf16.vlgmr.msra.gmra.mrb[64].mxu0 %vm1681_vm4, %v2670_v30  ;;  %v2648_v52 = vpop.xlane.xlu0 %2647  ;;  %v924_v30 = vadd.f32 %v7769_v56, %v313_v49  ;;  %v3160_v1 = vcombine.high %v1010_v21, %v1010_v21  ;;  %v3175_v0 = vcombine.high %v3167_v10, %v3167_v10 }
 0x617   : > { %6489 = vmatpush3.bf16.msra.mxu0 %v7907_v27  ;;  %7063 = vrcp.f32 %v2648_v52  ;;  %6490 = vmatprep.mubr.msk.bf16.mxu0 %vm7400_vm1, %v8567_v17  ;;  %v3136_v52 = vpack.c.bf16 %v3107_v31, %v3107_v31 }
 0x618   : > { %v2671_v45 = vpack.c.bf16 %v2659_v50, %v2659_v50  ;;  %6500 = vmatprep.subr.bf16.mxu0 %v8567_v17  ;;  %v3189_v50 = vpack.c.bf16 %v3167_v10, %v3167_v10  ;;  %v3190_v61 = vpack.c.bf16 %v3175_v0, %v3175_v0  ;;  %v3108_v56 = vcombine.high %v924_v30, %v924_v30 }
 0x619   : > { %v7060_v48 = vpop.eup %7059 }
 0x61a   : > { %v2661_v35 = vmul.f32 %v7060_v48, %v7044_v12  ;;  %6485 = vmatmul.mubr.msk.bf16.vlgmr.msra.gmra.mrb[64].mxu1 %vm1681_vm4, %v2671_v45  ;;  %v2651_v15 = vpop.xlane.xlu1 %2650  ;;  %v3115_v45 = vrot.slane %v924_v30, %v7785_v5  ;;  %v3174_v48 = vrot.slane %v3160_v1, %v7785_v5  ;;  %v3122_v2 = vrot.slane %v3108_v56, %v7785_v5 }
 0x61b   : > { %6495 = vmatpush3.bf16.msra.mxu1 %v7910_v41  ;;  %7065 = vrcp.f32 %v2651_v15  ;;  %6496 = vmatprep.mubr.msk.bf16.mxu1 %vm7400_vm1, %v8567_v17 }
 0x61c   : > { %v2672_v27 = vpack.c.bf16 %v2661_v35, %v2661_v35  ;;  %6506 = vmatprep.subr.bf16.mxu1 %v8567_v17  ;;  %v3123_v35 = vcombine.high %v3115_v45, %v3115_v45  ;;  %v3137_v15 = vpack.c.bf16 %v3115_v45, %v3115_v45  ;;  %v3139_v26 = vpack.c.bf16 %v3122_v2, %v3122_v2 }
 0x61d   : > { %v7062_v62 = vpop.eup %7061 }
 0x61e   : > { %v2663_v11 = vmul.f32 %v7062_v62, %v7046_v9  ;;  %6491 = vmatmul.mubr.msk.bf16.vlgmr.msra.gmra.mrb[68].mxu0 %vm1681_vm4, %v2672_v27  ;;  %v3176_v27 = vcombine.high %v3174_v48, %v3174_v48  ;;  %v3191_v62 = vpack.c.bf16 %v3174_v48, %v3174_v48 }
 0x61f   : > { %6501 = vmatpush3.bf16.msra.mxu0 %v7919_v38  ;;  %6502 = vmatprep.mubr.msk.bf16.mxu0 %vm7400_vm1, %v8567_v17 }
 0x620   : > { %v2673_v12 = vpack.c.bf16 %v2663_v11, %v2663_v11  ;;  %6512 = vmatprep.subr.bf16.mxu0 %v8567_v17  ;;  %v3138_v11 = vpack.c.bf16 %v3123_v35, %v3123_v35 }
 0x621   : > { %v7064_v41 = vpop.eup %7063 }
 0x622   : > { %v2665_v39 = vmul.f32 %v7064_v41, %v8108_v25  ;;  %6497 = vmatmul.mubr.msk.bf16.vlgmr.msra.gmra.mrb[68].mxu1 %vm1681_vm4, %v2673_v12  ;;  %v3098_v25 = vrot.slane %v920_v6, %v7785_v5  ;;  %v3192_v12 = vpack.c.bf16 %v3176_v27, %v3176_v27  ;;  %v3124_v41 = vcombine.high %v3122_v2, %v3122_v2 }
 0x623   : > { %6507 = vmatpush3.bf16.msra.mxu1 %v7944_v18  ;;  %6508 = vmatprep.mubr.msk.bf16.mxu1 %vm7400_vm1, %v8567_v17 }
 0x624   : > { %v2674_v38 = vpack.c.bf16 %v2665_v39, %v2665_v39  ;;  %6518 = vmatprep.subr.bf16.mxu1 %v8567_v17  ;;  %v3133_v28 = vpack.c.bf16 %v3098_v25, %v3098_v25  ;;  %v3140_v49 = vpack.c.bf16 %v3124_v41, %v3124_v41 }
 0x625   : > { %v7066_v9 = vpop.eup %7065 }
 0x626   : > { %v2667_v37 = vmul.f32 %v7066_v9, %v8112_v7  ;;  %6503 = vmatmul.mubr.msk.bf16.vlgmr.msra.gmra.mrb[72].mxu0 %vm1681_vm4, %v2674_v38  ;;  %v3106_v7 = vcombine.high %v3098_v25, %v3098_v25 }
 0x627   : > { %6514 = vmatprep.mubr.msk.bf16.mxu0 %vm7400_vm1, %v8567_v17 }
 0x628   : > { %6513 = vmatpush3.bf16.xpose.msra.mxu0 %v3185_v57  ;;  %v2675_v18 = vpack.c.bf16 %v2667_v37, %v2667_v37  ;;  %v3134_v19 = vpack.c.bf16 %v3106_v7, %v3106_v7 }
 0x629   : > { %6524 = vmatprep.subr.bf16.mxu0 %v8567_v17 }
 0x62a   : > { %6509 = vmatmul.mubr.msk.bf16.vlgmr.msra.gmra.mrb[72].mxu1 %vm1681_vm4, %v2675_v18 }
 0x62b   : > { %6520 = vmatprep.mubr.msk.bf16.mxu1 %vm7400_vm1, %v8567_v17 }
 0x62c   : > { %6519 = vmatpush3.bf16.xpose.msra.mxu1 %v3186_v8 }
 0x62d   : > { %6530 = vmatprep.subr.bf16.mxu1 %v8567_v17 }
 0x62f   : > { %6515 = vmatmul.mubr.bf16.vlgmr.msra.gmra.mrb[76].mxu0 %v3133_v28 }
 0x630   : > { %6525 = vmatpush3.bf16.xpose.msra.mxu0 %v3187_v51  ;;  %6526 = vmatprep.mubr.msk.bf16.mxu0 %vm7400_vm1, %v8567_v17 }
 0x631   : > { %6536 = vmatprep.subr.bf16.mxu0 %v8567_v17 }
 0x633   : > { %6521 = vmatmul.mubr.bf16.vlgmr.msra.gmra.mrb[76].mxu1 %v3134_v19 }
 0x634   : > { %6531 = vmatpush3.bf16.xpose.msra.mxu1 %v3188_v46  ;;  %6532 = vmatprep.mubr.msk.bf16.mxu1 %vm7400_vm1, %v8567_v17 }
 0x635   : > { %6542 = vmatprep.subr.bf16.mxu1 %v8567_v17 }
 0x637   : > { %6527 = vmatmul.mubr.bf16.vlgmr.msra.gmra.mrb[80].mxu0 %v3135_v43 }
 0x638   : > { %6537 = vmatpush3.bf16.xpose.msra.mxu0 %v3189_v50  ;;  %6538 = vmatprep.mubr.msk.bf16.mxu0 %vm7400_vm1, %v8567_v17 }
 0x639   : > { %6548 = vmatprep.subr.bf16.mxu0 %v8567_v17 }
 0x63b   : > { %6533 = vmatmul.mubr.bf16.vlgmr.msra.gmra.mrb[80].mxu1 %v3136_v52 }
 0x63c   : > { %6543 = vmatpush3.bf16.xpose.msra.mxu1 %v3190_v61  ;;  %6544 = vmatprep.mubr.msk.bf16.mxu1 %vm7400_vm1, %v8567_v17 }
 0x63d   : > { %6554 = vmatprep.subr.bf16.mxu1 %v8567_v17 }
 0x63f   : > { %6539 = vmatmul.mubr.bf16.vlgmr.msra.gmra.mrb[84].mxu0 %v3137_v15 }
 0x640   : > { %6549 = vmatpush3.bf16.xpose.msra.mxu0 %v3191_v62  ;;  %6550 = vmatprep.mubr.msk.bf16.mxu0 %vm7400_vm1, %v8567_v17 }
 0x641   : > { %6560 = vmatprep.subr.bf16.mxu0 %v8567_v17 }
 0x643   : > { %6545 = vmatmul.mubr.bf16.vlgmr.msra.gmra.mrb[84].mxu1 %v3138_v11 }
 0x644   : > { %6555 = vmatpush3.bf16.xpose.msra.mxu1 %v3192_v12  ;;  %6556 = vmatprep.mubr.msk.bf16.mxu1 %vm7400_vm1, %v8567_v17 }
 0x645   : > { %6566 = vmatprep.subr.bf16.mxu1 %v8567_v17 }
 0x647   : > { %6551 = vmatmul.mubr.bf16.vlgmr.msra.gmra.mrb[88].mxu0 %v3139_v26 }
 0x648   : > { %6561 = vmatpush3.bf16.msra.mxu0 %v7922_v36  ;;  %6562 = vmatprep.mubr.msk.bf16.mxu0 %vm7400_vm1, %v8567_v17 }
 0x649   : > { %6572 = vmatprep.subr.bf16.mxu0 %v8567_v17 }
 0x64b   : > { %6557 = vmatmul.mubr.bf16.vlgmr.msra.gmra.mrb[88].mxu1 %v3140_v49 }
 0x64c   : > { %6567 = vmatpush3.bf16.msra.mxu1 %v7925_v3  ;;  %6568 = vmatprep.mubr.msk.bf16.mxu1 %vm7400_vm1, %v8567_v17 }
 0x64d   : > { %6578 = vmatprep.subr.bf16.mxu1 %v8567_v17 }
 0x6e1   : > { %v2716_v53 = vpop.f32.mrb[60].mxu0 }
 0x6e2   : > { %v6468_v39 = vpop.f32.mrb[61].mxu0 }
 0x6e3   : > { %v2719_v38 = vpop.f32.mrb[62].mxu0 }
 0x6e4   : > { %v6469_v9 = vpop.f32.mrb[63].mxu0 }
 0x6e5   : > { %v2762_v6 = vpop.f32.mrb[60].mxu1 }
 0x6e6   : > { %v3052_v36 = vcombine.low %v2716_v53, %v2762_v6  ;;  %v6474_v13 = vpop.f32.mrb[61].mxu1 }
 0x6e7   : > { %v2765_v32 = vpop.f32.mrb[62].mxu1 }
 0x6e8   : > { %v6475_v57 = vpop.f32.mrb[63].mxu1  ;;  %v3060_v28 = vrot.slane %v3052_v36, %v7785_v5 }
 0x6e9   : > { %v2808_v37 = vpop.f32.mrb[64].mxu0 }
 0x6ea   : > { %v6480_v18 = vpop.f32.mrb[65].mxu0 }
 0x6eb   : > { %v2811_v25 = vpop.f32.mrb[66].mxu0 }
 0x6ec   : > { %v6481_v20 = vpop.f32.mrb[67].mxu0 }
 0x6ed   : > { %v2854_v8 = vpop.f32.mrb[64].mxu1 }
 0x6ee   : > { %v3053_v3 = vcombine.low %v2808_v37, %v2854_v8  ;;  %v6486_v54 = vpop.f32.mrb[65].mxu1 }
 0x6ef   : > { %v2857_v7 = vpop.f32.mrb[66].mxu1 }
 0x6f0   : > { %v3067_v29 = vrot.slane %v3053_v3, %v7785_v5  ;;  %v6487_v51 = vpop.f32.mrb[67].mxu1 }
 0x6f1   : > { %v2900_v21 = vpop.f32.mrb[68].mxu0 }
 0x6f2   : > { %v3068_v23 = vcombine.low %v3060_v28, %v3067_v29  ;;  %v6492_v19 = vpop.f32.mrb[69].mxu0 }
 0x6f3   : > { %v2903_v46 = vpop.f32.mrb[70].mxu0 }
 0x6f4   : > { %v6493_v10 = vpop.f32.mrb[71].mxu0 }
 0x6f5   : > { %v2946_v31 = vpop.f32.mrb[68].mxu1 }
 0x6f6   : > { %v3069_v43 = vcombine.low %v2900_v21, %v2946_v31  ;;  %v6498_v30 = vpop.f32.mrb[69].mxu1 }
 0x6f7   : > { %v2949_v1 = vpop.f32.mrb[70].mxu1 }
 0x6f8   : > { %v6499_v0 = vpop.f32.mrb[71].mxu1  ;;  %v3077_v27 = vrot.slane %v3069_v43, %v7785_v5 }
 0x6f9   : > { %v2992_v50 = vpop.f32.mrb[72].mxu0 }
 0x6fa   : > { %v6504_v52 = vpop.f32.mrb[73].mxu0 }
 0x6fb   : > { %v2995_v45 = vpop.f32.mrb[74].mxu0 }
 0x6fc   : > { %v6505_v48 = vpop.f32.mrb[75].mxu0 }
 0x6fd   : > { %v3038_v61 = vpop.f32.mrb[72].mxu1 }
 0x6fe   : > { %v3070_v56 = vcombine.low %v2992_v50, %v3038_v61  ;;  %v6510_v35 = vpop.f32.mrb[73].mxu1 }
 0x6ff   : > { %v3041_v15 = vpop.f32.mrb[74].mxu1 }
 0x700   : > { %v3084_v62 = vrot.slane %v3070_v56, %v7785_v5  ;;  %v6511_v2 = vpop.f32.mrb[75].mxu1 }
 0x702   : > { %v3085_v11 = vcombine.low %v3077_v27, %v3084_v62  ;;  %v3279_v12 = vpop.f32.mrb[76].mxu0 }
 0x703   : > { %v3565_v41 = vmul.f32 0.35355338, %v3279_v12  ;;  %v6516_v26 = vpop.f32.mrb[77].mxu0 }
 0x704   : > { %v3282_v49 = vpop.f32.mrb[78].mxu0  ;;  %v8206_v53 = vpack.c.bf16 %v3085_v11, %v3068_v23 }
 0x705   : > { %v6517_v39 = vpop.f32.mrb[79].mxu0  ;;  %v3573_v38 = vsel %vm1584_vm3, %v3565_v41, -inf }
 0x706   : > { %3574 = vmax.xlane.f32.xlu0 %v3573_v38  ;;  %v3319_v9 = vpop.f32.mrb[76].mxu1 }
 0x707   : > { %v3566_v6 = vmul.f32 0.35355338, %v3319_v9  ;;  %v6522_v36 = vpop.f32.mrb[77].mxu1 }
 0x708   : > { %v3322_v13 = vpop.f32.mrb[78].mxu1 }
 0x709   : > { %v6523_v32 = vpop.f32.mrb[79].mxu1  ;;  %v3576_v57 = vsel %vm1584_vm3, %v3566_v6, -inf }
 0x70a   : > { %v3359_v37 = vpop.f32.mrb[80].mxu0  ;;  %3577 = vmax.xlane.f32.xlu1 %v3576_v57 }
 0x70b   : > { %v3567_v18 = vmul.f32 0.35355338, %v3359_v37  ;;  %v6528_v25 = vpop.f32.mrb[81].mxu0 }
 0x70c   : > { %v3362_v20 = vpop.f32.mrb[82].mxu0 }
 0x70d   : > { %v6529_v8 = vpop.f32.mrb[83].mxu0  ;;  %v3579_v3 = vsel %vm1584_vm3, %v3567_v18, -inf }
 0x70e   : > { %3580 = vmax.xlane.f32.xlu0 %v3579_v3  ;;  %v3399_v54 = vpop.f32.mrb[80].mxu1 }
 0x70f   : > { %v3568_v7 = vmul.f32 0.35355338, %v3399_v54  ;;  %v6534_v28 = vpop.f32.mrb[81].mxu1 }
 0x710   : > { %v3402_v29 = vpop.f32.mrb[82].mxu1 }
 0x711   : > { %v6535_v51 = vpop.f32.mrb[83].mxu1  ;;  %v3582_v21 = vsel %vm1584_vm3, %v3568_v7, -inf }
 0x712   : > { %v3439_v23 = vpop.f32.mrb[84].mxu0  ;;  %3583 = vmax.xlane.f32.xlu1 %v3582_v21 }
 0x713   : > { %v3569_v19 = vmul.f32 0.35355338, %v3439_v23  ;;  %v6540_v46 = vpop.f32.mrb[85].mxu0 }
 0x714   : > { %v3442_v10 = vpop.f32.mrb[86].mxu0 }
 0x715   : > { %v6541_v31 = vpop.f32.mrb[87].mxu0  ;;  %v3585_v43 = vsel %vm1584_vm3, %v3569_v19, -inf }
 0x716   : > { %3586 = vmax.xlane.f32.xlu0 %v3585_v43  ;;  %v3479_v30 = vpop.f32.mrb[84].mxu1 }
 0x717   : > { %v3570_v1 = vmul.f32 0.35355338, %v3479_v30  ;;  %v6546_v0 = vpop.f32.mrb[85].mxu1 }
 0x718   : > { %v3482_v50 = vpop.f32.mrb[86].mxu1 }
 0x719   : > { %v6547_v52 = vpop.f32.mrb[87].mxu1  ;;  %v3588_v45 = vsel %vm1584_vm3, %v3570_v1, -inf }
 0x71a   : > { %v3519_v48 = vpop.f32.mrb[88].mxu0  ;;  %3589 = vmax.xlane.f32.xlu1 %v3588_v45 }
 0x71b   : > { %v3571_v61 = vmul.f32 0.35355338, %v3519_v48  ;;  %v6552_v56 = vpop.f32.mrb[89].mxu0 }
 0x71c   : > { %v3522_v35 = vpop.f32.mrb[90].mxu0 }
 0x71d   : > { %v6553_v15 = vpop.f32.mrb[91].mxu0  ;;  %v3591_v27 = vsel %vm1584_vm3, %v3571_v61, -inf }
 0x71e   : > { %3592 = vmax.xlane.f32.xlu0 %v3591_v27  ;;  %v3559_v62 = vpop.f32.mrb[88].mxu1 }
 0x71f   : > { %v3572_v2 = vmul.f32 0.35355338, %v3559_v62  ;;  %v6558_v11 = vpop.f32.mrb[89].mxu1 }
 0x720   : > { %v3562_v12 = vpop.f32.mrb[90].mxu1 }
 0x721   : > { %v6559_v26 = vpop.f32.mrb[91].mxu1  ;;  %v3594_v49 = vsel %vm1584_vm3, %v3572_v2, -inf }
 0x722   : > { %3595 = vmax.xlane.f32.xlu1 %v3594_v49 }
 0x793   : > { %v3575_v39 = vpop.xlane.xlu0 %3574 }
 0x794   : > { %v3597_v38 = vsub.f32 %v3565_v41, %v3575_v39 }
 0x796   : > { %v3605_v9 = vmul.f32 1.442695, %v3597_v38 }
 0x797   : > { %v3578_v36 = vpop.xlane.xlu1 %3577 }
 0x798   : > { %7067 = vpow2.f32 %v3605_v9  ;;  %v3598_v13 = vsub.f32 %v3566_v6, %v3578_v36 }
 0x79a   : > { %v3607_v32 = vmul.f32 1.442695, %v3598_v13 }
 0x79b   : > { %v3581_v57 = vpop.xlane.xlu0 %3580 }
 0x79c   : > { %7069 = vpow2.f32 %v3607_v32  ;;  %v3599_v37 = vsub.f32 %v3567_v18, %v3581_v57 }
 0x79e   : > { %v3609_v25 = vmul.f32 1.442695, %v3599_v37 }
 0x79f   : > { %v3584_v20 = vpop.xlane.xlu1 %3583 }
 0x7a0   : > { %7071 = vpow2.f32 %v3609_v25  ;;  %v3600_v8 = vsub.f32 %v3568_v7, %v3584_v20 }
 0x7a2   : > { %v7068_v3 = vpop.eup %7067  ;;  %v3611_v54 = vmul.f32 1.442695, %v3600_v8  ;;  %v332_v8 = vsub.s32 7, %v7763_v34 }
 0x7a3   : > { %v3587_v28 = vpop.xlane.xlu0 %3586  ;;  %v3621_v29 = vsel %vm1584_vm3, %v7068_v3, 0.0 }
 0x7a4   : > { %7073 = vpow2.f32 %v3611_v54  ;;  %v3601_v51 = vsub.f32 %v3569_v19, %v3587_v28  ;;  %3622 = vadd.xlane.f32.xlu0 %v3621_v29  ;;  %v333_v29 = vrot.slane %v8133_v4, %v332_v8 }
 0x7a6   : > { %v7070_v41 = vpop.eup %7069  ;;  %v3613_v21 = vmul.f32 1.442695, %v3601_v51 }
 0x7a7   : > { %v3590_v23 = vpop.xlane.xlu1 %3589  ;;  %v3624_v6 = vsel %vm1584_vm3, %v7070_v41, 0.0 }
 0x7a8   : > { %7075 = vpow2.f32 %v3613_v21  ;;  %v3602_v46 = vsub.f32 %v3570_v1, %v3590_v23  ;;  %3625 = vadd.xlane.f32.xlu1 %v3624_v6  ;;  %v1008_v23 = vadd.f32 %v7810_v42, %v333_v29 }
 0x7aa   : > { %v7072_v18 = vpop.eup %7071  ;;  %v3615_v10 = vmul.f32 1.442695, %v3602_v46 }
 0x7ab   : > { %v3593_v31 = vpop.xlane.xlu0 %3592  ;;  %v3627_v7 = vsel %vm1584_vm3, %v7072_v18, 0.0 }
 0x7ac   : > { %7077 = vpow2.f32 %v3615_v10  ;;  %v3603_v43 = vsub.f32 %v3571_v61, %v3593_v31  ;;  %3628 = vadd.xlane.f32.xlu0 %v3627_v7  ;;  %v4143_v31 = vrot.slane %v1008_v23, %v7785_v5 }
 0x7ae   : > { %v7074_v30 = vpop.eup %7073  ;;  %v3617_v0 = vmul.f32 1.442695, %v3603_v43 }
 0x7af   : > { %v3596_v19 = vpop.xlane.xlu1 %3595  ;;  %v3630_v50 = vsel %vm1584_vm3, %v7074_v30, 0.0 }
 0x7b0   : > { %7079 = vpow2.f32 %v3617_v0  ;;  %v3604_v52 = vsub.f32 %v3572_v2, %v3596_v19  ;;  %3631 = vadd.xlane.f32.xlu1 %v3630_v50 }
 0x7b2   : > { %v7076_v45 = vpop.eup %7075  ;;  %v3619_v48 = vmul.f32 1.442695, %v3604_v52 }
 0x7b3   : > { %v3633_v1 = vsel %vm1584_vm3, %v7076_v45, 0.0 }
 0x7b4   : > { %7081 = vpow2.f32 %v3619_v48  ;;  %3634 = vadd.xlane.f32.xlu0 %v3633_v1 }
 0x7b6   : > { %v7078_v56 = vpop.eup %7077 }
 0x7b7   : > { %v3636_v35 = vsel %vm1584_vm3, %v7078_v56, 0.0 }
 0x7b8   : > { %3637 = vadd.xlane.f32.xlu1 %v3636_v35  ;;  %v1012_v35 = vadd.f32 %v7817_v44, %v333_v29 }
 0x7ba   : > { %v8222_v61 = vpop.eup %7079 }
 0x7bb   : > { %v3639_v15 = vsel %vm1584_vm3, %v8222_v61, 0.0 }
 0x7bc   : > { %3640 = vadd.xlane.f32.xlu0 %v3639_v15 }
 0x7be   : > { %v8226_v27 = vpop.eup %7081 }
 0x7bf   : > { %v3642_v62 = vsel %vm1584_vm3, %v8226_v27, 0.0 }
 0x7c0   : > { %3643 = vadd.xlane.f32.xlu1 %v3642_v62  ;;  %v4160_v62 = vrot.slane %v1012_v35, %v7785_v5 }
 0x831   : > { %v3623_v2 = vpop.xlane.xlu0 %3622 }
 0x832   : > { %7083 = vrcp.f32 %v3623_v2 }
 0x835   : > { %v3626_v11 = vpop.xlane.xlu1 %3625 }
 0x836   : > { %7085 = vrcp.f32 %v3626_v11 }
 0x839   : > { %v3629_v12 = vpop.xlane.xlu0 %3628 }
 0x83a   : > { %7087 = vrcp.f32 %v3629_v12  ;;  %v4153_v12 = vcombine.high %v1012_v35, %v1012_v35 }
 0x83c   : > { %v7084_v26 = vpop.eup %7083 }
 0x83d   : > { %v3646_v49 = vmul.f32 %v7084_v26, %v7068_v3  ;;  %v3632_v39 = vpop.xlane.xlu1 %3631  ;;  %v4168_v26 = vcombine.high %v4160_v62, %v4160_v62 }
 0x83e   : > { %7089 = vrcp.f32 %v3632_v39 }
 0x83f   : > { %v3661_v38 = vpack.c.bf16 %v3646_v49, %v3646_v49  ;;  %v4182_v49 = vpack.c.bf16 %v4160_v62, %v4160_v62 }
 0x840   : > { %v7086_v9 = vpop.eup %7085 }
 0x841   : > { %v3648_v36 = vmul.f32 %v7086_v9, %v7070_v41  ;;  %6563 = vmatmul.mubr.msk.bf16.vlgmr.msra.gmra.mrb[92].mxu0 %vm1681_vm4, %v3661_v38  ;;  %v3635_v13 = vpop.xlane.xlu0 %3634  ;;  %v4167_v9 = vrot.slane %v4153_v12, %v7785_v5 }
 0x842   : > { %6573 = vmatpush3.bf16.msra.mxu0 %v7938_v59  ;;  %7091 = vrcp.f32 %v3635_v13  ;;  %6574 = vmatprep.mubr.msk.bf16.mxu0 %vm7400_vm1, %v8567_v17 }
 0x843   : > { %v3662_v32 = vpack.c.bf16 %v3648_v36, %v3648_v36  ;;  %6584 = vmatprep.subr.bf16.mxu0 %v8567_v17  ;;  %v4183_v36 = vpack.c.bf16 %v4168_v26, %v4168_v26 }
 0x844   : > { %v7088_v57 = vpop.eup %7087 }
 0x845   : > { %v3650_v37 = vmul.f32 %v7088_v57, %v7072_v18  ;;  %6569 = vmatmul.mubr.msk.bf16.vlgmr.msra.gmra.mrb[92].mxu1 %vm1681_vm4, %v3662_v32  ;;  %v3638_v25 = vpop.xlane.xlu1 %3637  ;;  %v8570_v18 = vsub.s32 3, %v7763_v34  ;;  %v4136_v34 = vcombine.high %v1008_v23, %v1008_v23  ;;  %v4169_v57 = vcombine.high %v4167_v9, %v4167_v9 }
 0x846   : > { %6579 = vmatpush3.bf16.msra.mxu1 %v7960_v47  ;;  %7093 = vrcp.f32 %v3638_v25  ;;  %6580 = vmatprep.mubr.msk.bf16.mxu1 %vm7400_vm1, %v8567_v17 }
 0x847   : > { %v3663_v20 = vpack.c.bf16 %v3650_v37, %v3650_v37  ;;  %6590 = vmatprep.subr.bf16.mxu1 %v8567_v17  ;;  %v317_v10 = vrot.slane %v8133_v4, %v8570_v18  ;;  %v4178_v4 = vpack.c.bf16 %v4143_v31, %v4143_v31  ;;  %v4150_v50 = vrot.slane %v4136_v34, %v7785_v5 }
 0x848   : > { %v7090_v59 = vpop.eup %7089  ;;  %v4184_v37 = vpack.c.bf16 %v4167_v9, %v4167_v9 }
 0x849   : > { %v3652_v3 = vmul.f32 %v7090_v59, %v7074_v30  ;;  %6575 = vmatmul.mubr.msk.bf16.vlgmr.msra.gmra.mrb[96].mxu0 %vm1681_vm4, %v3663_v20  ;;  %v3641_v54 = vpop.xlane.xlu0 %3640  ;;  %v922_v43 = vadd.f32 %v7767_v55, %v317_v10  ;;  %v4151_v30 = vcombine.high %v4143_v31, %v4143_v31  ;;  %v4152_v1 = vcombine.high %v4150_v50, %v4150_v50 }
 0x84a   : > { %6585 = vmatpush3.bf16.msra.mxu0 %v7935_v63  ;;  %7095 = vrcp.f32 %v3641_v54  ;;  %6586 = vmatprep.mubr.msk.bf16.mxu0 %vm7400_vm1, %v8567_v17  ;;  %v926_v11 = vadd.f32 %v7772_v60, %v317_v10  ;;  %v4185_v59 = vpack.c.bf16 %v4169_v57, %v4169_v57 }
 0x84b   : > { %v3664_v47 = vpack.c.bf16 %v3652_v3, %v3652_v3  ;;  %6596 = vmatprep.subr.bf16.mxu0 %v8567_v17  ;;  %v4091_v19 = vrot.slane %v922_v43, %v7785_v5  ;;  %v4179_v52 = vpack.c.bf16 %v4151_v30, %v4151_v30  ;;  %v4084_v55 = vcombine.high %v922_v43, %v922_v43 }
 0x84c   : > { %v7092_v28 = vpop.eup %7091  ;;  %v4108_v38 = vrot.slane %v926_v11, %v7785_v5  ;;  %v4101_v60 = vcombine.high %v926_v11, %v926_v11 }
 0x84d   : > { %v3654_v51 = vmul.f32 %v7092_v28, %v7076_v45  ;;  %6581 = vmatmul.mubr.msk.bf16.vlgmr.msra.gmra.mrb[96].mxu1 %vm1681_vm4, %v3664_v47  ;;  %v3644_v41 = vpop.xlane.xlu1 %3643  ;;  %v4099_v45 = vcombine.high %v4091_v19, %v4091_v19  ;;  %v4126_v48 = vpack.c.bf16 %v4091_v19, %v4091_v19 }
 0x84e   : > { %6591 = vmatpush3.bf16.msra.mxu1 %v7941_v22  ;;  %7097 = vrcp.f32 %v3644_v41  ;;  %6592 = vmatprep.mubr.msk.bf16.mxu1 %vm7400_vm1, %v8567_v17  ;;  %v4116_v13 = vcombine.high %v4108_v38, %v4108_v38  ;;  %v4130_v32 = vpack.c.bf16 %v4108_v38, %v4108_v38  ;;  %v4115_v25 = vrot.slane %v4101_v60, %v7785_v5 }
 0x84f   : > { %v3665_v63 = vpack.c.bf16 %v3654_v51, %v3654_v51  ;;  %6602 = vmatprep.subr.bf16.mxu1 %v8567_v17  ;;  %v4127_v15 = vpack.c.bf16 %v4099_v45, %v4099_v45 }
 0x850   : > { %v7094_v21 = vpop.eup %7093  ;;  %v4131_v20 = vpack.c.bf16 %v4116_v13, %v4116_v13  ;;  %v4117_v8 = vcombine.high %v4115_v25, %v4115_v25  ;;  %v4132_v3 = vpack.c.bf16 %v4115_v25, %v4115_v25 }
 0x851   : > { %v3656_v6 = vmul.f32 %v7094_v21, %v7078_v56  ;;  %6587 = vmatmul.mubr.msk.bf16.vlgmr.msra.gmra.mrb[100].mxu0 %vm1681_vm4, %v3665_v63  ;;  %v4180_v56 = vpack.c.bf16 %v4150_v50, %v4150_v50 }
 0x852   : > { %6597 = vmatpush3.bf16.msra.mxu0 %v7953_v40  ;;  %6598 = vmatprep.mubr.msk.bf16.mxu0 %vm7400_vm1, %v8567_v17  ;;  %v4133_v54 = vpack.c.bf16 %v4117_v8, %v4117_v8 }
 0x853   : > { %v3666_v46 = vpack.c.bf16 %v3656_v6, %v3656_v6  ;;  %6608 = vmatprep.subr.bf16.mxu0 %v8567_v17 }
 0x854   : > { %v7096_v22 = vpop.eup %7095 }
 0x855   : > { %v3658_v42 = vmul.f32 %v7096_v22, %v8222_v61  ;;  %6593 = vmatmul.mubr.msk.bf16.vlgmr.msra.gmra.mrb[100].mxu1 %vm1681_vm4, %v3666_v46  ;;  %v4098_v61 = vrot.slane %v4084_v55, %v7785_v5 }
 0x856   : > { %6603 = vmatpush3.bf16.msra.mxu1 %v7969_v33  ;;  %6604 = vmatprep.mubr.msk.bf16.mxu1 %vm7400_vm1, %v8567_v17 }
 0x857   : > { %v3667_v40 = vpack.c.bf16 %v3658_v42, %v3658_v42  ;;  %6614 = vmatprep.subr.bf16.mxu1 %v8567_v17  ;;  %v4100_v2 = vcombine.high %v4098_v61, %v4098_v61  ;;  %v4128_v44 = vpack.c.bf16 %v4098_v61, %v4098_v61 }
 0x858   : > { %v7098_v7 = vpop.eup %7097 }
 0x859   : > { %v3660_v0 = vmul.f32 %v7098_v7, %v8226_v27  ;;  %6599 = vmatmul.mubr.msk.bf16.vlgmr.msra.gmra.mrb[104].mxu0 %vm1681_vm4, %v3667_v40  ;;  %v4181_v27 = vpack.c.bf16 %v4152_v1, %v4152_v1  ;;  %v4129_v39 = vpack.c.bf16 %v4100_v2, %v4100_v2 }
 0x85a   : > { %6610 = vmatprep.mubr.msk.bf16.mxu0 %vm7400_vm1, %v8567_v17 }
 0x85b   : > { %6609 = vmatpush3.bf16.xpose.msra.mxu0 %v4178_v4  ;;  %v3668_v33 = vpack.c.bf16 %v3660_v0, %v3660_v0 }
 0x85c   : > { %6620 = vmatprep.subr.bf16.mxu0 %v8567_v17 }
 0x85d   : > { %6605 = vmatmul.mubr.msk.bf16.vlgmr.msra.gmra.mrb[104].mxu1 %vm1681_vm4, %v3668_v33 }
 0x85e   : > { %6616 = vmatprep.mubr.msk.bf16.mxu1 %vm7400_vm1, %v8567_v17 }
 0x85f   : > { %6615 = vmatpush3.bf16.xpose.msra.mxu1 %v4179_v52 }
 0x860   : > { %6626 = vmatprep.subr.bf16.mxu1 %v8567_v17 }
 0x862   : > { %6611 = vmatmul.mubr.bf16.vlgmr.msra.gmra.mrb[108].mxu0 %v4126_v48 }
 0x863   : > { %6621 = vmatpush3.bf16.xpose.msra.mxu0 %v4180_v56  ;;  %6622 = vmatprep.mubr.msk.bf16.mxu0 %vm7400_vm1, %v8567_v17 }
 0x864   : > { %6632 = vmatprep.subr.bf16.mxu0 %v8567_v17 }
 0x866   : > { %6617 = vmatmul.mubr.bf16.vlgmr.msra.gmra.mrb[108].mxu1 %v4127_v15 }
 0x867   : > { %6627 = vmatpush3.bf16.xpose.msra.mxu1 %v4181_v27  ;;  %6628 = vmatprep.mubr.msk.bf16.mxu1 %vm7400_vm1, %v8567_v17 }
 0x868   : > { %6638 = vmatprep.subr.bf16.mxu1 %v8567_v17 }
 0x86a   : > { %6623 = vmatmul.mubr.bf16.vlgmr.msra.gmra.mrb[112].mxu0 %v4128_v44 }
 0x86b   : > { %6633 = vmatpush3.bf16.xpose.msra.mxu0 %v4182_v49  ;;  %6634 = vmatprep.mubr.msk.bf16.mxu0 %vm7400_vm1, %v8567_v17 }
 0x86c   : > { %6644 = vmatprep.subr.bf16.mxu0 %v8567_v17 }
 0x86e   : > { %6629 = vmatmul.mubr.bf16.vlgmr.msra.gmra.mrb[112].mxu1 %v4129_v39 }
 0x86f   : > { %6639 = vmatpush3.bf16.xpose.msra.mxu1 %v4183_v36  ;;  %6640 = vmatprep.mubr.msk.bf16.mxu1 %vm7400_vm1, %v8567_v17 }
 0x870   : > { %6650 = vmatprep.subr.bf16.mxu1 %v8567_v17 }
 0x872   : > { %6635 = vmatmul.mubr.bf16.vlgmr.msra.gmra.mrb[116].mxu0 %v4130_v32 }
 0x873   : > { %6645 = vmatpush3.bf16.xpose.msra.mxu0 %v4184_v37  ;;  %6646 = vmatprep.mubr.msk.bf16.mxu0 %vm7400_vm1, %v8567_v17 }
 0x874   : > { %6656 = vmatprep.subr.bf16.mxu0 %v8567_v17 }
 0x876   : > { %6641 = vmatmul.mubr.bf16.vlgmr.msra.gmra.mrb[116].mxu1 %v4131_v20 }
 0x877   : > { %6651 = vmatpush3.bf16.xpose.msra.mxu1 %v4185_v59  ;;  %6652 = vmatprep.mubr.msk.bf16.mxu1 %vm7400_vm1, %v8567_v17 }
 0x878   : > { %6662 = vmatprep.subr.bf16.mxu1 %v8567_v17 }
 0x87a   : > { %6647 = vmatmul.mubr.bf16.vlgmr.msra.gmra.mrb[120].mxu0 %v4132_v3 }
 0x87b   : > { %6657 = vmatpush3.bf16.msra.mxu0 %v7947_v58  ;;  %6658 = vmatprep.mubr.msk.bf16.mxu0 %vm7400_vm1, %v8567_v17 }
 0x87c   : > { %6668 = vmatprep.subr.bf16.mxu0 %v8567_v17 }
 0x87e   : > { %6653 = vmatmul.mubr.bf16.vlgmr.msra.gmra.mrb[120].mxu1 %v4133_v54 }
 0x87f   : > { %6663 = vmatpush3.bf16.msra.mxu1 %v7950_v16  ;;  %6664 = vmatprep.mubr.msk.bf16.mxu1 %vm7400_vm1, %v8567_v17 }
 0x880   : > { %6674 = vmatprep.subr.bf16.mxu1 %v8567_v17 }
 0x914   : > { %v3709_v47 = vpop.f32.mrb[92].mxu0 }
 0x915   : > { %v6564_v28 = vpop.f32.mrb[93].mxu0 }
 0x916   : > { %v3712_v29 = vpop.f32.mrb[94].mxu0 }
 0x917   : > { %v6565_v51 = vpop.f32.mrb[95].mxu0 }
 0x918   : > { %v3755_v41 = vpop.f32.mrb[92].mxu1 }
 0x919   : > { %v4045_v58 = vcombine.low %v3709_v47, %v3755_v41  ;;  %v6570_v63 = vpop.f32.mrb[93].mxu1 }
 0x91a   : > { %v3758_v21 = vpop.f32.mrb[94].mxu1 }
 0x91b   : > { %v6571_v23 = vpop.f32.mrb[95].mxu1  ;;  %v4053_v40 = vrot.slane %v4045_v58, %v7785_v5 }
 0x91c   : > { %v3801_v6 = vpop.f32.mrb[96].mxu0 }
 0x91d   : > { %v6576_v46 = vpop.f32.mrb[97].mxu0 }
 0x91e   : > { %v3804_v22 = vpop.f32.mrb[98].mxu0 }
 0x91f   : > { %v6577_v18 = vpop.f32.mrb[99].mxu0 }
 0x920   : > { %v3847_v10 = vpop.f32.mrb[96].mxu1 }
 0x921   : > { %v4046_v16 = vcombine.low %v3801_v6, %v3847_v10  ;;  %v6582_v31 = vpop.f32.mrb[97].mxu1 }
 0x922   : > { %v3850_v42 = vpop.f32.mrb[98].mxu1 }
 0x923   : > { %v4060_v7 = vrot.slane %v4046_v16, %v7785_v5  ;;  %v6583_v43 = vpop.f32.mrb[99].mxu1 }
 0x924   : > { %v3893_v34 = vpop.f32.mrb[100].mxu0 }
 0x925   : > { %v4061_v30 = vcombine.low %v4053_v40, %v4060_v7  ;;  %v6588_v4 = vpop.f32.mrb[101].mxu0 }
 0x926   : > { %v3896_v0 = vpop.f32.mrb[102].mxu0 }
 0x927   : > { %v6589_v33 = vpop.f32.mrb[103].mxu0 }
 0x928   : > { %v3939_v19 = vpop.f32.mrb[100].mxu1 }
 0x929   : > { %v4062_v50 = vcombine.low %v3893_v34, %v3939_v19  ;;  %v6594_v52 = vpop.f32.mrb[101].mxu1 }
 0x92a   : > { %v3942_v55 = vpop.f32.mrb[102].mxu1 }
 0x92b   : > { %v6595_v45 = vpop.f32.mrb[103].mxu1  ;;  %v4070_v2 = vrot.slane %v4062_v50, %v7785_v5 }
 0x92c   : > { %v3985_v48 = vpop.f32.mrb[104].mxu0 }
 0x92d   : > { %v6600_v1 = vpop.f32.mrb[105].mxu0 }
 0x92e   : > { %v3988_v56 = vpop.f32.mrb[106].mxu0 }
 0x92f   : > { %v6601_v35 = vpop.f32.mrb[107].mxu0 }
 0x930   : > { %v4031_v61 = vpop.f32.mrb[104].mxu1 }
 0x931   : > { %v4063_v15 = vcombine.low %v3985_v48, %v4031_v61  ;;  %v6606_v27 = vpop.f32.mrb[105].mxu1 }
 0x932   : > { %v4034_v62 = vpop.f32.mrb[106].mxu1 }
 0x933   : > { %v4077_v44 = vrot.slane %v4063_v15, %v7785_v5  ;;  %v6607_v11 = vpop.f32.mrb[107].mxu1 }
 0x935   : > { %v4078_v12 = vcombine.low %v4070_v2, %v4077_v44  ;;  %v4272_v26 = vpop.f32.mrb[108].mxu0 }
 0x936   : > { %v4558_v49 = vmul.f32 0.35355338, %v4272_v26  ;;  %v6612_v39 = vpop.f32.mrb[109].mxu0 }
 0x937   : > { %v8317_v38 = vpack.c.bf16 %v4078_v12, %v4061_v30  ;;  %v4275_v9 = vpop.f32.mrb[110].mxu0 }
 0x938   : > { %v6613_v36 = vpop.f32.mrb[111].mxu0  ;;  %v4566_v60 = vsel %vm1584_vm3, %v4558_v49, -inf }
 0x939   : > { %4567 = vmax.xlane.f32.xlu0 %v4566_v60  ;;  %v4312_v13 = vpop.f32.mrb[108].mxu1 }
 0x93a   : > { %v4559_v32 = vmul.f32 0.35355338, %v4312_v13  ;;  %v6618_v57 = vpop.f32.mrb[109].mxu1 }
 0x93b   : > { %v4315_v37 = vpop.f32.mrb[110].mxu1 }
 0x93c   : > { %v6619_v25 = vpop.f32.mrb[111].mxu1  ;;  %v4569_v20 = vsel %vm1584_vm3, %v4559_v32, -inf }
 0x93d   : > { %v4352_v59 = vpop.f32.mrb[112].mxu0  ;;  %4570 = vmax.xlane.f32.xlu1 %v4569_v20 }
 0x93e   : > { %v4560_v8 = vmul.f32 0.35355338, %v4352_v59  ;;  %v6624_v3 = vpop.f32.mrb[113].mxu0 }
 0x93f   : > { %v4355_v54 = vpop.f32.mrb[114].mxu0 }
 0x940   : > { %v6625_v47 = vpop.f32.mrb[115].mxu0  ;;  %v4572_v28 = vsel %vm1584_vm3, %v4560_v8, -inf }
 0x941   : > { %4573 = vmax.xlane.f32.xlu0 %v4572_v28  ;;  %v4392_v29 = vpop.f32.mrb[112].mxu1 }
 0x942   : > { %v4561_v51 = vmul.f32 0.35355338, %v4392_v29  ;;  %v6630_v41 = vpop.f32.mrb[113].mxu1 }
 0x943   : > { %v4395_v58 = vpop.f32.mrb[114].mxu1 }
 0x944   : > { %v6631_v63 = vpop.f32.mrb[115].mxu1  ;;  %v4575_v21 = vsel %vm1584_vm3, %v4561_v51, -inf }
 0x945   : > { %v4432_v23 = vpop.f32.mrb[116].mxu0  ;;  %4576 = vmax.xlane.f32.xlu1 %v4575_v21 }
 0x946   : > { %v4562_v6 = vmul.f32 0.35355338, %v4432_v23  ;;  %v6636_v46 = vpop.f32.mrb[117].mxu0 }
 0x947   : > { %v4435_v22 = vpop.f32.mrb[118].mxu0 }
 0x948   : > { %v6637_v18 = vpop.f32.mrb[119].mxu0  ;;  %v4578_v10 = vsel %vm1584_vm3, %v4562_v6, -inf }
 0x949   : > { %4579 = vmax.xlane.f32.xlu0 %v4578_v10  ;;  %v4472_v16 = vpop.f32.mrb[116].mxu1 }
 0x94a   : > { %v4563_v31 = vmul.f32 0.35355338, %v4472_v16  ;;  %v6642_v42 = vpop.f32.mrb[117].mxu1 }
 0x94b   : > { %v4475_v40 = vpop.f32.mrb[118].mxu1 }
 0x94c   : > { %v6643_v7 = vpop.f32.mrb[119].mxu1  ;;  %v4581_v43 = vsel %vm1584_vm3, %v4563_v31, -inf }
 0x94d   : > { %v4512_v34 = vpop.f32.mrb[120].mxu0  ;;  %4582 = vmax.xlane.f32.xlu1 %v4581_v43 }
 0x94e   : > { %v4564_v30 = vmul.f32 0.35355338, %v4512_v34  ;;  %v6648_v4 = vpop.f32.mrb[121].mxu0 }
 0x94f   : > { %v4515_v0 = vpop.f32.mrb[122].mxu0 }
 0x950   : > { %v6649_v33 = vpop.f32.mrb[123].mxu0  ;;  %v4584_v19 = vsel %vm1584_vm3, %v4564_v30, -inf }
 0x951   : > { %4585 = vmax.xlane.f32.xlu0 %v4584_v19  ;;  %v4552_v50 = vpop.f32.mrb[120].mxu1 }
 0x952   : > { %v4565_v52 = vmul.f32 0.35355338, %v4552_v50  ;;  %v6654_v55 = vpop.f32.mrb[121].mxu1 }
 0x953   : > { %v4555_v45 = vpop.f32.mrb[122].mxu1  ;;  %v8571_v55 = vld [vmem:[#allocation29_spill] sm:$0xff] }
 0x954   : > { %v6655_v48 = vpop.f32.mrb[123].mxu1  ;;  %v4587_v1 = vsel %vm1584_vm3, %v4565_v52, -inf }
 0x955   : > { %4588 = vmax.xlane.f32.xlu1 %v4587_v1 }
 0x9c6   : > { %v4568_v56 = vpop.xlane.xlu0 %4567 }
 0x9c7   : > { %v4590_v35 = vsub.f32 %v4558_v49, %v4568_v56  ;;  %v8572_v56 = vld [vmem:[#allocation26_spill] sm:$0xff] }
 0x9c9   : > { %v4598_v61 = vmul.f32 1.442695, %v4590_v35 }
 0x9ca   : > { %v4571_v15 = vpop.xlane.xlu1 %4570 }
 0x9cb   : > { %7099 = vpow2.f32 %v4598_v61  ;;  %v4591_v27 = vsub.f32 %v4559_v32, %v4571_v15 }
 0x9cd   : > { %v4600_v62 = vmul.f32 1.442695, %v4591_v27 }
 0x9ce   : > { %v4574_v2 = vpop.xlane.xlu0 %4573 }
 0x9cf   : > { %7101 = vpow2.f32 %v4600_v62  ;;  %v4592_v44 = vsub.f32 %v4560_v8, %v4574_v2  ;;  %v8573_v62 = vld [vmem:[#allocation27_spill] sm:$0xff] }
 0x9d1   : > { %v4602_v11 = vmul.f32 1.442695, %v4592_v44  ;;  %v6955_v44 = vld [vmem:[%s8342_s19 + $0x40] sm:$0xff]  }
 0x9d2   : > { %v4577_v12 = vpop.xlane.xlu1 %4576 }
 0x9d3   : > { %7103 = vpow2.f32 %v4602_v11  ;;  %v4593_v26 = vsub.f32 %v4561_v51, %v4577_v12 }
 0x9d5   : > { %v7100_v39 = vpop.eup %7099  ;;  %v4604_v9 = vmul.f32 1.442695, %v4593_v26  ;;  %v8574_v26 = vld [vmem:[#allocation28_spill] sm:$0xff] }
 0x9d6   : > { %v4580_v36 = vpop.xlane.xlu0 %4579  ;;  %v4614_v60 = vsel %vm1584_vm3, %v7100_v39, 0.0 }
 0x9d7   : > { %7105 = vpow2.f32 %v4604_v9  ;;  %v4594_v13 = vsub.f32 %v4562_v6, %v4580_v36  ;;  %4615 = vadd.xlane.f32.xlu0 %v4614_v60  ;;  %v8575_v60 = vld [vmem:[#allocation30_spill] sm:$0xff] }
 0x9d9   : > { %v7102_v49 = vpop.eup %7101  ;;  %v4606_v57 = vmul.f32 1.442695, %v4594_v13  ;;  %v6956_v13 = vld [vmem:[%s8342_s19] sm:$0xff]  }
 0x9da   : > { %v4583_v37 = vpop.xlane.xlu1 %4582  ;;  %v4617_v32 = vsel %vm1584_vm3, %v7102_v49, 0.0 }
 0x9db   : > { %7107 = vpow2.f32 %v4606_v57  ;;  %v4595_v25 = vsub.f32 %v4563_v31, %v4583_v37  ;;  %4618 = vadd.xlane.f32.xlu1 %v4617_v32  ;;  %v6957_v57 = vld [vmem:[%s8342_s19 + $0x48] sm:$0xff]  }
 0x9dd   : > { %v7104_v20 = vpop.eup %7103  ;;  %v4608_v59 = vmul.f32 1.442695, %v4595_v25  ;;  %v6958_v25 = vld [vmem:[%s8342_s19 + $0x8] sm:$0xff]  }
 0x9de   : > { %v4586_v8 = vpop.xlane.xlu0 %4585  ;;  %v4620_v3 = vsel %vm1584_vm3, %v7104_v20, 0.0 }
 0x9df   : > { %7109 = vpow2.f32 %v4608_v59  ;;  %v4596_v54 = vsub.f32 %v4564_v30, %v4586_v8  ;;  %4621 = vadd.xlane.f32.xlu0 %v4620_v3  ;;  %v6959_v59 = vld [vmem:[%s8342_s19 + $0x50] sm:$0xff]   ;;  %v6961_v3 = vld [vmem:[%s8342_s19 + $0x58] sm:$0xff]  }
 0x9e0   : > { %v6960_v8 = vld [vmem:[%s8342_s19 + $0x10] sm:$0xff]  }
 0x9e1   : > { %v7106_v47 = vpop.eup %7105  ;;  %v4610_v28 = vmul.f32 1.442695, %v4596_v54  ;;  %v6962_v54 = vld [vmem:[%s8342_s19 + $0x18] sm:$0xff]  }
 0x9e2   : > { %v4589_v29 = vpop.xlane.xlu1 %4588  ;;  %v4623_v51 = vsel %vm1584_vm3, %v7106_v47, 0.0 }
 0x9e3   : > { %7111 = vpow2.f32 %v4610_v28  ;;  %v4597_v41 = vsub.f32 %v4565_v52, %v4589_v29  ;;  %4624 = vadd.xlane.f32.xlu1 %v4623_v51  ;;  %v6965_v28 = vld [vmem:[%s8342_s19 + $0x68] sm:$0xff]   ;;  %v6967_v51 = vld [vmem:[%s8342_s19 + $0x70] sm:$0xff]  }
 0x9e4   : > { %v6966_v29 = vld [vmem:[%s8342_s19 + $0x28] sm:$0xff]  }
 0x9e5   : > { %v7108_v58 = vpop.eup %7107  ;;  %v4612_v63 = vmul.f32 1.442695, %v4597_v41  ;;  %v6968_v41 = vld [vmem:[%s8342_s19 + $0x30] sm:$0xff]  }
 0x9e6   : > { %v4626_v21 = vsel %vm1584_vm3, %v7108_v58, 0.0 }
 0x9e7   : > { %7113 = vpow2.f32 %v4612_v63  ;;  %4627 = vadd.xlane.f32.xlu0 %v4626_v21  ;;  %v6970_v63 = vld [vmem:[%s8342_s19 + $0x38] sm:$0xff]   ;;  %v6971_v21 = vld [vmem:[%s8342_s19 + $0xc0] sm:$0xff]  }
 0x9e9   : > { %v7110_v23 = vpop.eup %7109 }
 0x9ea   : > { %v4629_v6 = vsel %vm1584_vm3, %v7110_v23, 0.0 }
 0x9eb   : > { %4630 = vadd.xlane.f32.xlu1 %v4629_v6  ;;  %v6973_v6 = vld [vmem:[%s8342_s19 + $0xc8] sm:$0xff]  }
 0x9ed   : > { %v8333_v46 = vpop.eup %7111 }
 0x9ee   : > { %v4632_v22 = vsel %vm1584_vm3, %v8333_v46, 0.0 }
 0x9ef   : > { %4633 = vadd.xlane.f32.xlu0 %v4632_v22  ;;  %v6975_v22 = vld [vmem:[%s8342_s19 + $0xd0] sm:$0xff]  }
 0x9f1   : > { %v8337_v18 = vpop.eup %7113 }
 0x9f2   : > { %v4635_v10 = vsel %vm1584_vm3, %v8337_v18, 0.0 }
 0x9f3   : > { %4636 = vadd.xlane.f32.xlu1 %v4635_v10  ;;  %v6978_v10 = vld [vmem:[%s8342_s19 + $0x98] sm:$0xff]  }
 0xa64   : > { %v4616_v16 = vpop.xlane.xlu0 %4615 }
 0xa65   : > { %7115 = vrcp.f32 %v4616_v16  ;;  %v6979_v16 = vld [vmem:[%s8342_s19 + $0xe0] sm:$0xff]  }
 0xa68   : > { %v4619_v31 = vpop.xlane.xlu1 %4618 }
 0xa69   : > { %7117 = vrcp.f32 %v4619_v31  ;;  %v6980_v31 = vld [vmem:[%s8342_s19 + $0xa0] sm:$0xff]  }
 0xa6c   : > { %v4622_v42 = vpop.xlane.xlu0 %4621 }
 0xa6d   : > { %7119 = vrcp.f32 %v4622_v42  ;;  %v6981_v42 = vld [vmem:[%s8342_s19 + $0xe8] sm:$0xff]  }
 0xa6f   : > { %v7116_v40 = vpop.eup %7115 }
 0xa70   : > { %v4639_v7 = vmul.f32 %v7116_v40, %v7100_v39  ;;  %v4625_v43 = vpop.xlane.xlu1 %4624  ;;  %v6982_v40 = vld [vmem:[%s8342_s19 + $0xa8] sm:$0xff]  }
 0xa71   : > { %7121 = vrcp.f32 %v4625_v43  ;;  %v6984_v43 = vld [vmem:[%s8342_s19 + $0xb0] sm:$0xff]  }
 0xa72   : > { %v4654_v34 = vpack.c.bf16 %v4639_v7, %v4639_v7  ;;  %v6983_v7 = vld [vmem:[%s8342_s19 + $0xf0] sm:$0xff]  }
 0xa73   : > { %v7118_v30 = vpop.eup %7117 }
 0xa74   : > { %v4641_v4 = vmul.f32 %v7118_v30, %v7102_v49  ;;  %6659 = vmatmul.mubr.msk.bf16.vlgmr.msra.gmra.mrb[124].mxu0 %vm1681_vm4, %v4654_v34  ;;  %v4628_v0 = vpop.xlane.xlu0 %4627  ;;  %v6985_v34 = vld [vmem:[%s8342_s19 + $0xf8] sm:$0xff]  }
 0xa75   : > { %6669 = vmatpush3.bf16.msra.mxu0 %v7972_v14  ;;  %7123 = vrcp.f32 %v4628_v0  ;;  %6670 = vmatprep.mubr.msk.bf16.mxu0 %vm7400_vm1, %v8567_v17  ;;  %v6986_v30 = vld [vmem:[%s8342_s19 + $0xb8] sm:$0xff]  }
 0xa76   : > { %v4655_v33 = vpack.c.bf16 %v4641_v4, %v4641_v4  ;;  %6680 = vmatprep.subr.bf16.mxu0 %v8567_v17 }
 0xa77   : > { %v7120_v19 = vpop.eup %7119 }
 0xa78   : > { %v4643_v50 = vmul.f32 %v7120_v19, %v7104_v20  ;;  %6665 = vmatmul.mubr.msk.bf16.vlgmr.msra.gmra.mrb[124].mxu1 %vm1681_vm4, %v4655_v33  ;;  %v4631_v52 = vpop.xlane.xlu1 %4630 }
 0xa79   : > { %6675 = vmatpush3.bf16.msra.mxu1 %v8571_v55  ;;  %7125 = vrcp.f32 %v4631_v52  ;;  %6676 = vmatprep.mubr.msk.bf16.mxu1 %vm7400_vm1, %v8567_v17 }
 0xa7a   : > { %v4656_v45 = vpack.c.bf16 %v4643_v50, %v4643_v50  ;;  %6686 = vmatprep.subr.bf16.mxu1 %v8567_v17 }
 0xa7b   : > { %v7122_v14 = vpop.eup %7121 }
 0xa7c   : > { %v4645_v48 = vmul.f32 %v7122_v14, %v7106_v47  ;;  %6671 = vmatmul.mubr.msk.bf16.vlgmr.msra.gmra.mrb[128].mxu0 %vm1681_vm4, %v4656_v45  ;;  %v4634_v1 = vpop.xlane.xlu0 %4633  ;;  %v6964_v47 = vld [vmem:[%s8342_s19 + $0x20] sm:$0xff]  }
 0xa7d   : > { %6681 = vmatpush3.bf16.msra.mxu0 %v8572_v56  ;;  %7127 = vrcp.f32 %v4634_v1  ;;  %6682 = vmatprep.mubr.msk.bf16.mxu0 %vm7400_vm1, %v8567_v17 }
 0xa7e   : > { %v4657_v35 = vpack.c.bf16 %v4645_v48, %v4645_v48  ;;  %6692 = vmatprep.subr.bf16.mxu0 %v8567_v17 }
 0xa7f   : > { %v7124_v61 = vpop.eup %7123 }
 0xa80   : > { %v4647_v15 = vmul.f32 %v7124_v61, %v7108_v58  ;;  %6677 = vmatmul.mubr.msk.bf16.vlgmr.msra.gmra.mrb[128].mxu1 %vm1681_vm4, %v4657_v35  ;;  %v4637_v27 = vpop.xlane.xlu1 %4636  ;;  %v6969_v58 = vld [vmem:[%s8342_s19 + $0x78] sm:$0xff]  }
 0xa81   : > { %6687 = vmatpush3.bf16.msra.mxu1 %v8573_v62  ;;  %7129 = vrcp.f32 %v4637_v27  ;;  %6688 = vmatprep.mubr.msk.bf16.mxu1 %vm7400_vm1, %v8567_v17 }
 0xa82   : > { %v4658_v2 = vpack.c.bf16 %v4647_v15, %v4647_v15  ;;  %6698 = vmatprep.subr.bf16.mxu1 %v8567_v17 }
 0xa83   : > { %v7126_v11 = vpop.eup %7125 }
 0xa84   : > { %v4649_v12 = vmul.f32 %v7126_v11, %v7110_v23  ;;  %6683 = vmatmul.mubr.msk.bf16.vlgmr.msra.gmra.mrb[132].mxu0 %vm1681_vm4, %v4658_v2  ;;  %v6972_v23 = vld [vmem:[%s8342_s19 + $0x80] sm:$0xff]  }
 0xa85   : > { %6693 = vmatpush3.bf16.msra.mxu0 %v8574_v26  ;;  %6694 = vmatprep.mubr.msk.bf16.mxu0 %vm7400_vm1, %v8567_v17 }
 0xa86   : > { %v4659_v39 = vpack.c.bf16 %v4649_v12, %v4649_v12  ;;  %6249 = vmatprep.subr.bf16.mxu0 %v6955_v44 }
 0xa87   : > { %v7128_v9 = vpop.eup %7127 }
 0xa88   : > { %v4651_v36 = vmul.f32 %v7128_v9, %v8333_v46  ;;  %6689 = vmatmul.mubr.msk.bf16.vlgmr.msra.gmra.mrb[132].mxu1 %vm1681_vm4, %v4659_v39  ;;  %v6974_v46 = vld [vmem:[%s8342_s19 + $0x88] sm:$0xff]  }
 0xa89   : > { %6699 = vmatpush3.bf16.msra.mxu1 %v8575_v60  ;;  %6700 = vmatprep.mubr.msk.bf16.mxu1 %vm7400_vm1, %v8567_v17 }
 0xa8a   : > { %v4660_v49 = vpack.c.bf16 %v4651_v36, %v4651_v36  ;;  %6271 = vmatprep.subr.bf16.mxu1 %v6971_v21 }
 0xa8b   : > { %v7130_v37 = vpop.eup %7129 }
 0xa8c   : > { %v4653_v32 = vmul.f32 %v7130_v37, %v8337_v18  ;;  %6695 = vmatmul.mubr.msk.bf16.vlgmr.msra.gmra.mrb[136].mxu0 %vm1681_vm4, %v4660_v49  ;;  %v6976_v18 = vld [vmem:[%s8342_s19 + $0x90] sm:$0xff]  }
 0xa8d   : > { %6250 = vmatpush3.bf16.msra.mxu0 %v6956_v13  ;;  %5374 = vmatprep.mubr.bf16.mxu0 %v8206_v53  ;;  %v6963_v53 = vld [vmem:[%s8342_s19 + $0x60] sm:$0xff]  }
 0xa8e   : > { %6251 = vmatprep.subr.bf16.mxu0 %v6957_v57  ;;  %v4661_v20 = vpack.c.bf16 %v4653_v32, %v4653_v32 }
 0xa90   : > { %6701 = vmatmul.mubr.msk.bf16.vlgmr.msra.gmra.mrb[136].mxu1 %vm1681_vm4, %v4661_v20 }
 0xa91   : > { %6252 = vmatpush3.bf16.msra.mxu0 %v6958_v25  ;;  %6272 = vmatpush3.bf16.msra.mxu1 %v6972_v23 }
 0xa92   : > { %6253 = vmatprep.subr.bf16.mxu0 %v6959_v59  ;;  %6273 = vmatprep.subr.bf16.mxu1 %v6973_v6 }
 0xa95   : > { %6254 = vmatpush3.bf16.msra.mxu0 %v6960_v8  ;;  %6274 = vmatpush3.bf16.msra.mxu1 %v6974_v46 }
 0xa96   : > { %6255 = vmatprep.subr.bf16.mxu0 %v6961_v3  ;;  %6275 = vmatprep.subr.bf16.mxu1 %v6975_v22 }
 0xa99   : > { %6256 = vmatpush3.bf16.msra.mxu0 %v6962_v54  ;;  %6276 = vmatpush3.bf16.msra.mxu1 %v6976_v18 }
 0xa9a   : > { %6257 = vmatprep.subr.bf16.mxu0 %v6963_v53 }
 0xa9d   : > { %6258 = vmatpush3.bf16.msra.mxu0 %v6964_v47 }
 0xa9e   : > { %6259 = vmatprep.subr.bf16.mxu0 %v6965_v28 }
 0xaa1   : > { %6260 = vmatpush3.bf16.msra.mxu0 %v6966_v29 }
 0xaa2   : > { %6261 = vmatprep.subr.bf16.mxu0 %v6967_v51 }
 0xaa5   : > { %6262 = vmatpush3.bf16.msra.mxu0 %v6968_v41 }
 0xaa6   : > { %6263 = vmatprep.subr.bf16.mxu0 %v6969_v58 }
 0xaa9   : > { %6264 = vmatpush3.bf16.msra.mxu0 %v6970_v63 }
 0xaaa   : > { %6704 = vmatprep.subr.bf16.mxu0 %v8567_v17 }
 0xaac   : > { %5375 = vmatmul.mubr.bf16.vlgmr.msra.gmra.mrb[140].mxu0 %v8092_v24  ;;  %v6977_v24 = vld [vmem:[%s8342_s19 + $0xd8] sm:$0xff]   ;;  %s5709_s19 = scalar_lea.vmem %s8536_s13, %s7380_s26 }
 0xaad   : > { %6720 = vmatprep.mubr.msk.bf16.mxu0 %vm7400_vm1, %v8567_v17  ;;  %6277 = vmatprep.subr.bf16.mxu1 %v6977_v24 }
 0xaae   : > { %6278 = vmatpush3.bf16.msra.mxu1 %v6978_v10 }
 0xaaf   : > { %6279 = vmatprep.subr.bf16.mxu1 %v6979_v16 }
 0xab2   : > { %6280 = vmatpush3.bf16.msra.mxu1 %v6980_v31 }
 0xab3   : > { %6281 = vmatprep.subr.bf16.mxu1 %v6981_v42 }
 0xab6   : > { %6282 = vmatpush3.bf16.msra.mxu1 %v6982_v40 }
 0xab7   : > { %6283 = vmatprep.subr.bf16.mxu1 %v6983_v7 }
 0xaba   : > { %6284 = vmatpush3.bf16.msra.mxu1 %v6984_v43  ;;  %v8576_v43 = vld [vmem:[#allocation25_spill] sm:$0xff] }
 0xabb   : > { %6285 = vmatprep.subr.bf16.mxu1 %v6985_v34 }
 0xabe   : > { %6286 = vmatpush3.bf16.msra.mxu1 %v6986_v30  ;;  %v8577_v30 = vld [vmem:[#allocation24_spill] sm:$0xff] }
 0xabf   : > { %6724 = vmatprep.subr.bf16.mxu1 %v8567_v17 }
 0xb47   : > { %v4702_v4 = vpop.f32.mrb[124].mxu0 }
 0xb48   : > { %v6660_v0 = vpop.f32.mrb[125].mxu0 }
 0xb49   : > { %v4705_v33 = vpop.f32.mrb[126].mxu0  ;;  %v6987_v0 = vld [vmem:[%s8430_s3] sm:$0xff]  }
 0xb4a   : > { %v6661_v19 = vpop.f32.mrb[127].mxu0  ;;  %v6988_v33 = vld [vmem:[%s8430_s3 + $0x8] sm:$0xff]   ;;  %6705 = vmatpush3.bf16.msra.mxu0 %v6987_v0 }
 0xb4b   : > { %v4748_v50 = vpop.f32.mrb[124].mxu1  ;;  %6706 = vmatprep.subr.bf16.mxu0 %v8567_v17 }
 0xb4c   : > { %v5038_v52 = vcombine.low %v4702_v4, %v4748_v50  ;;  %v6666_v55 = vpop.f32.mrb[125].mxu1 }
 0xb4d   : > { %v4751_v45 = vpop.f32.mrb[126].mxu1 }
 0xb4e   : > { %v6667_v14 = vpop.f32.mrb[127].mxu1  ;;  %v5046_v2 = vrot.slane %v5038_v52, %v7785_v5  ;;  %6707 = vmatpush3.bf16.msra.mxu0 %v6988_v33 }
 0xb4f   : > { %v4794_v48 = vpop.f32.mrb[128].mxu0  ;;  %6708 = vmatprep.subr.bf16.mxu0 %v8567_v17 }
 0xb50   : > { %v6672_v1 = vpop.f32.mrb[129].mxu0 }
 0xb51   : > { %v4797_v56 = vpop.f32.mrb[130].mxu0 }
 0xb52   : > { %v6673_v35 = vpop.f32.mrb[131].mxu0 }
 0xb53   : > { %v4840_v61 = vpop.f32.mrb[128].mxu1 }
 0xb54   : > { %v5039_v15 = vcombine.low %v4794_v48, %v4840_v61  ;;  %v6678_v27 = vpop.f32.mrb[129].mxu1 }
 0xb55   : > { %v4843_v62 = vpop.f32.mrb[130].mxu1  ;;  %v6990_v27 = vld [vmem:[%s8430_s3 + $0x18] sm:$0xff]  }
 0xb56   : > { %v5053_v44 = vrot.slane %v5039_v15, %v7785_v5  ;;  %v6679_v11 = vpop.f32.mrb[131].mxu1  ;;  %v6989_v15 = vld [vmem:[%s8430_s3 + $0x10] sm:$0xff]   ;;  %v6991_v62 = vld [vmem:[%s8430_s3 + $0x20] sm:$0xff]  }
 0xb57   : > { %v4886_v12 = vpop.f32.mrb[132].mxu0  ;;  %6709 = vmatpush3.bf16.msra.mxu0 %v6989_v15  ;;  %v6994_v11 = vld [vmem:[%s8430_s3 + $0x38] sm:$0xff]  }
 0xb58   : > { %v5054_v26 = vcombine.low %v5046_v2, %v5053_v44  ;;  %v6684_v39 = vpop.f32.mrb[133].mxu0  ;;  %6710 = vmatprep.subr.bf16.mxu0 %v8567_v17  ;;  %v6992_v2 = vld [vmem:[%s8430_s3 + $0x28] sm:$0xff]   ;;  %v6993_v44 = vld [vmem:[%s8430_s3 + $0x30] sm:$0xff]  }
 0xb59   : > { %v4889_v9 = vpop.f32.mrb[134].mxu0  ;;  %v6997_v39 = vld [vmem:[%s8453_s25 + $0x10] sm:$0xff]  }
 0xb5a   : > { %v6685_v36 = vpop.f32.mrb[135].mxu0  ;;  %v6998_v9 = vld [vmem:[%s8453_s25 + $0x18] sm:$0xff]  }
 0xb5b   : > { %v4932_v60 = vpop.f32.mrb[132].mxu1  ;;  %6711 = vmatpush3.bf16.msra.mxu0 %v6990_v27  ;;  %v6999_v36 = vld [vmem:[%s8453_s25 + $0x20] sm:$0xff]  }
 0xb5c   : > { %v5055_v13 = vcombine.low %v4886_v12, %v4932_v60  ;;  %v6690_v49 = vpop.f32.mrb[133].mxu1  ;;  %6712 = vmatprep.subr.bf16.mxu0 %v8567_v17  ;;  %v6995_v12 = vld [vmem:[%s8453_s25] sm:$0xff]   ;;  %v7000_v60 = vld [vmem:[%s8453_s25 + $0x28] sm:$0xff]  }
 0xb5d   : > { %v4935_v57 = vpop.f32.mrb[134].mxu1 }
 0xb5e   : > { %v6691_v37 = vpop.f32.mrb[135].mxu1  ;;  %v5063_v47 = vrot.slane %v5055_v13, %v7785_v5 }
 0xb5f   : > { %v4978_v32 = vpop.f32.mrb[136].mxu0  ;;  %6713 = vmatpush3.bf16.msra.mxu0 %v6991_v62 }
 0xb60   : > { %v6696_v25 = vpop.f32.mrb[137].mxu0  ;;  %6714 = vmatprep.subr.bf16.mxu0 %v8567_v17 }
 0xb61   : > { %v4981_v20 = vpop.f32.mrb[138].mxu0 }
 0xb62   : > { %v6697_v59 = vpop.f32.mrb[139].mxu0 }
 0xb63   : > { %v5024_v8 = vpop.f32.mrb[136].mxu1  ;;  %6715 = vmatpush3.bf16.msra.mxu0 %v6992_v2  ;;  %v6083_v59 = vld [vmem:[%s5426_s18] ss:$0 sm:$0xff] }
 0xb64   : > { %v5056_v3 = vcombine.low %v4978_v32, %v5024_v8  ;;  %v6702_v54 = vpop.f32.mrb[137].mxu1  ;;  %6716 = vmatprep.subr.bf16.mxu0 %v8567_v17 }
 0xb65   : > { %v5027_v53 = vpop.f32.mrb[138].mxu1 }
 0xb66   : > { %v5070_v28 = vrot.slane %v5056_v3, %v7785_v5  ;;  %v6703_v29 = vpop.f32.mrb[139].mxu1  ;;  %v6050_v5 = vld [vmem:[%s5142_s0] ss:$0 sm:$0xff]  ;;  %s5711_s0 = scalar_lea.vmem %s8537_s14, %s7380_s26  ;;  %s193_s26 = sadd.s32 1, %s7380_s26  }
 0xb67   : > { %6717 = vmatpush3.bf16.msra.mxu0 %v6993_v44  ;;  %v6106_v44 = vld [vmem:[%s5709_s19] ss:$0 sm:$0xff]  ;;  %p190_p8 = scmp.ge.s32.totalorder %s193_s26, 2  }
 0xb68   : > { %v5071_v51 = vcombine.low %v5063_v47, %v5070_v28  ;;  %6718 = vmatprep.subr.bf16.mxu0 %v8567_v17  ;;  %v6084_v47 = vld [vmem:[%s5428_s21] ss:$0 sm:$0xff]  ;;  %vm7403_vm5 = vmmov (%p190_p8), 0   ;;  %v7146_v48 = vld [vmem:[#allocation14 + $0x30] sm:$0xff] (%p190_p8)   ;;  %s7404_s8 = smov (%p190_p8), [#allocation16]  }
 0xb69   :  { %s5873_s10 = sshll.u32 (%p190_p8), %s7404_s8, 4  ;;  %s5874_s10 = int_to_ptr.vmem [resolvable:$true] %s5873_s10 }
 0xb6a   : > { %v5074_v41 = vpack.c.bf16 %v5071_v51, %v5054_v26  ;;  %v6996_v26 = vld [vmem:[%s8453_s25 + $0x8] sm:$0xff]   ;;  %s7324_s12 = scalar_lea.vmem (%p190_p8), %s5874_s10, 256  ;;  %p7329_p10 = scmp.lt.s32.totalorder (%p190_p8), %s5874_s10, %s5874_s10 }
 0xb6b   : > { %6719 = vmatpush3.bf16.msra.mxu0 %v6994_v11  ;;  %p7325_p9 = scmp.ne.s32.totalorder (%p190_p8), %s5874_s10, %s7324_s12  ;;  %p7330_p11 = scmp.lt.s32.totalorder (%p190_p8), %s7324_s12, %s7324_s12 }
 0xb6c   : > { %5415 = vmatprep.mubr.bf16.mxu1 %v5074_v41 }
 0xb6d   : > { %5416 = vmatmul.mubr.bf16.vlgmr.msra.gmra.mrb[140].mxu1 %v8317_v38  ;;  %p7331_p12 = por (%p190_p8), %p7330_p11, %p7329_p10 }
 0xb6e   : > { %6740 = vmatprep.mubr.msk.bf16.mxu1 %vm7400_vm1, %v8567_v17  ;;  %6725 = vmatpush3.bf16.msra.mxu1 %v6995_v12 }
 0xb6f   : > { %6726 = vmatprep.subr.bf16.mxu1 %v8567_v17  ;;  %p7332_p13 = pnand (%p190_p8), %p7331_p12, %p7325_p9 }
 0xb72   : > { %6727 = vmatpush3.bf16.msra.mxu1 %v6996_v26  ;;  %v6107_v26 = vld [vmem:[%s5711_s0] ss:$0 sm:$0xff] }
 0xb73   : > { %6728 = vmatprep.subr.bf16.mxu1 %v8567_v17 }
 0xb76   : > { %6729 = vmatpush3.bf16.msra.mxu1 %v6997_v39 }
 0xb77   : > { %6730 = vmatprep.subr.bf16.mxu1 %v8567_v17 }
 0xb7a   : > { %6731 = vmatpush3.bf16.msra.mxu1 %v6998_v9 }
 0xb7b   : > { %6732 = vmatprep.subr.bf16.mxu1 %v8567_v17 }
 0xb7e   : > { %6733 = vmatpush3.bf16.msra.mxu1 %v6999_v36 }
 0xb7f   : > { %v6265_v58 = vpop.f32.mrb[140].mxu0  ;;  %6734 = vmatprep.subr.bf16.mxu1 %v8567_v17 }
 0xb80   : > { %v6266_v63 = vpop.f32.mrb[141].mxu0 }
 0xb81   : > { %v6267_v21 = vadd.f32 %v6266_v63, %v6265_v58  ;;  %v6268_v23 = vpop.f32.mrb[142].mxu0  ;;  %v7001_v58 = vld [vmem:[%s8453_s25 + $0x30] sm:$0xff]   ;;  %v7002_v63 = vld [vmem:[%s8453_s25 + $0x38] sm:$0xff]  }
 0xb82   : > { %v6269_v6 = vpop.f32.mrb[143].mxu0  ;;  %6735 = vmatpush3.bf16.msra.mxu1 %v7000_v60 }
 0xb83   : > { %v6270_v46 = vadd.f32 %v6269_v6, %v6268_v23  ;;  %v5377_v24 = vadd.f32 %v6267_v21, %v6050_v5  ;;  %6736 = vmatprep.subr.bf16.mxu1 %v8567_v17  ;;  %v6087_v21 = vld [vmem:[%s5492_s2] ss:$0 sm:$0xff] }
 0xb85   : > { %v5380_v31 = vadd.f32 %v6270_v46, %v6050_v5 }
 0xb86   : > { %6737 = vmatpush3.bf16.msra.mxu1 %v7001_v58 }
 0xb87   : > { %6738 = vmatprep.subr.bf16.mxu1 %v8567_v17  ;;  %v6097_v17 = vld [vmem:[%s5610_s20] ss:$0 sm:$0xff] }
 0xb8a   : > { %6739 = vmatpush3.bf16.msra.mxu1 %v7002_v63 }
 0xc40   : > { %v6287_v22 = vpop.f32.mrb[140].mxu1 }
 0xc41   : > { %v6288_v18 = vpop.f32.mrb[141].mxu1 }
 0xc42   : > { %v6289_v38 = vadd.f32 %v6288_v18, %v6287_v22  ;;  %v6290_v10 = vpop.f32.mrb[142].mxu1 }
 0xc43   : > { %v6291_v16 = vpop.f32.mrb[143].mxu1 }
 0xc44   : > { %v5418_v42 = vadd.f32 %v6289_v38, %v5377_v24  ;;  %v6292_v40 = vadd.f32 %v6291_v16, %v6290_v10 }
 0xc46   : > { %v5421_v7 = vadd.f32 %v6292_v40, %v5380_v31  ;;  %v5424_v34 = vadd.f32 %v8576_v43, %v5418_v42 }
 0xc48   : > { %5430 = vadd.xlane.f32.xlu0 %v5424_v34  ;;  %v5425_v4 = vadd.f32 %v8577_v30, %v5421_v7 }
 0xc4a   : > { %5432 = vadd.xlane.f32.xlu1 %v5425_v4 }
 0xcd5   : > { %v5431_v19 = vpop.xlane.xlu0 %5430 }
 0xcd6   : > { %v5434_v50 = vmul.f32 0.03125, %v5431_v19 }
 0xcd7   : > { %v5433_v52 = vpop.xlane.xlu1 %5432 }
 0xcd8   : > { %v5436_v55 = vsub.f32 %v5424_v34, %v5434_v50  ;;  %v5435_v45 = vmul.f32 0.03125, %v5433_v52 }
 0xcda   : > { %v5437_v14 = vsub.f32 %v5425_v4, %v5435_v45  ;;  %v5440_v1 = vsel %vm167_vm0, %v5436_v55, 0.0 }
 0xcdb   : > { %v5442_v56 = vmul.f32 %v5440_v1, %v5440_v1 }
 0xcdc   : > { %v5441_v35 = vsel %vm167_vm0, %v5437_v14, 0.0 }
 0xcdd   : > { %5444 = vadd.xlane.f32.xlu0 %v5442_v56  ;;  %v5443_v61 = vmul.f32 %v5441_v35, %v5441_v35 }
 0xcdf   : > { %5446 = vadd.xlane.f32.xlu1 %v5443_v61 }
 0xd6a   : > { %v5445_v13 = vpop.xlane.xlu0 %5444 }
 0xd6b   : > { %v5448_v49 = vmul.f32 0.03125, %v5445_v13 }
 0xd6c   : > { %v5447_v57 = vpop.xlane.xlu1 %5446 }
 0xd6d   : > { %v5450_v37 = vadd.f32 1e-05, %v5448_v49  ;;  %v5449_v32 = vmul.f32 0.03125, %v5447_v57  ;;  %v7140_v49 = vld [vmem:[#allocation14] sm:$0xff] (%p190_p8)   ;;  %v7402_v57 = vmov (%p190_p8), 0.0  }
 0xd6e   :  { %6744 = vmatprep.subr.bf16.mxu0 (%p190_p8), %v7402_v57 }
 0xd6f   : > { %7131 = vrsqrt.f32 %v5450_v37  ;;  %v5451_v25 = vadd.f32 1e-05, %v5449_v32  ;;  %v7141_v37 = vld [vmem:[#allocation14 + $0x8] sm:$0xff] (%p190_p8)   ;;  %v7142_v32 = vld [vmem:[#allocation14 + $0x10] sm:$0xff] (%p190_p8)  }
 0xd71   : > { %7133 = vrsqrt.f32 %v5451_v25  ;;  %v7143_v25 = vld [vmem:[#allocation14 + $0x18] sm:$0xff] (%p190_p8)  }
 0xd79   : > { %v7132_v20 = vpop.eup %7131 }
 0xd7a   : > { %v5454_v8 = vmul.f32 %v7132_v20, %v5440_v1  ;;  %v7144_v20 = vld [vmem:[#allocation14 + $0x20] sm:$0xff] (%p190_p8)  }
 0xd7b   : > { %v7134_v3 = vpop.eup %7133 }
 0xd7c   : > { %v5455_v54 = vmul.f32 %v7134_v3, %v5441_v35  ;;  %v5462_v53 = vmul.f32 %v6083_v59, %v5454_v8 }
 0xd7e   : > { %v5463_v28 = vmul.f32 %v6083_v59, %v5455_v54  ;;  %v5470_v29 = vadd.f32 %v6084_v47, %v5462_v53  ;;  %v7145_v59 = vld [vmem:[#allocation14 + $0x28] sm:$0xff] (%p190_p8)   ;;  %v6108_v54 = vld [vmem:[%s8539_s16] ss:$0 sm:$0xff] (%p190_p8) }
 0xd80   : > { %v5471_v51 = vadd.f32 %v6084_v47, %v5463_v28 }
 0xd82   : > { %v5472_v41 = vpack.c.bf16 %v5471_v51, %v5470_v29 }
 0xd84   : > { %6721 = vmatmul.mubr.bf16.vlgmr.msra.gmra.mrb[144].mxu0 %v5472_v41 }
 0xd85   :  { %6745 = vmatpush3.bf16.msra.mxu0 (%p190_p8), %v7140_v49  ;;  %6760 = vmatprep.mubr.msk.bf16.mxu0 (%p190_p8), %vm7403_vm5, %v7402_v57 }
 0xd86   :  { %6746 = vmatprep.subr.bf16.mxu0 (%p190_p8), %v7402_v57 }
 0xd89   :  { %6747 = vmatpush3.bf16.msra.mxu0 (%p190_p8), %v7141_v37 }
 0xd8a   :  { %6748 = vmatprep.subr.bf16.mxu0 (%p190_p8), %v7402_v57 }
 0xd8d   :  { %6749 = vmatpush3.bf16.msra.mxu0 (%p190_p8), %v7142_v32 }
 0xd8e   :  { %6750 = vmatprep.subr.bf16.mxu0 (%p190_p8), %v7402_v57 }
 0xd91   :  { %6751 = vmatpush3.bf16.msra.mxu0 (%p190_p8), %v7143_v25 }
 0xd92   :  { %6752 = vmatprep.subr.bf16.mxu0 (%p190_p8), %v7402_v57 }
 0xd95   :  { %6753 = vmatpush3.bf16.msra.mxu0 (%p190_p8), %v7144_v20 }
 0xd96   :  { %6754 = vmatprep.subr.bf16.mxu0 (%p190_p8), %v7402_v57 }
 0xd99   :  { %6755 = vmatpush3.bf16.msra.mxu0 (%p190_p8), %v7145_v59 }
 0xd9a   :  { %6756 = vmatprep.subr.bf16.mxu0 (%p190_p8), %v7402_v57 }
 0xd9d   :  { %6757 = vmatpush3.bf16.msra.mxu0 (%p190_p8), %v7146_v48 }
 0xd9e   :  { %6758 = vmatprep.subr.bf16.mxu0 (%p190_p8), %v7402_v57 }
 0xe57   : > { %v5582_v23 = vpop.f32.mrb[144].mxu0 }
 0xe58   : > { %v5583_v6 = vadd.f32 %v6087_v21, %v5582_v23  ;;  %v6722_v46 = vpop.f32.mrb[145].mxu0 }
 0xe59   : > { %v5585_v5 = vpop.f32.mrb[146].mxu0 }
 0xe5a   : > { %v5586_v22 = vadd.f32 %v6087_v21, %v5585_v5  ;;  %v6723_v18 = vpop.f32.mrb[147].mxu0  ;;  %v5589_v24 = vmax.f32 %v5583_v6, 0.0 }
 0xe5c   : > { %v5590_v38 = vmax.f32 %v5586_v22, 0.0 }
 0xe5e   : > { %v5591_v10 = vpack.c.bf16 %v5590_v38, %v5589_v24 }
 0xe60   : > { %6741 = vmatmul.mubr.bf16.vlgmr.msra.gmra.mrb[144].mxu1 %v5591_v10 }
 0xf33   : > { %v5700_v16 = vpop.f32.mrb[144].mxu1 }
 0xf34   : > { %v5701_v31 = vadd.f32 %v6097_v17, %v5700_v16  ;;  %v6742_v42 = vpop.f32.mrb[145].mxu1 }
 0xf35   : > { %v5703_v40 = vpop.f32.mrb[146].mxu1 }
 0xf36   : > { %v5704_v7 = vadd.f32 %v6097_v17, %v5703_v40  ;;  %v6743_v43 = vpop.f32.mrb[147].mxu1  ;;  %v5707_v34 = vadd.f32 %v5701_v31, %v5470_v29 }
 0xf38   : > { %5713 = vadd.xlane.f32.xlu0 %v5707_v34  ;;  %v5708_v30 = vadd.f32 %v5704_v7, %v5471_v51 }
 0xf3a   : > { %5715 = vadd.xlane.f32.xlu1 %v5708_v30 }
 0xfc5   : > { %v5714_v4 = vpop.xlane.xlu0 %5713 }
 0xfc6   : > { %v5717_v0 = vmul.f32 0.03125, %v5714_v4 }
 0xfc7   : > { %v5716_v33 = vpop.xlane.xlu1 %5715 }
 0xfc8   : > { %v5719_v19 = vsub.f32 %v5707_v34, %v5717_v0  ;;  %v5718_v50 = vmul.f32 0.03125, %v5716_v33 }
 0xfca   : > { %v5720_v52 = vsub.f32 %v5708_v30, %v5718_v50  ;;  %v5721_v55 = vsel %vm167_vm0, %v5719_v19, 0.0 }
 0xfcb   : > { %v5723_v45 = vmul.f32 %v5721_v55, %v5721_v55 }
 0xfcc   : > { %v5722_v14 = vsel %vm167_vm0, %v5720_v52, 0.0 }
 0xfcd   : > { %5725 = vadd.xlane.f32.xlu0 %v5723_v45  ;;  %v5724_v1 = vmul.f32 %v5722_v14, %v5722_v14 }
 0xfcf   : > { %5727 = vadd.xlane.f32.xlu1 %v5724_v1 }
0x105a   : > { %v5726_v56 = vpop.xlane.xlu0 %5725 }
0x105b   : > { %v5729_v35 = vmul.f32 0.03125, %v5726_v56 }
0x105c   : > { %v5728_v61 = vpop.xlane.xlu1 %5727 }
0x105d   : > { %v5731_v15 = vadd.f32 1e-05, %v5729_v35  ;;  %v5730_v27 = vmul.f32 0.03125, %v5728_v61 }
0x105f   : > { %7135 = vrsqrt.f32 %v5731_v15  ;;  %v5732_v62 = vadd.f32 1e-05, %v5730_v27 }
0x1061   : > { %7137 = vrsqrt.f32 %v5732_v62 }
0x1069   : > { %v7136_v2 = vpop.eup %7135 }
0x106a   : > { %v5735_v11 = vmul.f32 %v7136_v2, %v5721_v55 }
0x106b   : > { %v7138_v12 = vpop.eup %7137 }
0x106c   : > { %v5743_v39 = vmul.f32 %v6106_v44, %v5735_v11  ;;  %v5736_v9 = vmul.f32 %v7138_v12, %v5722_v14  ;;  %192 = sbr.rel (!%p190_p8) target bundleno = 164 (0xa4), region = 139 }
0x106e   : > { %v5751_v36 = vadd.f32 %v6107_v26, %v5743_v39   ;;  %v5744_v60 = vmul.f32 %v6106_v44, %v5736_v9 }
0x1070   : > { %v5752_v13 = vadd.f32 %v6107_v26, %v5744_v60   ;;  %v8580_v8 = vmov %v5751_v36 }
0x1071   :  { %v7147_v8 = vld [vmem:[#allocation14 + $0x38] sm:$0xff] (%p190_p8)  }
0x1072   : > { %v8579_v9 = vmov %v5752_v13  ;;  %v5753_v3 = vpack.c.bf16 (%p190_p8), %v5752_v13, %v5751_v36  ;;  %6759 = vmatpush3.bf16.msra.mxu0 (%p190_p8), %v7147_v8 }
0x1075   :  { %6761 = vmatmul.mubr.bf16.vlgmr.msra.gmra.mrb[0].mxu0 %v5753_v3 }
0x1148   :  { %v5859_v53 = vpop.f32.mrb[0].mxu0 }
0x1149   :  { %v5860_v47 = vadd.f32 %v6108_v54, %v5859_v53  ;;  %v6762_v28 = vpop.f32.mrb[1].mxu0 }
0x114a   :  { %v5862_v29 = vpop.f32.mrb[2].mxu0 }
0x114b   :  { %5866 = vst [vmem:[#allocation16] sm:$0xff] %v5860_v47  ;;  %v5863_v51 = vadd.f32 %v6108_v54, %v5862_v29  ;;  %v6763_v41 = vpop.f32.mrb[3].mxu0 }
0x114d   :  { %5867 = vst [vmem:[#allocation16 + $0x8] sm:$0xff] %v5863_v51 }
0x114e   :  { %7335 = shalt.err (!%p7332_p13)
}
0x114f   :  { %s7336_s16 = scalar_lea.hbm %s8540_s17, 256 }
0x1150   :  { %p7337_p0 = scmp.ne.s32.totalorder %s8540_s17, %s7336_s16  ;;  %p7340_p1 = scmp.lt.u32.totalorder %s7336_s16, %s8540_s17 }
0x1152   :  { %p7342_p2 = pnand %p7340_p1, %p7337_p0 }
0x1154   :  { %7345 = shalt.err (!%p7342_p2)
}
0x1155   :  { %s8581_s29 = smov 8   ;;  %s8582_s22 = smov 128  }
0x1156   :  { %5879 = dma.vmem_to_hbm [thread:$0]  %s5874_s10, 256, %s8540_s17, [#allocation4], %s8582_s22, %s8582_s22, %s8581_s29  }
0x1157   :  { %7368 = dma.done.wait [#allocation4], 256  }
0x1158   :  { %7369 = vsyncadd [#allocation4], 4294967040 }
0x1159   :  { %5883 = vsyncpa [#allocation3], 1 }
0x115a   :  { %5884 = vsyncpa [#allocation6], 1 }
0x115b   :  { %5885 = vsyncpa [#allocation9], 1 }
0x115c   :  { %5886 = vsyncpa [#allocation12], 1 }
0x115d   :  { %5887 = vsyncpa [#allocation15], 1 }
0x115e   :  { %5888 = vsyncpa [#allocation4], 1 }

</bundles_post_ra>
